<compile_context>
chip_gen: v6e
topology: v6e:2x2x1
jax: 0.10.0
libtpu: 0.0.40
codegen_flags: <defaults>
</compile_context>

<pallas_src>
import functools

import jax
import jax.numpy as jnp
import numpy as np
from jax.experimental import pallas as pl
from jax.experimental.pallas import tpu as pltpu

EPS = 1e-5


def _full_spec(shape):
    # Whole-array block, gridless call.
    return pl.BlockSpec(shape, lambda: (0,) * len(shape))


# ----------------------------- fused Pallas kernel -----------------------------

def _bn_relu(x, gamma, beta, axes):
    """Training-mode BatchNorm (batch statistics, biased var) + ReLU."""
    mean = jnp.mean(x, axis=axes, keepdims=True)
    var = jnp.mean((x - mean) ** 2, axis=axes, keepdims=True)
    return jnp.maximum(gamma * (x - mean) * jax.lax.rsqrt(var + EPS) + beta, 0.0)


def _taps(pad_ref, Ho, Wo, stride):
    """Read the 9 shifted (stride-subsampled) 3x3 patches of a padded NHWC ref,
    each flattened to (N*Ho*Wo, C), in (i, j, c)-major order."""
    N = pad_ref.shape[0]
    C = pad_ref.shape[-1]
    patches = []
    for i in range(3):
        for j in range(3):
            if stride == 1:
                p = pad_ref[:, i:i + Ho, j:j + Wo, :]
            else:
                # stride folded into the read: rows/cols i, i+s, i+2s, ...
                p = pad_ref[:, pl.ds(i, Ho, stride), pl.ds(j, Wo, stride), :]
            patches.append(p.reshape(N * Ho * Wo, C))
    return patches


def _plain_block_kernel(x_ref, g1_ref, b1_ref, w1_ref, cb1_ref,
                        g2_ref, b2_ref, w2_ref, cb2_ref,
                        o_ref, pad1_ref, pad2_ref, *, stride):
    N, H, W, Cin = x_ref.shape
    _, Ho, Wo, Cout = o_ref.shape

    # --- BatchNorm2d(Cin) + ReLU ------------------------------------------------
    h = _bn_relu(x_ref[...], g1_ref[...], b1_ref[...], (0, 1, 2))

    # --- zero-pad (padding=1) into VMEM scratch, in-kernel -----------------------
    pad1_ref[...] = jnp.zeros(pad1_ref.shape, pad1_ref.dtype)
    pad1_ref[:, 1:H + 1, 1:W + 1, :] = h

    # --- conv1: 3x3, stride s, single im2col MXU matmul --------------------------
    cols = jnp.concatenate(_taps(pad1_ref, Ho, Wo, stride), axis=-1)   # (M, 9*Cin)
    h = jnp.dot(cols, w1_ref[...], preferred_element_type=jnp.float32) + cb1_ref[...]

    # --- BatchNorm2d(Cout) + ReLU on the (M, Cout) matrix ------------------------
    h = _bn_relu(h, g2_ref[...], b2_ref[...], (0,))

    # --- zero-pad again for conv2 -------------------------------------------------
    pad2_ref[...] = jnp.zeros(pad2_ref.shape, pad2_ref.dtype)
    pad2_ref[:, 1:Ho + 1, 1:Wo + 1, :] = h.reshape(N, Ho, Wo, Cout)

    # --- conv2: 3x3, stride 1, single im2col MXU matmul ---------------------------
    cols = jnp.concatenate(_taps(pad2_ref, Ho, Wo, 1), axis=-1)        # (M, 9*Cout)
    h = jnp.dot(cols, w2_ref[...], preferred_element_type=jnp.float32) + cb2_ref[...]

    o_ref[...] = h.reshape(N, Ho, Wo, Cout)


# ----------------------------- wrapper -----------------------------

def plain_block_forward(x_nchw, p):
    """PlainBlock forward: (N, Cin, H, W) -> (N, Cout, Ho, Wo), NCHW like PyTorch."""
    x = jnp.transpose(x_nchw, (0, 2, 3, 1)).astype(jnp.float32)       # NCHW -> NHWC
    N, H, W, Cin = x.shape
    Cout = p["w1"].shape[-1]
    s = 2 if p["downsample"] else 1
    Ho = (H + 2 - 3) // s + 1
    Wo = (W + 2 - 3) // s + 1

    # Pre-flatten weights / params outside the kernel (one-time, free reshapes).
    w1f = p["w1"].reshape(9 * Cin, Cout)        # (i, j, cin)-major rows == tap order
    w2f = p["w2"].reshape(9 * Cout, Cout)
    g1 = p["bn1_g"].reshape(1, 1, 1, Cin)
    b1 = p["bn1_b"].reshape(1, 1, 1, Cin)
    g2 = p["bn2_g"].reshape(1, Cout)
    b2 = p["bn2_b"].reshape(1, Cout)
    cb1 = p["b1"].reshape(1, Cout)
    cb2 = p["b2"].reshape(1, Cout)

    args = (x, g1, b1, w1f, cb1, g2, b2, w2f, cb2)
    out_nhwc = pl.pallas_call(
        functools.partial(_plain_block_kernel, stride=s),
        out_shape=jax.ShapeDtypeStruct((N, Ho, Wo, Cout), jnp.float32),
        in_specs=[_full_spec(a.shape) for a in args],
        out_specs=_full_spec((N, Ho, Wo, Cout)),
        scratch_shapes=[
            pltpu.VMEM((N, H + 2, W + 2, Cin), jnp.float32),    # padded BN1 output
            pltpu.VMEM((N, Ho + 2, Wo + 2, Cout), jnp.float32), # padded BN2 output
        ],
    )(*args)
    return jnp.transpose(out_nhwc, (0, 3, 1, 2))                      # NHWC -> NCHW


# ----------------------------- parameters -----------------------------

def init_plain_block(key, Cin, Cout, downsample):
    ks = jax.random.split(key, 4)
    return {
        "downsample": downsample,
        "bn1_g": jnp.ones((Cin,), jnp.float32),
        "bn1_b": jnp.zeros((Cin,), jnp.float32),
        "w1": 0.1 * jax.random.normal(ks[0], (3, 3, Cin, Cout), jnp.float32),
        "b1": 0.1 * jax.random.normal(ks[1], (Cout,), jnp.float32),
        "bn2_g": jnp.ones((Cout,), jnp.float32),
        "bn2_b": jnp.zeros((Cout,), jnp.float32),
        "w2": 0.1 * jax.random.normal(ks[2], (3, 3, Cout, Cout), jnp.float32),
        "b2": 0.1 * jax.random.normal(ks[3], (Cout,), jnp.float32),
    }


# ----------------------------- pure-JAX reference -----------------------------

def _ref_bn_relu(x, g, b):
    mean = jnp.mean(x, axis=(0, 1, 2), keepdims=True)
    var = jnp.mean((x - mean) ** 2, axis=(0, 1, 2), keepdims=True)
    return jnp.maximum(g * (x - mean) * jax.lax.rsqrt(var + EPS) + b, 0.0)


def _ref_conv(x, w, b, stride):
    y = jax.lax.conv_general_dilated(
        x, w, (stride, stride), [(1, 1), (1, 1)],
        dimension_numbers=("NHWC", "HWIO", "NHWC"))
    return y + b.reshape(1, 1, 1, -1)


def ref_plain_block(x_nchw, p):
    x = jnp.transpose(x_nchw, (0, 2, 3, 1)).astype(jnp.float32)
    s = 2 if p["downsample"] else 1
    h = _ref_bn_relu(x, p["bn1_g"].reshape(1, 1, 1, -1), p["bn1_b"].reshape(1, 1, 1, -1))
    h = _ref_conv(h, p["w1"], p["b1"], s)
    h = _ref_bn_relu(h, p["bn2_g"].reshape(1, 1, 1, -1), p["bn2_b"].reshape(1, 1, 1, -1))
    h = _ref_conv(h, p["w2"], p["b2"], 1)
    return jnp.transpose(h, (0, 3, 1, 2))


# ----------------------------- main -----------------------------

if __name__ == "__main__":
    key = jax.random.PRNGKey(0)
    k_x, k_p1, k_p2 = jax.random.split(key, 3)

    Cin, Cout = 4, 8
    x = jax.random.normal(k_x, (2, Cin, 16, 16), jnp.float32)   # NCHW like PyTorch

    configs = (
        ("downsample", init_plain_block(k_p1, Cin, Cout, True)),    # stride-2 conv1
        ("unit_stride", init_plain_block(k_p2, Cin, Cout, False)),  # stride-1 conv1
    )
    for name, params in configs:
        out = jax.block_until_ready(plain_block_forward(x, params))
        ref = jax.block_until_ready(ref_plain_block(x, params))
        s = 2 if params["downsample"] else 1
        assert out.shape == (2, Cout, 16 // s, 16 // s), (name, out.shape)
        np.testing.assert_allclose(np.asarray(out), np.asarray(ref),
                                   atol=1e-3, rtol=1e-3, err_msg=name)

    print("KERNEL_OK")
</pallas_src>

<mosaic_0001>
module attributes {stable_mosaic.version = 11 : i64} {
  func.func @_plain_block_kernel(%arg0: memref<2x16x16x4xf32, #tpu.memory_space<vmem>>, %arg1: memref<1x1x1x4xf32, #tpu.memory_space<vmem>>, %arg2: memref<1x1x1x4xf32, #tpu.memory_space<vmem>>, %arg3: memref<36x8xf32, #tpu.memory_space<vmem>>, %arg4: memref<1x8xf32, #tpu.memory_space<vmem>>, %arg5: memref<1x8xf32, #tpu.memory_space<vmem>>, %arg6: memref<1x8xf32, #tpu.memory_space<vmem>>, %arg7: memref<72x8xf32, #tpu.memory_space<vmem>>, %arg8: memref<1x8xf32, #tpu.memory_space<vmem>>, %arg9: memref<2x8x8x8xf32, #tpu.memory_space<vmem>>, %arg10: memref<2x18x18x4xf32, #tpu.memory_space<vmem>>, %arg11: memref<2x10x10x8xf32, #tpu.memory_space<vmem>>) attributes {dimension_semantics = [], scalar_prefetch = 0 : i64, scratch_operands = 2 : i64, tpu.core_type = #tpu.core_type<tc>} {
    %c0 = arith.constant 0 : index
    %c0_0 = arith.constant 0 : index
    %c0_1 = arith.constant 0 : index
    %c0_2 = arith.constant 0 : index
    %0 = vector.load %arg0[%c0, %c0_0, %c0_1, %c0_2] : memref<2x16x16x4xf32, #tpu.memory_space<vmem>>, vector<2x16x16x4xf32>
    %c0_3 = arith.constant 0 : index
    %c0_4 = arith.constant 0 : index
    %c0_5 = arith.constant 0 : index
    %c0_6 = arith.constant 0 : index
    %1 = vector.load %arg1[%c0_3, %c0_4, %c0_5, %c0_6] : memref<1x1x1x4xf32, #tpu.memory_space<vmem>>, vector<1x1x1x4xf32>
    %c0_7 = arith.constant 0 : index
    %c0_8 = arith.constant 0 : index
    %c0_9 = arith.constant 0 : index
    %c0_10 = arith.constant 0 : index
    %2 = vector.load %arg2[%c0_7, %c0_8, %c0_9, %c0_10] : memref<1x1x1x4xf32, #tpu.memory_space<vmem>>, vector<1x1x1x4xf32>
    %cst = arith.constant dense<0.000000e+00> : vector<4xf32>
    %3 = vector.multi_reduction <add>, %0, %cst [0, 1, 2] : vector<2x16x16x4xf32> to vector<4xf32>
    %4 = vector.shape_cast %3 : vector<4xf32> to vector<1x1x1x4xf32>
    %cst_11 = arith.constant 5.120000e+02 : f32
    %5 = vector.broadcast %cst_11 : f32 to vector<1x1x1x4xf32>
    %6 = arith.divf %4, %5 : vector<1x1x1x4xf32>
    %7 = vector.broadcast %6 : vector<1x1x1x4xf32> to vector<2x16x16x4xf32>
    %8 = arith.subf %0, %7 : vector<2x16x16x4xf32>
    %9 = arith.mulf %8, %8 : vector<2x16x16x4xf32>
    %cst_12 = arith.constant dense<0.000000e+00> : vector<4xf32>
    %10 = vector.multi_reduction <add>, %9, %cst_12 [0, 1, 2] : vector<2x16x16x4xf32> to vector<4xf32>
    %11 = vector.shape_cast %10 : vector<4xf32> to vector<1x1x1x4xf32>
    %cst_13 = arith.constant 5.120000e+02 : f32
    %12 = vector.broadcast %cst_13 : f32 to vector<1x1x1x4xf32>
    %13 = arith.divf %11, %12 : vector<1x1x1x4xf32>
    %14 = vector.broadcast %6 : vector<1x1x1x4xf32> to vector<2x16x16x4xf32>
    %15 = arith.subf %0, %14 : vector<2x16x16x4xf32>
    %16 = vector.broadcast %1 : vector<1x1x1x4xf32> to vector<2x16x16x4xf32>
    %17 = arith.mulf %16, %15 : vector<2x16x16x4xf32>
    %cst_14 = arith.constant 9.99999974E-6 : f32
    %18 = vector.broadcast %cst_14 : f32 to vector<1x1x1x4xf32>
    %19 = arith.addf %13, %18 : vector<1x1x1x4xf32>
    %20 = math.rsqrt %19 : vector<1x1x1x4xf32>
    %21 = vector.broadcast %20 : vector<1x1x1x4xf32> to vector<2x16x16x4xf32>
    %22 = arith.mulf %17, %21 : vector<2x16x16x4xf32>
    %23 = vector.broadcast %2 : vector<1x1x1x4xf32> to vector<2x16x16x4xf32>
    %24 = arith.addf %22, %23 : vector<2x16x16x4xf32>
    %cst_15 = arith.constant 0.000000e+00 : f32
    %25 = vector.broadcast %cst_15 : f32 to vector<2x16x16x4xf32>
    %26 = arith.maximumf %24, %25 : vector<2x16x16x4xf32>
    %cst_16 = arith.constant 0.000000e+00 : f32
    %27 = vector.broadcast %cst_16 : f32 to vector<2x18x18x4xf32>
    %c0_17 = arith.constant 0 : index
    %c0_18 = arith.constant 0 : index
    %c0_19 = arith.constant 0 : index
    %c0_20 = arith.constant 0 : index
    %28 = vector.load %arg10[%c0_17, %c0_18, %c0_19, %c0_20] : memref<2x18x18x4xf32, #tpu.memory_space<vmem>>, vector<2x18x18x4xf32>
    tpu.vector_store %arg10[%c0_17, %c0_18, %c0_19, %c0_20], %27 {strides = array<i32>} : memref<2x18x18x4xf32, #tpu.memory_space<vmem>>, vector<2x18x18x4xf32>,
    %c0_21 = arith.constant 0 : index
    %c1 = arith.constant 1 : index
    %c1_22 = arith.constant 1 : index
    %c0_23 = arith.constant 0 : index
    %29 = vector.load %arg10[%c0_21, %c1, %c1_22, %c0_23] : memref<2x18x18x4xf32, #tpu.memory_space<vmem>>, vector<2x16x16x4xf32>
    tpu.vector_store %arg10[%c0_21, %c1, %c1_22, %c0_23], %26 {strides = array<i32>} : memref<2x18x18x4xf32, #tpu.memory_space<vmem>>, vector<2x16x16x4xf32>,
    %c0_24 = arith.constant 0 : index
    %c0_25 = arith.constant 0 : index
    %c0_26 = arith.constant 0 : index
    %c0_27 = arith.constant 0 : index
    %30 = tpu.strided_load %arg10[%c0_24, %c0_25, %c0_26, %c0_27] {strides = array<i32: 1, 2, 2, 1>} : memref<2x18x18x4xf32, #tpu.memory_space<vmem>>, vector<2x8x8x4xf32>
    %31 = vector.shape_cast %30 : vector<2x8x8x4xf32> to vector<128x4xf32>
    %c0_28 = arith.constant 0 : index
    %c0_29 = arith.constant 0 : index
    %c1_30 = arith.constant 1 : index
    %c0_31 = arith.constant 0 : index
    %32 = tpu.strided_load %arg10[%c0_28, %c0_29, %c1_30, %c0_31] {strides = array<i32: 1, 2, 2, 1>} : memref<2x18x18x4xf32, #tpu.memory_space<vmem>>, vector<2x8x8x4xf32>
    %33 = vector.shape_cast %32 : vector<2x8x8x4xf32> to vector<128x4xf32>
    %c0_32 = arith.constant 0 : index
    %c0_33 = arith.constant 0 : index
    %c2 = arith.constant 2 : index
    %c0_34 = arith.constant 0 : index
    %34 = tpu.strided_load %arg10[%c0_32, %c0_33, %c2, %c0_34] {strides = array<i32: 1, 2, 2, 1>} : memref<2x18x18x4xf32, #tpu.memory_space<vmem>>, vector<2x8x8x4xf32>
    %35 = vector.shape_cast %34 : vector<2x8x8x4xf32> to vector<128x4xf32>
    %c0_35 = arith.constant 0 : index
    %c1_36 = arith.constant 1 : index
    %c0_37 = arith.constant 0 : index
    %c0_38 = arith.constant 0 : index
    %36 = tpu.strided_load %arg10[%c0_35, %c1_36, %c0_37, %c0_38] {strides = array<i32: 1, 2, 2, 1>} : memref<2x18x18x4xf32, #tpu.memory_space<vmem>>, vector<2x8x8x4xf32>
    %37 = vector.shape_cast %36 : vector<2x8x8x4xf32> to vector<128x4xf32>
    %c0_39 = arith.constant 0 : index
    %c1_40 = arith.constant 1 : index
    %c1_41 = arith.constant 1 : index
    %c0_42 = arith.constant 0 : index
    %38 = tpu.strided_load %arg10[%c0_39, %c1_40, %c1_41, %c0_42] {strides = array<i32: 1, 2, 2, 1>} : memref<2x18x18x4xf32, #tpu.memory_space<vmem>>, vector<2x8x8x4xf32>
    %39 = vector.shape_cast %38 : vector<2x8x8x4xf32> to vector<128x4xf32>
    %c0_43 = arith.constant 0 : index
    %c1_44 = arith.constant 1 : index
    %c2_45 = arith.constant 2 : index
    %c0_46 = arith.constant 0 : index
    %40 = tpu.strided_load %arg10[%c0_43, %c1_44, %c2_45, %c0_46] {strides = array<i32: 1, 2, 2, 1>} : memref<2x18x18x4xf32, #tpu.memory_space<vmem>>, vector<2x8x8x4xf32>
    %41 = vector.shape_cast %40 : vector<2x8x8x4xf32> to vector<128x4xf32>
    %c0_47 = arith.constant 0 : index
    %c2_48 = arith.constant 2 : index
    %c0_49 = arith.constant 0 : index
    %c0_50 = arith.constant 0 : index
    %42 = tpu.strided_load %arg10[%c0_47, %c2_48, %c0_49, %c0_50] {strides = array<i32: 1, 2, 2, 1>} : memref<2x18x18x4xf32, #tpu.memory_space<vmem>>, vector<2x8x8x4xf32>
    %43 = vector.shape_cast %42 : vector<2x8x8x4xf32> to vector<128x4xf32>
    %c0_51 = arith.constant 0 : index
    %c2_52 = arith.constant 2 : index
    %c1_53 = arith.constant 1 : index
    %c0_54 = arith.constant 0 : index
    %44 = tpu.strided_load %arg10[%c0_51, %c2_52, %c1_53, %c0_54] {strides = array<i32: 1, 2, 2, 1>} : memref<2x18x18x4xf32, #tpu.memory_space<vmem>>, vector<2x8x8x4xf32>
    %45 = vector.shape_cast %44 : vector<2x8x8x4xf32> to vector<128x4xf32>
    %c0_55 = arith.constant 0 : index
    %c2_56 = arith.constant 2 : index
    %c2_57 = arith.constant 2 : index
    %c0_58 = arith.constant 0 : index
    %46 = tpu.strided_load %arg10[%c0_55, %c2_56, %c2_57, %c0_58] {strides = array<i32: 1, 2, 2, 1>} : memref<2x18x18x4xf32, #tpu.memory_space<vmem>>, vector<2x8x8x4xf32>
    %47 = vector.shape_cast %46 : vector<2x8x8x4xf32> to vector<128x4xf32>
    %48 = tpu.concatenate %31, %33, %35, %37, %39, %41, %43, %45, %47 in 1 : vector<128x4xf32>, vector<128x4xf32>, vector<128x4xf32>, vector<128x4xf32>, vector<128x4xf32>, vector<128x4xf32>, vector<128x4xf32>, vector<128x4xf32>, vector<128x4xf32> -> vector<128x36xf32>
    %c0_59 = arith.constant 0 : index
    %c0_60 = arith.constant 0 : index
    %49 = vector.load %arg3[%c0_59, %c0_60] : memref<36x8xf32, #tpu.memory_space<vmem>>, vector<36x8xf32>
    %cst_61 = arith.constant dense<0.000000e+00> : vector<128x8xf32>
    %50 = tpu.matmul %48, %49, %cst_61 {dimension_numbers = #tpu.dot_dimension_numbers<[1], [0], [0], [1], [0, 0, 1, 1], [], []>} : vector<128x36xf32>, vector<36x8xf32>, vector<128x8xf32> -> vector<128x8xf32>
    %c0_62 = arith.constant 0 : index
    %c0_63 = arith.constant 0 : index
    %51 = vector.load %arg4[%c0_62, %c0_63] : memref<1x8xf32, #tpu.memory_space<vmem>>, vector<1x8xf32>
    %52 = vector.broadcast %51 : vector<1x8xf32> to vector<128x8xf32>
    %53 = arith.addf %50, %52 : vector<128x8xf32>
    %c0_64 = arith.constant 0 : index
    %c0_65 = arith.constant 0 : index
    %54 = vector.load %arg5[%c0_64, %c0_65] : memref<1x8xf32, #tpu.memory_space<vmem>>, vector<1x8xf32>
    %c0_66 = arith.constant 0 : index
    %c0_67 = arith.constant 0 : index
    %55 = vector.load %arg6[%c0_66, %c0_67] : memref<1x8xf32, #tpu.memory_space<vmem>>, vector<1x8xf32>
    %cst_68 = arith.constant dense<0.000000e+00> : vector<8xf32>
    %56 = vector.multi_reduction <add>, %53, %cst_68 [0] : vector<128x8xf32> to vector<8xf32>
    %57 = vector.shape_cast %56 : vector<8xf32> to vector<1x8xf32>
    %cst_69 = arith.constant 1.280000e+02 : f32
    %58 = vector.broadcast %cst_69 : f32 to vector<1x8xf32>
    %59 = arith.divf %57, %58 : vector<1x8xf32>
    %60 = vector.broadcast %59 : vector<1x8xf32> to vector<128x8xf32>
    %61 = arith.subf %53, %60 : vector<128x8xf32>
    %62 = arith.mulf %61, %61 : vector<128x8xf32>
    %cst_70 = arith.constant dense<0.000000e+00> : vector<8xf32>
    %63 = vector.multi_reduction <add>, %62, %cst_70 [0] : vector<128x8xf32> to vector<8xf32>
    %64 = vector.shape_cast %63 : vector<8xf32> to vector<1x8xf32>
    %cst_71 = arith.constant 1.280000e+02 : f32
    %65 = vector.broadcast %cst_71 : f32 to vector<1x8xf32>
    %66 = arith.divf %64, %65 : vector<1x8xf32>
    %67 = vector.broadcast %59 : vector<1x8xf32> to vector<128x8xf32>
    %68 = arith.subf %53, %67 : vector<128x8xf32>
    %69 = vector.broadcast %54 : vector<1x8xf32> to vector<128x8xf32>
    %70 = arith.mulf %69, %68 : vector<128x8xf32>
    %cst_72 = arith.constant 9.99999974E-6 : f32
    %71 = vector.broadcast %cst_72 : f32 to vector<1x8xf32>
    %72 = arith.addf %66, %71 : vector<1x8xf32>
    %73 = math.rsqrt %72 : vector<1x8xf32>
    %74 = vector.broadcast %73 : vector<1x8xf32> to vector<128x8xf32>
    %75 = arith.mulf %70, %74 : vector<128x8xf32>
    %76 = vector.broadcast %55 : vector<1x8xf32> to vector<128x8xf32>
    %77 = arith.addf %75, %76 : vector<128x8xf32>
    %cst_73 = arith.constant 0.000000e+00 : f32
    %78 = vector.broadcast %cst_73 : f32 to vector<128x8xf32>
    %79 = arith.maximumf %77, %78 : vector<128x8xf32>
    %cst_74 = arith.constant 0.000000e+00 : f32
    %80 = vector.broadcast %cst_74 : f32 to vector<2x10x10x8xf32>
    %c0_75 = arith.constant 0 : index
    %c0_76 = arith.constant 0 : index
    %c0_77 = arith.constant 0 : index
    %c0_78 = arith.constant 0 : index
    %81 = vector.load %arg11[%c0_75, %c0_76, %c0_77, %c0_78] : memref<2x10x10x8xf32, #tpu.memory_space<vmem>>, vector<2x10x10x8xf32>
    tpu.vector_store %arg11[%c0_75, %c0_76, %c0_77, %c0_78], %80 {strides = array<i32>} : memref<2x10x10x8xf32, #tpu.memory_space<vmem>>, vector<2x10x10x8xf32>,
    %82 = vector.shape_cast %79 : vector<128x8xf32> to vector<2x8x8x8xf32>
    %c0_79 = arith.constant 0 : index
    %c1_80 = arith.constant 1 : index
    %c1_81 = arith.constant 1 : index
    %c0_82 = arith.constant 0 : index
    %83 = vector.load %arg11[%c0_79, %c1_80, %c1_81, %c0_82] : memref<2x10x10x8xf32, #tpu.memory_space<vmem>>, vector<2x8x8x8xf32>
    tpu.vector_store %arg11[%c0_79, %c1_80, %c1_81, %c0_82], %82 {strides = array<i32>} : memref<2x10x10x8xf32, #tpu.memory_space<vmem>>, vector<2x8x8x8xf32>,
    %c0_83 = arith.constant 0 : index
    %c0_84 = arith.constant 0 : index
    %c0_85 = arith.constant 0 : index
    %c0_86 = arith.constant 0 : index
    %84 = vector.load %arg11[%c0_83, %c0_84, %c0_85, %c0_86] : memref<2x10x10x8xf32, #tpu.memory_space<vmem>>, vector<2x8x8x8xf32>
    %85 = vector.shape_cast %84 : vector<2x8x8x8xf32> to vector<128x8xf32>
    %c0_87 = arith.constant 0 : index
    %c0_88 = arith.constant 0 : index
    %c1_89 = arith.constant 1 : index
    %c0_90 = arith.constant 0 : index
    %86 = vector.load %arg11[%c0_87, %c0_88, %c1_89, %c0_90] : memref<2x10x10x8xf32, #tpu.memory_space<vmem>>, vector<2x8x8x8xf32>
    %87 = vector.shape_cast %86 : vector<2x8x8x8xf32> to vector<128x8xf32>
    %c0_91 = arith.constant 0 : index
    %c0_92 = arith.constant 0 : index
    %c2_93 = arith.constant 2 : index
    %c0_94 = arith.constant 0 : index
    %88 = vector.load %arg11[%c0_91, %c0_92, %c2_93, %c0_94] : memref<2x10x10x8xf32, #tpu.memory_space<vmem>>, vector<2x8x8x8xf32>
    %89 = vector.shape_cast %88 : vector<2x8x8x8xf32> to vector<128x8xf32>
    %c0_95 = arith.constant 0 : index
    %c1_96 = arith.constant 1 : index
    %c0_97 = arith.constant 0 : index
    %c0_98 = arith.constant 0 : index
    %90 = vector.load %arg11[%c0_95, %c1_96, %c0_97, %c0_98] : memref<2x10x10x8xf32, #tpu.memory_space<vmem>>, vector<2x8x8x8xf32>
    %91 = vector.shape_cast %90 : vector<2x8x8x8xf32> to vector<128x8xf32>
    %c0_99 = arith.constant 0 : index
    %c1_100 = arith.constant 1 : index
    %c1_101 = arith.constant 1 : index
    %c0_102 = arith.constant 0 : index
    %92 = vector.load %arg11[%c0_99, %c1_100, %c1_101, %c0_102] : memref<2x10x10x8xf32, #tpu.memory_space<vmem>>, vector<2x8x8x8xf32>
    %93 = vector.shape_cast %92 : vector<2x8x8x8xf32> to vector<128x8xf32>
    %c0_103 = arith.constant 0 : index
    %c1_104 = arith.constant 1 : index
    %c2_105 = arith.constant 2 : index
    %c0_106 = arith.constant 0 : index
    %94 = vector.load %arg11[%c0_103, %c1_104, %c2_105, %c0_106] : memref<2x10x10x8xf32, #tpu.memory_space<vmem>>, vector<2x8x8x8xf32>
    %95 = vector.shape_cast %94 : vector<2x8x8x8xf32> to vector<128x8xf32>
    %c0_107 = arith.constant 0 : index
    %c2_108 = arith.constant 2 : index
    %c0_109 = arith.constant 0 : index
    %c0_110 = arith.constant 0 : index
    %96 = vector.load %arg11[%c0_107, %c2_108, %c0_109, %c0_110] : memref<2x10x10x8xf32, #tpu.memory_space<vmem>>, vector<2x8x8x8xf32>
    %97 = vector.shape_cast %96 : vector<2x8x8x8xf32> to vector<128x8xf32>
    %c0_111 = arith.constant 0 : index
    %c2_112 = arith.constant 2 : index
    %c1_113 = arith.constant 1 : index
    %c0_114 = arith.constant 0 : index
    %98 = vector.load %arg11[%c0_111, %c2_112, %c1_113, %c0_114] : memref<2x10x10x8xf32, #tpu.memory_space<vmem>>, vector<2x8x8x8xf32>
    %99 = vector.shape_cast %98 : vector<2x8x8x8xf32> to vector<128x8xf32>
    %c0_115 = arith.constant 0 : index
    %c2_116 = arith.constant 2 : index
    %c2_117 = arith.constant 2 : index
    %c0_118 = arith.constant 0 : index
    %100 = vector.load %arg11[%c0_115, %c2_116, %c2_117, %c0_118] : memref<2x10x10x8xf32, #tpu.memory_space<vmem>>, vector<2x8x8x8xf32>
    %101 = vector.shape_cast %100 : vector<2x8x8x8xf32> to vector<128x8xf32>
    %102 = tpu.concatenate %85, %87, %89, %91, %93, %95, %97, %99, %101 in 1 : vector<128x8xf32>, vector<128x8xf32>, vector<128x8xf32>, vector<128x8xf32>, vector<128x8xf32>, vector<128x8xf32>, vector<128x8xf32>, vector<128x8xf32>, vector<128x8xf32> -> vector<128x72xf32>
    %c0_119 = arith.constant 0 : index
    %c0_120 = arith.constant 0 : index
    %103 = vector.load %arg7[%c0_119, %c0_120] : memref<72x8xf32, #tpu.memory_space<vmem>>, vector<72x8xf32>
    %cst_121 = arith.constant dense<0.000000e+00> : vector<128x8xf32>
    %104 = tpu.matmul %102, %103, %cst_121 {dimension_numbers = #tpu.dot_dimension_numbers<[1], [0], [0], [1], [0, 0, 1, 1], [], []>} : vector<128x72xf32>, vector<72x8xf32>, vector<128x8xf32> -> vector<128x8xf32>
    %c0_122 = arith.constant 0 : index
    %c0_123 = arith.constant 0 : index
    %105 = vector.load %arg8[%c0_122, %c0_123] : memref<1x8xf32, #tpu.memory_space<vmem>>, vector<1x8xf32>
    %106 = vector.broadcast %105 : vector<1x8xf32> to vector<128x8xf32>
    %107 = arith.addf %104, %106 : vector<128x8xf32>
    %108 = vector.shape_cast %107 : vector<128x8xf32> to vector<2x8x8x8xf32>
    %c0_124 = arith.constant 0 : index
    %c0_125 = arith.constant 0 : index
    %c0_126 = arith.constant 0 : index
    %c0_127 = arith.constant 0 : index
    %109 = vector.load %arg9[%c0_124, %c0_125, %c0_126, %c0_127] : memref<2x8x8x8xf32, #tpu.memory_space<vmem>>, vector<2x8x8x8xf32>
    tpu.vector_store %arg9[%c0_124, %c0_125, %c0_126, %c0_127], %108 {strides = array<i32>} : memref<2x8x8x8xf32, #tpu.memory_space<vmem>>, vector<2x8x8x8xf32>,
    return
  }
}

</mosaic_0001>

<bundles_post_ra>
// kernel: tpu_custom_call.1
= control target key start
LH: loop header
LB: loop body
LE: loop exit
PB: predicated region body
PF: predicated region fallthrough
CT: control target
= control target key end

     0   :  { %vm99_vm0 = vcmask 31744   ;;  %vm769_vm1 = vcmask 25600   ;;  %v6377_v1 = vmov 0.0   ;;  %s3677_s23 = smov 8   ;;  %s3678_s24 = smov 4   ;;  %s6367_s0 = inlined_call_operand.vmem [shape: f32[2,16,16,4], index: 0, kind: input, shape index: {}]   ;;  %s6368_s1 = inlined_call_operand.vmem [shape: f32[1,1,1,4], index: 1, kind: input, shape index: {}]   ;;  %s6369_s2 = inlined_call_operand.vmem [shape: f32[1,1,1,4], index: 2, kind: input, shape index: {}]   ;;  %s6370_s3 = inlined_call_operand.vmem [shape: f32[36,8], index: 3, kind: input, shape index: {}]   ;;  %s6371_s4 = inlined_call_operand.vmem [shape: f32[1,8], index: 4, kind: input, shape index: {}]   ;;  %s6372_s5 = inlined_call_operand.vmem [shape: f32[1,8], index: 5, kind: input, shape index: {}]   ;;  %s6373_s6 = inlined_call_operand.vmem [shape: f32[1,8], index: 6, kind: input, shape index: {}]   ;;  %s6374_s7 = inlined_call_operand.vmem [shape: f32[72,8], index: 7, kind: input, shape index: {}]   ;;  %s6375_s8 = inlined_call_operand.vmem [shape: f32[1,8], index: 8, kind: input, shape index: {}]   ;;  %s6376_s9 = inlined_call_operand.hbm [shape: f32[2,8,8,8], index: 9, kind: output, shape index: {}]  }
   0x1   :  { %v3744_v0 = vld [vmem:[%s6367_s0] sm:$0xff]  ;;  %767 = vst.msk [vmem:[#allocation2] sm:$0xff] %vm99_vm0, %v6377_v1  ;;  %768 = vst.msk [vmem:[#allocation2 + $0x8] sm:$0xff] %vm99_vm0, %v6377_v1  ;;  %v3953_v2 = vld [vmem:[%s6367_s0 + $0x8] sm:$0xff] }
   0x2   :  { %770 = vst.msk [vmem:[#allocation2 + $0x10] sm:$0x3] %vm769_vm1, %v6377_v1  ;;  %773 = vst.msk [vmem:[#allocation2 + $0x28] sm:$0x3] %vm769_vm1, %v6377_v1  ;;  %v3958_v3 = vld [vmem:[%s6367_s0 + $0x10] sm:$0xff]  ;;  %v3963_v4 = vld [vmem:[%s6367_s0 + $0x18] sm:$0xff] }
   0x3   :  { %771 = vst.msk [vmem:[#allocation2 + $0x18] sm:$0xff] %vm99_vm0, %v6377_v1  ;;  %772 = vst.msk [vmem:[#allocation2 + $0x20] sm:$0xff] %vm99_vm0, %v6377_v1  ;;  %v100_v5 = vsel %vm99_vm0, %v3744_v0, 0.0  ;;  %v101_v6 = vsel %vm99_vm0, %v3953_v2, 0.0  ;;  %v103_v7 = vsel %vm99_vm0, %v3958_v3, 0.0  ;;  %v3974_v8 = vld [vmem:[%s6367_s0 + $0x20] sm:$0xff] }
   0x4   :  { %774 = vst.msk [vmem:[#allocation2 + $0x30] sm:$0xff] %vm99_vm0, %v6377_v1  ;;  %775 = vst.msk [vmem:[#allocation2 + $0x38] sm:$0xff] %vm99_vm0, %v6377_v1  ;;  %v102_v9 = vadd.f32 %v101_v6, %v100_v5  ;;  %v105_v10 = vsel %vm99_vm0, %v3963_v4, 0.0  ;;  %v3981_v11 = vld [vmem:[%s6367_s0 + $0x28] sm:$0xff]  ;;  %v107_v13 = vsel %vm99_vm0, %v3974_v8, 0.0  ;;  %v3988_v14 = vld [vmem:[%s6367_s0 + $0x30] sm:$0xff] }
   0x5   :  { %776 = vst.msk [vmem:[#allocation2 + $0x40] sm:$0x3] %vm769_vm1, %v6377_v1  ;;  %779 = vst.msk [vmem:[#allocation2 + $0x58] sm:$0x3] %vm769_vm1, %v6377_v1  ;;  %v109_v18 = vsel %vm99_vm0, %v3981_v11, 0.0  ;;  %v3997_v19 = vld [vmem:[%s6367_s0 + $0x38] sm:$0xff] }
   0x6   :  { %777 = vst.msk [vmem:[#allocation2 + $0x48] sm:$0xff] %vm99_vm0, %v6377_v1  ;;  %778 = vst.msk [vmem:[#allocation2 + $0x50] sm:$0xff] %vm99_vm0, %v6377_v1  ;;  %v104_v12 = vadd.f32 %v103_v7, %v102_v9  ;;  %v111_v23 = vsel %vm99_vm0, %v3988_v14, 0.0  ;;  %v4004_v24 = vld [vmem:[%s6367_s0 + $0x40] sm:$0xff]  ;;  %v113_v26 = vsel %vm99_vm0, %v3997_v19, 0.0  ;;  %v4013_v27 = vld [vmem:[%s6367_s0 + $0x48] sm:$0xff] }
   0x7   :  { %780 = vst.msk [vmem:[#allocation2 + $0x60] sm:$0xff] %vm99_vm0, %v6377_v1  ;;  %781 = vst.msk [vmem:[#allocation2 + $0x68] sm:$0xff] %vm99_vm0, %v6377_v1  ;;  %v115_v29 = vsel %vm99_vm0, %v4004_v24, 0.0  ;;  %v4020_v30 = vld [vmem:[%s6367_s0 + $0x50] sm:$0xff]  ;;  %v117_v32 = vsel %vm99_vm0, %v4013_v27, 0.0  ;;  %v4027_v33 = vld [vmem:[%s6367_s0 + $0x58] sm:$0xff] }
   0x8   :  { %782 = vst.msk [vmem:[#allocation2 + $0x70] sm:$0x3] %vm769_vm1, %v6377_v1  ;;  %785 = vst.msk [vmem:[#allocation2 + $0x88] sm:$0x3] %vm769_vm1, %v6377_v1  ;;  %v106_v15 = vadd.f32 %v105_v10, %v104_v12  ;;  %v973_v17 = vld [vmem:[#allocation2 + $0x1] ss:$2 sm:$0xff] }
   0x9   :  { %783 = vst.msk [vmem:[#allocation2 + $0x78] sm:$0xff] %vm99_vm0, %v6377_v1  ;;  %784 = vst.msk [vmem:[#allocation2 + $0x80] sm:$0xff] %vm99_vm0, %v6377_v1  ;;  %v1005_v16 = vld [vmem:[#allocation2 + $0x2] ss:$2 sm:$0xff]  ;;  %1243 = vrot.lane.b32.xlu0 %v973_v17, %s3678_s24  ;;  %v119_v35 = vsel %vm99_vm0, %v4020_v30, 0.0  ;;  %v121_v38 = vsel %vm99_vm0, %v4027_v33, 0.0 }
   0xa   :  { %786 = vst.msk [vmem:[#allocation2 + $0x90] sm:$0xff] %vm99_vm0, %v6377_v1  ;;  %787 = vst.msk [vmem:[#allocation2 + $0x98] sm:$0xff] %vm99_vm0, %v6377_v1  ;;  %1307 = vrot.lane.b32.xlu1 %v1005_v16, %s3677_s23  ;;  %v108_v20 = vadd.f32 %v107_v13, %v106_v15  ;;  %v4034_v36 = vld [vmem:[%s6367_s0 + $0x60] sm:$0xff]  ;;  %v4041_v39 = vld [vmem:[%s6367_s0 + $0x68] sm:$0xff] }
   0xb   :  { %788 = vst.msk [vmem:[#allocation2 + $0xa0] sm:$0x3] %vm769_vm1, %v6377_v1  ;;  %791 = vst.msk [vmem:[#allocation2 + $0xb8] sm:$0x3] %vm769_vm1, %v6377_v1  ;;  %v123_v41 = vsel %vm99_vm0, %v4034_v36, 0.0  ;;  %v4048_v42 = vld [vmem:[%s6367_s0 + $0x70] sm:$0xff] }
   0xc   :  { %789 = vst.msk [vmem:[#allocation2 + $0xa8] sm:$0xff] %vm99_vm0, %v6377_v1  ;;  %790 = vst.msk [vmem:[#allocation2 + $0xb0] sm:$0xff] %vm99_vm0, %v6377_v1  ;;  %v110_v25 = vadd.f32 %v109_v18, %v108_v20  ;;  %v125_v44 = vsel %vm99_vm0, %v4041_v39, 0.0  ;;  %v4055_v45 = vld [vmem:[%s6367_s0 + $0x78] sm:$0xff] }
   0xd   :  { %792 = vst.msk [vmem:[#allocation2 + $0xc0] sm:$0xff] %vm99_vm0, %v6377_v1  ;;  %793 = vst.msk [vmem:[#allocation2 + $0xc8] sm:$0xff] %vm99_vm0, %v6377_v1 }
   0xe   :  { %794 = vst.msk [vmem:[#allocation2 + $0xd0] sm:$0x3] %vm769_vm1, %v6377_v1  ;;  %797 = vst.msk [vmem:[#allocation2 + $0xe8] sm:$0x3] %vm769_vm1, %v6377_v1  ;;  %v112_v28 = vadd.f32 %v111_v23, %v110_v25 }
   0xf   :  { %795 = vst.msk [vmem:[#allocation2 + $0xd8] sm:$0xff] %vm99_vm0, %v6377_v1  ;;  %796 = vst.msk [vmem:[#allocation2 + $0xe0] sm:$0xff] %vm99_vm0, %v6377_v1 }
  0x10   :  { %798 = vst.msk [vmem:[#allocation2 + $0xf0] sm:$0xff] %vm99_vm0, %v6377_v1  ;;  %799 = vst.msk [vmem:[#allocation2 + $0xf8] sm:$0xff] %vm99_vm0, %v6377_v1  ;;  %v114_v31 = vadd.f32 %v113_v26, %v112_v28 }
  0x11   :  { %800 = vst.msk [vmem:[#allocation2 + $0x100] sm:$0x3] %vm769_vm1, %v6377_v1  ;;  %803 = vst.msk [vmem:[#allocation2 + $0x118] sm:$0x3] %vm769_vm1, %v6377_v1 }
  0x12   :  { %801 = vst.msk [vmem:[#allocation2 + $0x108] sm:$0xff] %vm99_vm0, %v6377_v1  ;;  %802 = vst.msk [vmem:[#allocation2 + $0x110] sm:$0xff] %vm99_vm0, %v6377_v1  ;;  %v116_v34 = vadd.f32 %v115_v29, %v114_v31 }
  0x13   :  { %804 = vst.msk [vmem:[#allocation2 + $0x120] sm:$0xff] %vm99_vm0, %v6377_v1  ;;  %805 = vst.msk [vmem:[#allocation2 + $0x128] sm:$0xff] %vm99_vm0, %v6377_v1 }
  0x14   :  { %806 = vst.msk [vmem:[#allocation2 + $0x130] sm:$0x3] %vm769_vm1, %v6377_v1  ;;  %809 = vst.msk [vmem:[#allocation2 + $0x148] sm:$0x3] %vm769_vm1, %v6377_v1  ;;  %v118_v37 = vadd.f32 %v117_v32, %v116_v34 }
  0x15   :  { %807 = vst.msk [vmem:[#allocation2 + $0x138] sm:$0xff] %vm99_vm0, %v6377_v1  ;;  %808 = vst.msk [vmem:[#allocation2 + $0x140] sm:$0xff] %vm99_vm0, %v6377_v1 }
  0x16   :  { %810 = vst.msk [vmem:[#allocation2 + $0x150] sm:$0xff] %vm99_vm0, %v6377_v1  ;;  %811 = vst.msk [vmem:[#allocation2 + $0x158] sm:$0xff] %vm99_vm0, %v6377_v1  ;;  %v120_v40 = vadd.f32 %v119_v35, %v118_v37 }
  0x17   :  { %812 = vst.msk [vmem:[#allocation2 + $0x160] sm:$0x3] %vm769_vm1, %v6377_v1  ;;  %815 = vst.msk [vmem:[#allocation2 + $0x178] sm:$0x3] %vm769_vm1, %v6377_v1 }
  0x18   :  { %813 = vst.msk [vmem:[#allocation2 + $0x168] sm:$0xff] %vm99_vm0, %v6377_v1  ;;  %814 = vst.msk [vmem:[#allocation2 + $0x170] sm:$0xff] %vm99_vm0, %v6377_v1  ;;  %v122_v43 = vadd.f32 %v121_v38, %v120_v40 }
  0x19   :  { %816 = vst.msk [vmem:[#allocation2 + $0x180] sm:$0xff] %vm99_vm0, %v6377_v1  ;;  %817 = vst.msk [vmem:[#allocation2 + $0x188] sm:$0xff] %vm99_vm0, %v6377_v1 }
  0x1a   :  { %818 = vst.msk [vmem:[#allocation2 + $0x190] sm:$0x3] %vm769_vm1, %v6377_v1  ;;  %824 = vst.msk [vmem:[#allocation2 + $0x1c0] sm:$0x3] %vm769_vm1, %v6377_v1  ;;  %v124_v46 = vadd.f32 %v123_v41, %v122_v43 }
  0x1b   :  { %822 = vst.msk [vmem:[#allocation2 + $0x1b0] sm:$0xff] %vm99_vm0, %v6377_v1  ;;  %823 = vst.msk [vmem:[#allocation2 + $0x1b8] sm:$0xff] %vm99_vm0, %v6377_v1 }
  0x1c   :  { %825 = vst.msk [vmem:[#allocation2 + $0x1c8] sm:$0xff] %vm99_vm0, %v6377_v1  ;;  %826 = vst.msk [vmem:[#allocation2 + $0x1d0] sm:$0xff] %vm99_vm0, %v6377_v1 }
  0x1d   :  { %827 = vst.msk [vmem:[#allocation2 + $0x1d8] sm:$0x3] %vm769_vm1, %v6377_v1  ;;  %830 = vst.msk [vmem:[#allocation2 + $0x1f0] sm:$0x3] %vm769_vm1, %v6377_v1 }
  0x1e   :  { %828 = vst.msk [vmem:[#allocation2 + $0x1e0] sm:$0xff] %vm99_vm0, %v6377_v1  ;;  %829 = vst.msk [vmem:[#allocation2 + $0x1e8] sm:$0xff] %vm99_vm0, %v6377_v1 }
  0x1f   :  { %831 = vst.msk [vmem:[#allocation2 + $0x1f8] sm:$0xff] %vm99_vm0, %v6377_v1  ;;  %832 = vst.msk [vmem:[#allocation2 + $0x200] sm:$0xff] %vm99_vm0, %v6377_v1 }
  0x20   :  { %833 = vst.msk [vmem:[#allocation2 + $0x208] sm:$0x3] %vm769_vm1, %v6377_v1  ;;  %836 = vst.msk [vmem:[#allocation2 + $0x220] sm:$0x3] %vm769_vm1, %v6377_v1 }
  0x21   :  { %834 = vst.msk [vmem:[#allocation2 + $0x210] sm:$0xff] %vm99_vm0, %v6377_v1  ;;  %835 = vst.msk [vmem:[#allocation2 + $0x218] sm:$0xff] %vm99_vm0, %v6377_v1 }
  0x22   :  { %837 = vst.msk [vmem:[#allocation2 + $0x228] sm:$0xff] %vm99_vm0, %v6377_v1  ;;  %838 = vst.msk [vmem:[#allocation2 + $0x230] sm:$0xff] %vm99_vm0, %v6377_v1  ;;  %v1021_v21 = vld [vmem:[#allocation2 + $0x1b2] ss:$2 sm:$0xff]  ;;  %v989_v22 = vld [vmem:[#allocation2 + $0x1b1] ss:$2 sm:$0xff] }
  0x23   :  { %839 = vst.msk [vmem:[#allocation2 + $0x238] sm:$0x3] %vm769_vm1, %v6377_v1  ;;  %842 = vst.msk [vmem:[#allocation2 + $0x250] sm:$0x3] %vm769_vm1, %v6377_v1  ;;  %1323 = vrot.lane.b32.xlu1 %v1021_v21, %s3677_s23  ;;  %1259 = vrot.lane.b32.xlu0 %v989_v22, %s3678_s24 }
  0x24   :  { %840 = vst.msk [vmem:[#allocation2 + $0x240] sm:$0xff] %vm99_vm0, %v6377_v1  ;;  %841 = vst.msk [vmem:[#allocation2 + $0x248] sm:$0xff] %vm99_vm0, %v6377_v1 }
  0x25   :  { %843 = vst.msk [vmem:[#allocation2 + $0x258] sm:$0xff] %vm99_vm0, %v6377_v1  ;;  %844 = vst.msk [vmem:[#allocation2 + $0x260] sm:$0xff] %vm99_vm0, %v6377_v1 }
  0x26   :  { %845 = vst.msk [vmem:[#allocation2 + $0x268] sm:$0x3] %vm769_vm1, %v6377_v1  ;;  %848 = vst.msk [vmem:[#allocation2 + $0x280] sm:$0x3] %vm769_vm1, %v6377_v1 }
  0x27   :  { %846 = vst.msk [vmem:[#allocation2 + $0x270] sm:$0xff] %vm99_vm0, %v6377_v1  ;;  %847 = vst.msk [vmem:[#allocation2 + $0x278] sm:$0xff] %vm99_vm0, %v6377_v1 }
  0x28   :  { %849 = vst.msk [vmem:[#allocation2 + $0x288] sm:$0xff] %vm99_vm0, %v6377_v1  ;;  %850 = vst.msk [vmem:[#allocation2 + $0x290] sm:$0xff] %vm99_vm0, %v6377_v1 }
  0x29   :  { %851 = vst.msk [vmem:[#allocation2 + $0x298] sm:$0x3] %vm769_vm1, %v6377_v1  ;;  %854 = vst.msk [vmem:[#allocation2 + $0x2b0] sm:$0x3] %vm769_vm1, %v6377_v1 }
  0x2a   :  { %852 = vst.msk [vmem:[#allocation2 + $0x2a0] sm:$0xff] %vm99_vm0, %v6377_v1  ;;  %853 = vst.msk [vmem:[#allocation2 + $0x2a8] sm:$0xff] %vm99_vm0, %v6377_v1 }
  0x2b   :  { %855 = vst.msk [vmem:[#allocation2 + $0x2b8] sm:$0xff] %vm99_vm0, %v6377_v1  ;;  %856 = vst.msk [vmem:[#allocation2 + $0x2c0] sm:$0xff] %vm99_vm0, %v6377_v1 }
  0x2c   :  { %857 = vst.msk [vmem:[#allocation2 + $0x2c8] sm:$0x3] %vm769_vm1, %v6377_v1  ;;  %860 = vst.msk [vmem:[#allocation2 + $0x2e0] sm:$0x3] %vm769_vm1, %v6377_v1 }
  0x2d   :  { %858 = vst.msk [vmem:[#allocation2 + $0x2d0] sm:$0xff] %vm99_vm0, %v6377_v1  ;;  %859 = vst.msk [vmem:[#allocation2 + $0x2d8] sm:$0xff] %vm99_vm0, %v6377_v1 }
  0x2e   :  { %861 = vst.msk [vmem:[#allocation2 + $0x2e8] sm:$0xff] %vm99_vm0, %v6377_v1  ;;  %862 = vst.msk [vmem:[#allocation2 + $0x2f0] sm:$0xff] %vm99_vm0, %v6377_v1 }
  0x2f   :  { %863 = vst.msk [vmem:[#allocation2 + $0x2f8] sm:$0x3] %vm769_vm1, %v6377_v1  ;;  %866 = vst.msk [vmem:[#allocation2 + $0x310] sm:$0x3] %vm769_vm1, %v6377_v1 }
  0x30   :  { %864 = vst.msk [vmem:[#allocation2 + $0x300] sm:$0xff] %vm99_vm0, %v6377_v1  ;;  %865 = vst.msk [vmem:[#allocation2 + $0x308] sm:$0xff] %vm99_vm0, %v6377_v1 }
  0x31   :  { %867 = vst.msk [vmem:[#allocation2 + $0x318] sm:$0xff] %vm99_vm0, %v6377_v1  ;;  %868 = vst.msk [vmem:[#allocation2 + $0x320] sm:$0xff] %vm99_vm0, %v6377_v1 }
  0x32   :  { %869 = vst.msk [vmem:[#allocation2 + $0x328] sm:$0x3] %vm769_vm1, %v6377_v1  ;;  %872 = vst.msk [vmem:[#allocation2 + $0x340] sm:$0x3] %vm769_vm1, %v6377_v1 }
  0x33   :  { %870 = vst.msk [vmem:[#allocation2 + $0x330] sm:$0xff] %vm99_vm0, %v6377_v1  ;;  %871 = vst.msk [vmem:[#allocation2 + $0x338] sm:$0xff] %vm99_vm0, %v6377_v1 }
  0x34   :  { %14 = vsyncpa [#allocation5], 0  ;;  %v127_v47 = vsel %vm99_vm0, %v4048_v42, 0.0  ;;  %v4062_v48 = vld [vmem:[%s6367_s0 + $0x80] sm:$0xff]  ;;  %v126_v49 = vadd.f32 %v125_v44, %v124_v46  ;;  %v129_v50 = vsel %vm99_vm0, %v4055_v45, 0.0  ;;  %v4069_v51 = vld [vmem:[%s6367_s0 + $0x88] sm:$0xff] }
  0x35   :  { %v131_v53 = vsel %vm99_vm0, %v4062_v48, 0.0  ;;  %v4076_v54 = vld [vmem:[%s6367_s0 + $0x90] sm:$0xff]  ;;  %v133_v56 = vsel %vm99_vm0, %v4069_v51, 0.0  ;;  %v4083_v57 = vld [vmem:[%s6367_s0 + $0x98] sm:$0xff]  ;;  %v4090_v60 = vld [vmem:[%s6367_s0 + $0xa0] sm:$0xff]  ;;  %vm1755_vm2 = vcmask 64512  }
  0x36   :  { %v128_v52 = vadd.f32 %v127_v47, %v126_v49  ;;  %v135_v59 = vsel %vm99_vm0, %v4076_v54, 0.0  ;;  %v137_v62 = vsel %vm99_vm0, %v4083_v57, 0.0  ;;  %v4097_v63 = vld [vmem:[%s6367_s0 + $0xa8] sm:$0xff]  ;;  %v139_v6 = vsel %vm99_vm0, %v4090_v60, 0.0  ;;  %v4104_v7 = vld [vmem:[%s6367_s0 + $0xb0] sm:$0xff]  ;;  %v4111_v12 = vld [vmem:[%s6367_s0 + $0xb8] sm:$0xff] }
  0x37   :  { %v141_v10 = vsel %vm99_vm0, %v4097_v63, 0.0  ;;  %v143_v15 = vsel %vm99_vm0, %v4104_v7, 0.0  ;;  %v4118_v16 = vld [vmem:[%s6367_s0 + $0xc0] sm:$0xff]  ;;  %v145_v18 = vsel %vm99_vm0, %v4111_v12, 0.0  ;;  %v4125_v20 = vld [vmem:[%s6367_s0 + $0xc8] sm:$0xff]  ;;  %v4132_v23 = vld [vmem:[%s6367_s0 + $0xd0] sm:$0xff] }
  0x38   :  { %v130_v55 = vadd.f32 %v129_v50, %v128_v52  ;;  %v147_v22 = vsel %vm99_vm0, %v4118_v16, 0.0  ;;  %v149_v26 = vsel %vm99_vm0, %v4125_v20, 0.0  ;;  %v4139_v28 = vld [vmem:[%s6367_s0 + $0xd8] sm:$0xff]  ;;  %v151_v31 = vsel %vm99_vm0, %v4132_v23, 0.0  ;;  %v4146_v32 = vld [vmem:[%s6367_s0 + $0xe0] sm:$0xff]  ;;  %v4153_v37 = vld [vmem:[%s6367_s0 + $0xe8] sm:$0xff] }
  0x39   :  { %v153_v35 = vsel %vm99_vm0, %v4139_v28, 0.0  ;;  %v155_v40 = vsel %vm99_vm0, %v4146_v32, 0.0  ;;  %v4160_v41 = vld [vmem:[%s6367_s0 + $0xf0] sm:$0xff]  ;;  %v157_v44 = vsel %vm99_vm0, %v4153_v37, 0.0  ;;  %v4167_v46 = vld [vmem:[%s6367_s0 + $0xf8] sm:$0xff]  ;;  %v4174_v50 = vld [vmem:[%s6367_s0 + $0x100] sm:$0xff] }
  0x3a   :  { %v132_v58 = vadd.f32 %v131_v53, %v130_v55  ;;  %v159_v49 = vsel %vm99_vm0, %v4160_v41, 0.0  ;;  %v161_v53 = vsel %vm99_vm0, %v4167_v46, 0.0  ;;  %v4181_v55 = vld [vmem:[%s6367_s0 + $0x108] sm:$0xff]  ;;  %s3680_s27 = smov 16   ;;  %s3681_s28 = smov 20   ;;  %vm1935_vm3 = vcmask 1043456  }
  0x3b   :  { %s3682_s29 = smov 24   ;;  %s3683_s30 = smov 28   ;;  %vm1772_vm4 = vcmask 97280   ;;  %vm1789_vm5 = vcmask 130048   ;;  %vm1806_vm6 = vcmask 162816   ;;  %vm1823_vm7 = vcmask 195584  }
  0x3c   :  { %v134_v61 = vadd.f32 %v133_v56, %v132_v58  ;;  %v163_v58 = vsel %vm99_vm0, %v4174_v50, 0.0  ;;  %s3684_s16 = smov 32   ;;  %vm1840_vm8 = vcmask 228352   ;;  %vm1857_vm9 = vcmask 261120   ;;  %s3686_s21 = smov 64  }
  0x3d   :  { %vm1886_vm10 = vcmask 293888   ;;  %vm2274_vm11 = vcmask 58368   ;;  %s3687_s22 = smov 56   ;;  %vm3052_vm12 = vcmask 326656   ;;  %vm3069_vm13 = vcmask 392192  }
  0x3e   :  { %v136_v5 = vadd.f32 %v135_v59, %v134_v61  ;;  %v4188_v59 = vld [vmem:[%s6367_s0 + $0x110] sm:$0xff]  ;;  %vm3086_vm14 = vcmask 457728   ;;  %vm3103_vm15 = vcmask 523264  }
  0x40   :  { %v138_v9 = vadd.f32 %v137_v62, %v136_v5  ;;  %v165_v62 = vsel %vm99_vm0, %v4181_v55, 0.0  ;;  %v4195_v5 = vld [vmem:[%s6367_s0 + $0x118] sm:$0xff] }
  0x42   :  { %v140_v13 = vadd.f32 %v139_v6, %v138_v9  ;;  %v167_v9 = vsel %vm99_vm0, %v4188_v59, 0.0 }
  0x44   :  { %v142_v17 = vadd.f32 %v141_v10, %v140_v13  ;;  %v4202_v10 = vld [vmem:[%s6367_s0 + $0x120] sm:$0xff] }
  0x46   :  { %v144_v21 = vadd.f32 %v143_v15, %v142_v17  ;;  %v169_v15 = vsel %vm99_vm0, %v4195_v5, 0.0  ;;  %v4209_v17 = vld [vmem:[%s6367_s0 + $0x128] sm:$0xff] }
  0x48   :  { %v146_v25 = vadd.f32 %v145_v18, %v144_v21  ;;  %v171_v21 = vsel %vm99_vm0, %v4202_v10, 0.0 }
  0x4a   :  { %v148_v29 = vadd.f32 %v147_v22, %v146_v25  ;;  %v4216_v22 = vld [vmem:[%s6367_s0 + $0x130] sm:$0xff] }
  0x4c   :  { %v150_v34 = vadd.f32 %v149_v26, %v148_v29  ;;  %v173_v26 = vsel %vm99_vm0, %v4209_v17, 0.0  ;;  %v4223_v29 = vld [vmem:[%s6367_s0 + $0x138] sm:$0xff] }
  0x4e   :  { %v152_v38 = vadd.f32 %v151_v31, %v150_v34  ;;  %v175_v34 = vsel %vm99_vm0, %v4216_v22, 0.0 }
  0x50   :  { %v154_v43 = vadd.f32 %v153_v35, %v152_v38  ;;  %v4230_v35 = vld [vmem:[%s6367_s0 + $0x140] sm:$0xff] }
  0x52   :  { %v156_v47 = vadd.f32 %v155_v40, %v154_v43  ;;  %v177_v40 = vsel %vm99_vm0, %v4223_v29, 0.0  ;;  %v4237_v43 = vld [vmem:[%s6367_s0 + $0x148] sm:$0xff] }
  0x54   :  { %v158_v52 = vadd.f32 %v157_v44, %v156_v47  ;;  %v179_v47 = vsel %vm99_vm0, %v4230_v35, 0.0 }
  0x56   :  { %v160_v56 = vadd.f32 %v159_v49, %v158_v52  ;;  %v4244_v49 = vld [vmem:[%s6367_s0 + $0x150] sm:$0xff] }
  0x58   :  { %v162_v61 = vadd.f32 %v161_v53, %v160_v56  ;;  %v181_v53 = vsel %vm99_vm0, %v4237_v43, 0.0  ;;  %v4251_v56 = vld [vmem:[%s6367_s0 + $0x158] sm:$0xff] }
  0x5a   :  { %v164_v6 = vadd.f32 %v163_v58, %v162_v61  ;;  %v183_v61 = vsel %vm99_vm0, %v4244_v49, 0.0 }
  0x5c   :  { %v166_v13 = vadd.f32 %v165_v62, %v164_v6  ;;  %v4258_v62 = vld [vmem:[%s6367_s0 + $0x160] sm:$0xff] }
  0x5e   :  { %v168_v18 = vadd.f32 %v167_v9, %v166_v13  ;;  %v185_v9 = vsel %vm99_vm0, %v4251_v56, 0.0  ;;  %v4265_v13 = vld [vmem:[%s6367_s0 + $0x168] sm:$0xff] }
  0x60   :  { %v170_v25 = vadd.f32 %v169_v15, %v168_v18  ;;  %v187_v18 = vsel %vm99_vm0, %v4258_v62, 0.0 }
  0x62   :  { %v172_v31 = vadd.f32 %v171_v21, %v170_v25  ;;  %v4272_v21 = vld [vmem:[%s6367_s0 + $0x170] sm:$0xff] }
  0x64   :  { %v174_v38 = vadd.f32 %v173_v26, %v172_v31  ;;  %v189_v26 = vsel %vm99_vm0, %v4265_v13, 0.0  ;;  %v4279_v31 = vld [vmem:[%s6367_s0 + $0x178] sm:$0xff] }
  0x66   :  { %v176_v44 = vadd.f32 %v175_v34, %v174_v38  ;;  %v191_v38 = vsel %vm99_vm0, %v4272_v21, 0.0 }
  0x68   :  { %v178_v52 = vadd.f32 %v177_v40, %v176_v44  ;;  %v4286_v40 = vld [vmem:[%s6367_s0 + $0x180] sm:$0xff] }
  0x6a   :  { %v180_v58 = vadd.f32 %v179_v47, %v178_v52  ;;  %v193_v47 = vsel %vm99_vm0, %v4279_v31, 0.0  ;;  %v4293_v52 = vld [vmem:[%s6367_s0 + $0x188] sm:$0xff] }
  0x6b   :  { %6413 = vst [vmem:[#allocation7_spill] sm:$0xff] %v4293_v52 }
  0x6c   :  { %v182_v6 = vadd.f32 %v181_v53, %v180_v58  ;;  %v195_v58 = vsel %vm99_vm0, %v4286_v40, 0.0 }
  0x6e   :  { %v184_v15 = vadd.f32 %v183_v61, %v182_v6  ;;  %v4300_v61 = vld [vmem:[%s6367_s0 + $0x190] sm:$0xff] }
  0x6f   :  { %6414 = vst [vmem:[#allocation8_spill] sm:$0xff] %v4300_v61 }
  0x70   :  { %v186_v25 = vadd.f32 %v185_v9, %v184_v15  ;;  %v197_v9 = vsel %vm99_vm0, %v4293_v52, 0.0  ;;  %v4307_v15 = vld [vmem:[%s6367_s0 + $0x198] sm:$0xff] }
  0x71   :  { %6415 = vst [vmem:[#allocation9_spill] sm:$0xff] %v4307_v15 }
  0x72   :  { %v188_v34 = vadd.f32 %v187_v18, %v186_v25  ;;  %v199_v25 = vsel %vm99_vm0, %v4300_v61, 0.0 }
  0x74   :  { %v190_v44 = vadd.f32 %v189_v26, %v188_v34  ;;  %v4314_v26 = vld [vmem:[%s6367_s0 + $0x1a0] sm:$0xff] }
  0x75   :  { %6416 = vst [vmem:[#allocation10_spill] sm:$0xff] %v4314_v26 }
  0x76   :  { %v192_v53 = vadd.f32 %v191_v38, %v190_v44  ;;  %v201_v38 = vsel %vm99_vm0, %v4307_v15, 0.0  ;;  %v4321_v44 = vld [vmem:[%s6367_s0 + $0x1a8] sm:$0xff] }
  0x77   :  { %6417 = vst [vmem:[#allocation11_spill] sm:$0xff] %v4321_v44 }
  0x78   :  { %v194_v6 = vadd.f32 %v193_v47, %v192_v53  ;;  %v203_v53 = vsel %vm99_vm0, %v4314_v26, 0.0 }
  0x7a   :  { %v196_v18 = vadd.f32 %v195_v58, %v194_v6  ;;  %v4328_v58 = vld [vmem:[%s6367_s0 + $0x1b0] sm:$0xff] }
  0x7b   :  { %6418 = vst [vmem:[#allocation12_spill] sm:$0xff] %v4328_v58 }
  0x7c   :  { %v198_v34 = vadd.f32 %v197_v9, %v196_v18  ;;  %v205_v9 = vsel %vm99_vm0, %v4321_v44, 0.0  ;;  %v4335_v18 = vld [vmem:[%s6367_s0 + $0x1b8] sm:$0xff] }
  0x7d   :  { %6419 = vst [vmem:[#allocation13_spill] sm:$0xff] %v4335_v18 }
  0x7e   :  { %v200_v47 = vadd.f32 %v199_v25, %v198_v34  ;;  %v207_v25 = vsel %vm99_vm0, %v4328_v58, 0.0  ;;  %v4342_v34 = vld [vmem:[%s6367_s0 + $0x1c0] sm:$0xff] }
  0x7f   :  { %6420 = vst [vmem:[#allocation14_spill] sm:$0xff] %v4342_v34 }
  0x80   :  { %v202_v6 = vadd.f32 %v201_v38, %v200_v47  ;;  %v209_v38 = vsel %vm99_vm0, %v4335_v18, 0.0  ;;  %v4349_v47 = vld [vmem:[%s6367_s0 + $0x1c8] sm:$0xff] }
  0x81   :  { %6421 = vst [vmem:[#allocation15_spill] sm:$0xff] %v4349_v47 }
  0x82   :  { %v204_v1 = vadd.f32 %v203_v53, %v202_v6  ;;  %v211_v53 = vsel %vm99_vm0, %v4342_v34, 0.0  ;;  %v4356_v6 = vld [vmem:[%s6367_s0 + $0x1d0] sm:$0xff] }
  0x83   :  { %6422 = vst [vmem:[#allocation16_spill] sm:$0xff] %v4356_v6 }
  0x84   :  { %v206_v26 = vadd.f32 %v205_v9, %v204_v1  ;;  %v213_v1 = vsel %vm99_vm0, %v4349_v47, 0.0  ;;  %v4363_v9 = vld [vmem:[%s6367_s0 + $0x1d8] sm:$0xff] }
  0x85   :  { %6423 = vst [vmem:[#allocation17_spill] sm:$0xff] %v4363_v9  ;;  %v217_v34 = vsel %vm99_vm0, %v4363_v9, 0.0 }
  0x86   :  { %v208_v44 = vadd.f32 %v207_v25, %v206_v26  ;;  %v215_v26 = vsel %vm99_vm0, %v4356_v6, 0.0 }
  0x88   :  { %v210_v58 = vadd.f32 %v209_v38, %v208_v44  ;;  %v4372_v44 = vld [vmem:[%s6367_s0 + $0x1e0] sm:$0xff] }
  0x89   :  { %6424 = vst [vmem:[#allocation18_spill] sm:$0xff] %v4372_v44  ;;  %v219_v15 = vsel %vm99_vm0, %v4372_v44, 0.0 }
  0x8a   :  { %v212_v18 = vadd.f32 %v211_v53, %v210_v58  ;;  %v4379_v58 = vld [vmem:[%s6367_s0 + $0x1e8] sm:$0xff] }
  0x8b   :  { %6425 = vst [vmem:[#allocation19_spill] sm:$0xff] %v4379_v58 }
  0x8c   :  { %v214_v25 = vadd.f32 %v213_v1, %v212_v18  ;;  %v221_v18 = vsel %vm99_vm0, %v4379_v58, 0.0  ;;  %v4386_v1 = vld [vmem:[%s6367_s0 + $0x1f0] sm:$0xff] }
  0x8d   :  { %6426 = vst [vmem:[#allocation20_spill] sm:$0xff] %v4386_v1 }
  0x8e   :  { %v216_v38 = vadd.f32 %v215_v26, %v214_v25  ;;  %v4393_v26 = vld [vmem:[%s6367_s0 + $0x1f8] sm:$0xff] }
  0x90   :  { %v218_v47 = vadd.f32 %v217_v34, %v216_v38  ;;  %v223_v34 = vsel %vm99_vm0, %v4386_v1, 0.0 }
  0x92   :  { %v220_v53 = vadd.f32 %v219_v15, %v218_v47  ;;  %v225_v15 = vsel %vm99_vm0, %v4393_v26, 0.0 }
  0x94   :  { %v222_v9 = vadd.f32 %v221_v18, %v220_v53 }
  0x96   :  { %v224_v25 = vadd.f32 %v223_v34, %v222_v9 }
  0x98   :  { %v226_v47 = vadd.f32 %v225_v15, %v224_v25 }
  0x9a   :  { %v227_v38 = vrot.slane %v226_v47, 4 }
  0x9c   :  { %v228_v58 = vadd.f32 %v227_v38, %v226_v47 }
  0x9e   :  { %v229_v44 = vrot.slane %v228_v58, 2 }
  0xa0   :  { %v230_v6 = vadd.f32 %v229_v44, %v228_v58 }
  0xa2   :  { %v231_v61 = vrot.slane %v230_v6, 1 }
  0xa4   :  { %v232_v52 = vadd.f32 %v231_v61, %v230_v6 }
  0xa6   :  { %v4397_v53 = vmul.f32 0.001953125, %v232_v52 }
  0xa8   :  { %v4401_v18 = vsub.f32 %v3744_v0, %v4397_v53  ;;  %v4405_v1 = vsub.f32 %v3953_v2, %v4397_v53  ;;  %v4409_v9 = vsub.f32 %v3958_v3, %v4397_v53  ;;  %v4413_v34 = vsub.f32 %v3963_v4, %v4397_v53 }
  0xa9   :  { %v4417_v52 = vsub.f32 %v3974_v8, %v4397_v53  ;;  %v4427_v3 = vsub.f32 %v3981_v11, %v4397_v53  ;;  %v4433_v8 = vsub.f32 %v3988_v14, %v4397_v53  ;;  %v4442_v11 = vsub.f32 %v3997_v19, %v4397_v53 }
  0xaa   :  { %6427 = vst [vmem:[#allocation21_spill] sm:$0xff] %v4405_v1  ;;  %v299_v0 = vmul.f32 %v4401_v18, %v4401_v18  ;;  %v300_v61 = vmul.f32 %v4405_v1, %v4405_v1  ;;  %v301_v2 = vmul.f32 %v4409_v9, %v4409_v9  ;;  %v302_v4 = vmul.f32 %v4413_v34, %v4413_v34 }
  0xab   :  { %v303_v6 = vmul.f32 %v4417_v52, %v4417_v52  ;;  %v304_v47 = vmul.f32 %v4427_v3, %v4427_v3  ;;  %v4449_v1 = vsub.f32 %v4004_v24, %v4397_v53  ;;  %v4456_v19 = vsub.f32 %v4013_v27, %v4397_v53 }
  0xac   :  { %v363_v44 = vsel %vm99_vm0, %v299_v0, 0.0  ;;  %v364_v58 = vsel %vm99_vm0, %v300_v61, 0.0  ;;  %v366_v25 = vsel %vm99_vm0, %v301_v2, 0.0  ;;  %v368_v14 = vsel %vm99_vm0, %v302_v4, 0.0 }
  0xad   :  { %v365_v15 = vadd.f32 %v364_v58, %v363_v44  ;;  %v305_v0 = vmul.f32 %v4433_v8, %v4433_v8  ;;  %v370_v61 = vsel %vm99_vm0, %v303_v6, 0.0  ;;  %v306_v44 = vmul.f32 %v4442_v11, %v4442_v11 }
  0xae   :  { %v372_v4 = vsel %vm99_vm0, %v304_v47, 0.0  ;;  %v4463_v24 = vsub.f32 %v4020_v30, %v4397_v53  ;;  %v4470_v27 = vsub.f32 %v4027_v33, %v4397_v53  ;;  %v4477_v30 = vsub.f32 %v4034_v36, %v4397_v53 }
  0xaf   :  { %v367_v38 = vadd.f32 %v366_v25, %v365_v15  ;;  %v307_v25 = vmul.f32 %v4449_v1, %v4449_v1  ;;  %v374_v6 = vsel %vm99_vm0, %v305_v0, 0.0  ;;  %v376_v47 = vsel %vm99_vm0, %v306_v44, 0.0 }
  0xb0   :  { %v4484_v33 = vsub.f32 %v4041_v39, %v4397_v53  ;;  %v4491_v36 = vsub.f32 %v4048_v42, %v4397_v53  ;;  %v4498_v39 = vsub.f32 %v4055_v45, %v4397_v53  ;;  %v4505_v42 = vsub.f32 %v4062_v48, %v4397_v53 }
  0xb1   :  { %v369_v2 = vadd.f32 %v368_v14, %v367_v38  ;;  %v308_v14 = vmul.f32 %v4456_v19, %v4456_v19  ;;  %v378_v0 = vsel %vm99_vm0, %v307_v25, 0.0  ;;  %v4512_v45 = vsub.f32 %v4069_v51, %v4397_v53 }
  0xb2   :  { %v4519_v48 = vsub.f32 %v4076_v54, %v4397_v53  ;;  %v4526_v51 = vsub.f32 %v4083_v57, %v4397_v53  ;;  %v4533_v54 = vsub.f32 %v4090_v60, %v4397_v53  ;;  %v4540_v57 = vsub.f32 %v4097_v63, %v4397_v53 }
  0xb3   :  { %v371_v58 = vadd.f32 %v370_v61, %v369_v2  ;;  %v309_v61 = vmul.f32 %v4463_v24, %v4463_v24  ;;  %v380_v44 = vsel %vm99_vm0, %v308_v14, 0.0  ;;  %v4547_v60 = vsub.f32 %v4104_v7, %v4397_v53 }
  0xb4   :  { %v4554_v63 = vsub.f32 %v4111_v12, %v4397_v53  ;;  %v4561_v7 = vsub.f32 %v4118_v16, %v4397_v53  ;;  %v4568_v12 = vsub.f32 %v4125_v20, %v4397_v53  ;;  %v4575_v16 = vsub.f32 %v4132_v23, %v4397_v53 }
  0xb5   :  { %v373_v15 = vadd.f32 %v372_v4, %v371_v58  ;;  %v310_v4 = vmul.f32 %v4470_v27, %v4470_v27  ;;  %v382_v25 = vsel %vm99_vm0, %v309_v61, 0.0  ;;  %v4582_v20 = vsub.f32 %v4139_v28, %v4397_v53 }
  0xb6   :  { %v4589_v23 = vsub.f32 %v4146_v32, %v4397_v53  ;;  %v4596_v28 = vsub.f32 %v4153_v37, %v4397_v53  ;;  %v4603_v32 = vsub.f32 %v4160_v41, %v4397_v53  ;;  %v4610_v37 = vsub.f32 %v4167_v46, %v4397_v53 }
  0xb7   :  { %v375_v38 = vadd.f32 %v374_v6, %v373_v15  ;;  %v311_v6 = vmul.f32 %v4477_v30, %v4477_v30  ;;  %v384_v14 = vsel %vm99_vm0, %v310_v4, 0.0  ;;  %v4617_v41 = vsub.f32 %v4174_v50, %v4397_v53 }
  0xb8   :  { %v4624_v46 = vsub.f32 %v4181_v55, %v4397_v53  ;;  %v4631_v50 = vsub.f32 %v4188_v59, %v4397_v53  ;;  %v4638_v55 = vsub.f32 %v4195_v5, %v4397_v53  ;;  %v4645_v59 = vsub.f32 %v4202_v10, %v4397_v53 }
  0xb9   :  { %v377_v2 = vadd.f32 %v376_v47, %v375_v38  ;;  %v312_v47 = vmul.f32 %v4484_v33, %v4484_v33  ;;  %v386_v61 = vsel %vm99_vm0, %v311_v6, 0.0  ;;  %v4652_v5 = vsub.f32 %v4209_v17, %v4397_v53 }
  0xba   :  { %v4659_v10 = vsub.f32 %v4216_v22, %v4397_v53  ;;  %v4666_v17 = vsub.f32 %v4223_v29, %v4397_v53  ;;  %v4673_v22 = vsub.f32 %v4230_v35, %v4397_v53  ;;  %v4680_v29 = vsub.f32 %v4237_v43, %v4397_v53 }
  0xbb   :  { %v379_v58 = vadd.f32 %v378_v0, %v377_v2  ;;  %v313_v0 = vmul.f32 %v4491_v36, %v4491_v36  ;;  %v388_v4 = vsel %vm99_vm0, %v312_v47, 0.0  ;;  %v4687_v35 = vsub.f32 %v4244_v49, %v4397_v53 }
  0xbc   :  { %v4694_v43 = vsub.f32 %v4251_v56, %v4397_v53  ;;  %v4701_v49 = vsub.f32 %v4258_v62, %v4397_v53  ;;  %v4708_v56 = vsub.f32 %v4265_v13, %v4397_v53  ;;  %v4715_v62 = vsub.f32 %v4272_v21, %v4397_v53 }
  0xbd   :  { %v381_v15 = vadd.f32 %v380_v44, %v379_v58  ;;  %v314_v44 = vmul.f32 %v4498_v39, %v4498_v39  ;;  %v390_v6 = vsel %vm99_vm0, %v313_v0, 0.0  ;;  %v4722_v13 = vsub.f32 %v4279_v31, %v4397_v53 }
  0xbe   :  { %6428 = vst [vmem:[#allocation22_spill] sm:$0xff] %v4701_v49  ;;  %6429 = vst [vmem:[#allocation23_spill] sm:$0xff] %v4708_v56  ;;  %v4729_v21 = vsub.f32 %v4286_v40, %v4397_v53 }
  0xbf   :  { %v383_v38 = vadd.f32 %v382_v25, %v381_v15  ;;  %v315_v25 = vmul.f32 %v4505_v42, %v4505_v42  ;;  %v392_v47 = vsel %vm99_vm0, %v314_v44, 0.0  ;;  %6430 = vst [vmem:[#allocation24_spill] sm:$0xff] %v4715_v62  ;;  %6431 = vst [vmem:[#allocation25_spill] sm:$0xff] %v4722_v13 }
  0xc0   :  { %6432 = vst [vmem:[#allocation26_spill] sm:$0xff] %v4729_v21 }
  0xc1   :  { %v385_v2 = vadd.f32 %v384_v14, %v383_v38  ;;  %v316_v14 = vmul.f32 %v4512_v45, %v4512_v45  ;;  %v394_v0 = vsel %vm99_vm0, %v315_v25, 0.0 }
  0xc3   :  { %v387_v58 = vadd.f32 %v386_v61, %v385_v2  ;;  %v317_v61 = vmul.f32 %v4519_v48, %v4519_v48  ;;  %v396_v44 = vsel %vm99_vm0, %v316_v14, 0.0 }
  0xc5   :  { %v389_v15 = vadd.f32 %v388_v4, %v387_v58  ;;  %v318_v4 = vmul.f32 %v4526_v51, %v4526_v51  ;;  %v398_v25 = vsel %vm99_vm0, %v317_v61, 0.0 }
  0xc7   :  { %v391_v38 = vadd.f32 %v390_v6, %v389_v15  ;;  %v319_v6 = vmul.f32 %v4533_v54, %v4533_v54  ;;  %v400_v14 = vsel %vm99_vm0, %v318_v4, 0.0 }
  0xc9   :  { %v393_v2 = vadd.f32 %v392_v47, %v391_v38  ;;  %v320_v47 = vmul.f32 %v4540_v57, %v4540_v57  ;;  %v402_v61 = vsel %vm99_vm0, %v319_v6, 0.0 }
  0xcb   :  { %v395_v58 = vadd.f32 %v394_v0, %v393_v2  ;;  %v321_v0 = vmul.f32 %v4547_v60, %v4547_v60  ;;  %v404_v4 = vsel %vm99_vm0, %v320_v47, 0.0 }
  0xcd   :  { %v397_v15 = vadd.f32 %v396_v44, %v395_v58  ;;  %v322_v44 = vmul.f32 %v4554_v63, %v4554_v63  ;;  %v406_v6 = vsel %vm99_vm0, %v321_v0, 0.0 }
  0xcf   :  { %v399_v38 = vadd.f32 %v398_v25, %v397_v15  ;;  %v323_v25 = vmul.f32 %v4561_v7, %v4561_v7  ;;  %v408_v47 = vsel %vm99_vm0, %v322_v44, 0.0 }
  0xd1   :  { %v401_v2 = vadd.f32 %v400_v14, %v399_v38  ;;  %v324_v14 = vmul.f32 %v4568_v12, %v4568_v12  ;;  %v410_v0 = vsel %vm99_vm0, %v323_v25, 0.0 }
  0xd3   :  { %v403_v58 = vadd.f32 %v402_v61, %v401_v2  ;;  %v325_v61 = vmul.f32 %v4575_v16, %v4575_v16  ;;  %v412_v44 = vsel %vm99_vm0, %v324_v14, 0.0 }
  0xd5   :  { %v405_v15 = vadd.f32 %v404_v4, %v403_v58  ;;  %v326_v4 = vmul.f32 %v4582_v20, %v4582_v20  ;;  %v414_v25 = vsel %vm99_vm0, %v325_v61, 0.0 }
  0xd7   :  { %v407_v38 = vadd.f32 %v406_v6, %v405_v15  ;;  %v327_v6 = vmul.f32 %v4589_v23, %v4589_v23  ;;  %v416_v14 = vsel %vm99_vm0, %v326_v4, 0.0 }
  0xd9   :  { %v409_v2 = vadd.f32 %v408_v47, %v407_v38  ;;  %v328_v47 = vmul.f32 %v4596_v28, %v4596_v28  ;;  %v418_v61 = vsel %vm99_vm0, %v327_v6, 0.0 }
  0xdb   :  { %v411_v58 = vadd.f32 %v410_v0, %v409_v2  ;;  %v329_v0 = vmul.f32 %v4603_v32, %v4603_v32  ;;  %v420_v4 = vsel %vm99_vm0, %v328_v47, 0.0 }
  0xdd   :  { %v413_v15 = vadd.f32 %v412_v44, %v411_v58  ;;  %v330_v44 = vmul.f32 %v4610_v37, %v4610_v37  ;;  %v422_v6 = vsel %vm99_vm0, %v329_v0, 0.0 }
  0xdf   :  { %v415_v38 = vadd.f32 %v414_v25, %v413_v15  ;;  %v331_v25 = vmul.f32 %v4617_v41, %v4617_v41  ;;  %v424_v47 = vsel %vm99_vm0, %v330_v44, 0.0 }
  0xe1   :  { %v417_v2 = vadd.f32 %v416_v14, %v415_v38  ;;  %v332_v14 = vmul.f32 %v4624_v46, %v4624_v46  ;;  %v426_v0 = vsel %vm99_vm0, %v331_v25, 0.0 }
  0xe3   :  { %v419_v58 = vadd.f32 %v418_v61, %v417_v2  ;;  %v333_v61 = vmul.f32 %v4631_v50, %v4631_v50  ;;  %v428_v44 = vsel %vm99_vm0, %v332_v14, 0.0 }
  0xe5   :  { %v421_v15 = vadd.f32 %v420_v4, %v419_v58  ;;  %v334_v4 = vmul.f32 %v4638_v55, %v4638_v55  ;;  %v430_v25 = vsel %vm99_vm0, %v333_v61, 0.0 }
  0xe7   :  { %v423_v38 = vadd.f32 %v422_v6, %v421_v15  ;;  %v335_v6 = vmul.f32 %v4645_v59, %v4645_v59  ;;  %v432_v14 = vsel %vm99_vm0, %v334_v4, 0.0 }
  0xe9   :  { %v425_v2 = vadd.f32 %v424_v47, %v423_v38  ;;  %v336_v47 = vmul.f32 %v4652_v5, %v4652_v5  ;;  %v434_v61 = vsel %vm99_vm0, %v335_v6, 0.0 }
  0xeb   :  { %v427_v58 = vadd.f32 %v426_v0, %v425_v2  ;;  %v337_v0 = vmul.f32 %v4659_v10, %v4659_v10  ;;  %v436_v4 = vsel %vm99_vm0, %v336_v47, 0.0 }
  0xed   :  { %v429_v15 = vadd.f32 %v428_v44, %v427_v58  ;;  %v338_v44 = vmul.f32 %v4666_v17, %v4666_v17  ;;  %v438_v6 = vsel %vm99_vm0, %v337_v0, 0.0 }
  0xef   :  { %v431_v38 = vadd.f32 %v430_v25, %v429_v15  ;;  %v339_v25 = vmul.f32 %v4673_v22, %v4673_v22  ;;  %v440_v47 = vsel %vm99_vm0, %v338_v44, 0.0 }
  0xf1   :  { %v433_v2 = vadd.f32 %v432_v14, %v431_v38  ;;  %v340_v14 = vmul.f32 %v4680_v29, %v4680_v29  ;;  %v442_v0 = vsel %vm99_vm0, %v339_v25, 0.0 }
  0xf3   :  { %v435_v58 = vadd.f32 %v434_v61, %v433_v2  ;;  %v341_v61 = vmul.f32 %v4687_v35, %v4687_v35  ;;  %v444_v44 = vsel %vm99_vm0, %v340_v14, 0.0 }
  0xf5   :  { %v437_v15 = vadd.f32 %v436_v4, %v435_v58  ;;  %v342_v4 = vmul.f32 %v4694_v43, %v4694_v43  ;;  %v446_v25 = vsel %vm99_vm0, %v341_v61, 0.0 }
  0xf7   :  { %v439_v38 = vadd.f32 %v438_v6, %v437_v15  ;;  %v343_v6 = vmul.f32 %v4701_v49, %v4701_v49  ;;  %v448_v14 = vsel %vm99_vm0, %v342_v4, 0.0 }
  0xf9   :  { %v441_v2 = vadd.f32 %v440_v47, %v439_v38  ;;  %v344_v47 = vmul.f32 %v4708_v56, %v4708_v56  ;;  %v450_v61 = vsel %vm99_vm0, %v343_v6, 0.0 }
  0xfb   :  { %v443_v58 = vadd.f32 %v442_v0, %v441_v2  ;;  %v345_v0 = vmul.f32 %v4715_v62, %v4715_v62  ;;  %v452_v4 = vsel %vm99_vm0, %v344_v47, 0.0  ;;  %v347_v62 = vmul.f32 %v4729_v21, %v4729_v21 }
  0xfd   :  { %v445_v15 = vadd.f32 %v444_v44, %v443_v58  ;;  %v6433_v44 = vld [vmem:[#allocation7_spill] sm:$0xff]  ;;  %v346_v58 = vmul.f32 %v4722_v13, %v4722_v13  ;;  %v454_v6 = vsel %vm99_vm0, %v345_v0, 0.0  ;;  %v458_v0 = vsel %vm99_vm0, %v347_v62, 0.0 }
  0xfe   :  { %v4736_v31 = vsub.f32 %v6433_v44, %v4397_v53 }
  0xff   :  { %v447_v38 = vadd.f32 %v446_v25, %v445_v15  ;;  %v6435_v15 = vld [vmem:[#allocation8_spill] sm:$0xff]  ;;  %v456_v47 = vsel %vm99_vm0, %v346_v58, 0.0 }
 0x100   :  { %6434 = vst [vmem:[#allocation7_spill] sm:$0xff] %v4736_v31  ;;  %v4743_v40 = vsub.f32 %v6435_v15, %v4397_v53  ;;  %v348_v13 = vmul.f32 %v4736_v31, %v4736_v31 }
 0x101   :  { %v449_v2 = vadd.f32 %v448_v14, %v447_v38  ;;  %v6437_v38 = vld [vmem:[#allocation9_spill] sm:$0xff] }
 0x102   :  { %6436 = vst [vmem:[#allocation8_spill] sm:$0xff] %v4743_v40  ;;  %v4750_v44 = vsub.f32 %v6437_v38, %v4397_v53  ;;  %v349_v21 = vmul.f32 %v4743_v40, %v4743_v40  ;;  %v460_v58 = vsel %vm99_vm0, %v348_v13, 0.0 }
 0x103   :  { %v451_v25 = vadd.f32 %v450_v61, %v449_v2  ;;  %v6439_v2 = vld [vmem:[#allocation10_spill] sm:$0xff] }
 0x104   :  { %6438 = vst [vmem:[#allocation9_spill] sm:$0xff] %v4750_v44  ;;  %v4757_v15 = vsub.f32 %v6439_v2, %v4397_v53  ;;  %v350_v31 = vmul.f32 %v4750_v44, %v4750_v44  ;;  %v462_v62 = vsel %vm99_vm0, %v349_v21, 0.0 }
 0x105   :  { %v453_v14 = vadd.f32 %v452_v4, %v451_v25  ;;  %v6441_v25 = vld [vmem:[#allocation11_spill] sm:$0xff] }
 0x106   :  { %6440 = vst [vmem:[#allocation10_spill] sm:$0xff] %v4757_v15  ;;  %v4764_v38 = vsub.f32 %v6441_v25, %v4397_v53  ;;  %v351_v40 = vmul.f32 %v4757_v15, %v4757_v15  ;;  %v464_v13 = vsel %vm99_vm0, %v350_v31, 0.0 }
 0x107   :  { %v455_v61 = vadd.f32 %v454_v6, %v453_v14  ;;  %v6443_v14 = vld [vmem:[#allocation12_spill] sm:$0xff] }
 0x108   :  { %6442 = vst [vmem:[#allocation11_spill] sm:$0xff] %v4764_v38  ;;  %v4771_v2 = vsub.f32 %v6443_v14, %v4397_v53  ;;  %v352_v44 = vmul.f32 %v4764_v38, %v4764_v38  ;;  %v466_v21 = vsel %vm99_vm0, %v351_v40, 0.0 }
 0x109   :  { %v457_v4 = vadd.f32 %v456_v47, %v455_v61  ;;  %v6445_v61 = vld [vmem:[#allocation13_spill] sm:$0xff] }
 0x10a   :  { %6444 = vst [vmem:[#allocation12_spill] sm:$0xff] %v4771_v2  ;;  %v4778_v25 = vsub.f32 %v6445_v61, %v4397_v53  ;;  %v353_v15 = vmul.f32 %v4771_v2, %v4771_v2  ;;  %v468_v31 = vsel %vm99_vm0, %v352_v44, 0.0 }
 0x10b   :  { %v459_v6 = vadd.f32 %v458_v0, %v457_v4  ;;  %v6447_v4 = vld [vmem:[#allocation14_spill] sm:$0xff] }
 0x10c   :  { %6446 = vst [vmem:[#allocation13_spill] sm:$0xff] %v4778_v25  ;;  %v4785_v14 = vsub.f32 %v6447_v4, %v4397_v53  ;;  %v354_v38 = vmul.f32 %v4778_v25, %v4778_v25  ;;  %v470_v40 = vsel %vm99_vm0, %v353_v15, 0.0 }
 0x10d   :  { %v461_v47 = vadd.f32 %v460_v58, %v459_v6  ;;  %v6449_v6 = vld [vmem:[#allocation15_spill] sm:$0xff] }
 0x10e   :  { %6448 = vst [vmem:[#allocation14_spill] sm:$0xff] %v4785_v14  ;;  %v4792_v61 = vsub.f32 %v6449_v6, %v4397_v53  ;;  %v355_v2 = vmul.f32 %v4785_v14, %v4785_v14  ;;  %v472_v44 = vsel %vm99_vm0, %v354_v38, 0.0 }
 0x10f   :  { %v463_v0 = vadd.f32 %v462_v62, %v461_v47  ;;  %v6451_v47 = vld [vmem:[#allocation16_spill] sm:$0xff] }
 0x110   :  { %6450 = vst [vmem:[#allocation15_spill] sm:$0xff] %v4792_v61  ;;  %v4799_v4 = vsub.f32 %v6451_v47, %v4397_v53  ;;  %v356_v25 = vmul.f32 %v4792_v61, %v4792_v61  ;;  %v474_v15 = vsel %vm99_vm0, %v355_v2, 0.0 }
 0x111   :  { %v465_v58 = vadd.f32 %v464_v13, %v463_v0  ;;  %v6453_v0 = vld [vmem:[#allocation17_spill] sm:$0xff] }
 0x112   :  { %6452 = vst [vmem:[#allocation16_spill] sm:$0xff] %v4799_v4  ;;  %v4806_v6 = vsub.f32 %v6453_v0, %v4397_v53  ;;  %v357_v14 = vmul.f32 %v4799_v4, %v4799_v4  ;;  %v476_v38 = vsel %vm99_vm0, %v356_v25, 0.0 }
 0x113   :  { %v467_v62 = vadd.f32 %v466_v21, %v465_v58  ;;  %v6455_v58 = vld [vmem:[#allocation18_spill] sm:$0xff] }
 0x114   :  { %6454 = vst [vmem:[#allocation17_spill] sm:$0xff] %v4806_v6  ;;  %v4813_v47 = vsub.f32 %v6455_v58, %v4397_v53  ;;  %v358_v61 = vmul.f32 %v4806_v6, %v4806_v6  ;;  %v478_v2 = vsel %vm99_vm0, %v357_v14, 0.0 }
 0x115   :  { %v469_v13 = vadd.f32 %v468_v31, %v467_v62  ;;  %v6457_v62 = vld [vmem:[#allocation19_spill] sm:$0xff] }
 0x116   :  { %6456 = vst [vmem:[#allocation18_spill] sm:$0xff] %v4813_v47  ;;  %v4820_v0 = vsub.f32 %v6457_v62, %v4397_v53  ;;  %v359_v4 = vmul.f32 %v4813_v47, %v4813_v47  ;;  %v480_v25 = vsel %vm99_vm0, %v358_v61, 0.0 }
 0x117   :  { %v471_v21 = vadd.f32 %v470_v40, %v469_v13  ;;  %v6459_v13 = vld [vmem:[#allocation20_spill] sm:$0xff] }
 0x118   :  { %6458 = vst [vmem:[#allocation19_spill] sm:$0xff] %v4820_v0  ;;  %v4827_v58 = vsub.f32 %v6459_v13, %v4397_v53  ;;  %v360_v62 = vmul.f32 %v4820_v0, %v4820_v0  ;;  %v482_v13 = vsel %vm99_vm0, %v359_v4, 0.0 }
 0x119   :  { %v473_v31 = vadd.f32 %v472_v44, %v471_v21  ;;  %v4834_v21 = vsub.f32 %v4393_v26, %v4397_v53 }
 0x11a   :  { %6460 = vst [vmem:[#allocation20_spill] sm:$0xff] %v4827_v58 }
 0x11b   :  { %v475_v40 = vadd.f32 %v474_v15, %v473_v31  ;;  %v361_v31 = vmul.f32 %v4827_v58, %v4827_v58  ;;  %v362_v14 = vmul.f32 %v4834_v21, %v4834_v21 }
 0x11d   :  { %v477_v44 = vadd.f32 %v476_v38, %v475_v40  ;;  %v484_v38 = vsel %vm99_vm0, %v360_v62, 0.0  ;;  %v486_v26 = vsel %vm99_vm0, %v361_v31, 0.0  ;;  %v488_v0 = vsel %vm99_vm0, %v362_v14, 0.0 }
 0x11f   :  { %v479_v15 = vadd.f32 %v478_v2, %v477_v44 }
 0x121   :  { %v481_v6 = vadd.f32 %v480_v25, %v479_v15 }
 0x123   :  { %v483_v40 = vadd.f32 %v482_v13, %v481_v6  ;;  %v4850_v6 = vld [vmem:[%s6368_s1] ss:$0 sm:$0xff] }
 0x124   :  { %v505_v62 = vmul.f32 %v4850_v6, %v4409_v9  ;;  %v509_v13 = vmul.f32 %v4850_v6, %v4433_v8  ;;  %v510_v9 = vmul.f32 %v4850_v6, %v4442_v11  ;;  %v4886_v8 = vmul.f32 %v4850_v6, %v4477_v30 }
 0x125   :  { %v485_v53 = vadd.f32 %v484_v38, %v483_v40  ;;  %v4890_v11 = vmul.f32 %v4850_v6, %v4484_v33  ;;  %v6462_v30 = vmov 0.0   ;;  %v4950_v33 = vmul.f32 %v4850_v6, %v4505_v42 }
 0x126   :  { %2273 = vst.msk [vmem:[#allocation3] sm:$0xff] %vm1755_vm2, %v6462_v30  ;;  %2276 = vst.msk [vmem:[#allocation3 + $0x10] sm:$0xff] %vm1755_vm2, %v6462_v30  ;;  %v4970_v42 = vmul.f32 %v4850_v6, %v4554_v63  ;;  %v4990_v63 = vmul.f32 %v4850_v6, %v4589_v23  ;;  %v5010_v23 = vmul.f32 %v4850_v6, %v4624_v46 }
 0x127   :  { %v487_v47 = vadd.f32 %v486_v26, %v485_v53  ;;  %2278 = vst.msk [vmem:[#allocation3 + $0x20] sm:$0xff] %vm1755_vm2, %v6462_v30  ;;  %2280 = vst.msk [vmem:[#allocation3 + $0x30] sm:$0xff] %vm1755_vm2, %v6462_v30  ;;  %v5033_v46 = vmul.f32 %v4850_v6, %v4652_v5 }
 0x128   :  { %2282 = vst.msk [vmem:[#allocation3 + $0x40] sm:$0xff] %vm1755_vm2, %v6462_v30  ;;  %2284 = vst.msk [vmem:[#allocation3 + $0x50] sm:$0xff] %vm1755_vm2, %v6462_v30 }
 0x129   :  { %v489_v61 = vadd.f32 %v488_v0, %v487_v47  ;;  %v506_v47 = vmul.f32 %v4850_v6, %v4413_v34  ;;  %v507_v0 = vmul.f32 %v4850_v6, %v4417_v52  ;;  %v4870_v34 = vmul.f32 %v4850_v6, %v4463_v24  ;;  %2286 = vst.msk [vmem:[#allocation3 + $0x60] sm:$0xff] %vm1755_vm2, %v6462_v30 }
 0x12a   :  { %v4874_v52 = vmul.f32 %v4850_v6, %v4470_v27  ;;  %v4894_v24 = vmul.f32 %v4850_v6, %v4491_v36  ;;  %v4906_v27 = vmul.f32 %v4850_v6, %v4526_v51  ;;  %2288 = vst.msk [vmem:[#allocation3 + $0x70] sm:$0xff] %vm1755_vm2, %v6462_v30  ;;  %2290 = vst.msk [vmem:[#allocation3 + $0x80] sm:$0xff] %vm1755_vm2, %v6462_v30 }
 0x12b   :  { %v490_v2 = vrot.slane %v489_v61, 4  ;;  %2292 = vst.msk [vmem:[#allocation3 + $0x90] sm:$0xff] %vm1755_vm2, %v6462_v30  ;;  %2294 = vst.msk [vmem:[#allocation3 + $0xa0] sm:$0xff] %vm1755_vm2, %v6462_v30  ;;  %v4954_v36 = vmul.f32 %v4850_v6, %v4512_v45  ;;  %v4966_v51 = vmul.f32 %v4850_v6, %v4547_v60  ;;  %v4974_v45 = vmul.f32 %v4850_v6, %v4575_v16 }
 0x12c   :  { %2296 = vst.msk [vmem:[#allocation3 + $0xb0] sm:$0xff] %vm1755_vm2, %v6462_v30  ;;  %2298 = vst.msk [vmem:[#allocation3 + $0xc0] sm:$0xff] %vm1755_vm2, %v6462_v30  ;;  %v4986_v60 = vmul.f32 %v4850_v6, %v4568_v12  ;;  %v4994_v16 = vmul.f32 %v4850_v6, %v4596_v28  ;;  %v5006_v12 = vmul.f32 %v4850_v6, %v4617_v41  ;;  %v5017_v28 = vld [vmem:[%s6369_s2] ss:$0 sm:$0xff]  ;;  %s3679_s2 = smov 12  }
 0x12d   :  { %v491_v44 = vadd.f32 %v490_v2, %v489_v61  ;;  %2300 = vst.msk [vmem:[#allocation3 + $0xd0] sm:$0xff] %vm1755_vm2, %v6462_v30  ;;  %2302 = vst.msk [vmem:[#allocation3 + $0xe0] sm:$0xff] %vm1755_vm2, %v6462_v30  ;;  %v5029_v41 = vmul.f32 %v4850_v6, %v4645_v59 }
 0x12e   :  { %2304 = vst.msk [vmem:[#allocation3 + $0xf0] sm:$0xff] %vm1755_vm2, %v6462_v30  ;;  %2306 = vst.msk [vmem:[#allocation3 + $0x100] sm:$0xff] %vm1755_vm2, %v6462_v30 }
 0x12f   :  { %v492_v56 = vrot.slane %v491_v44, 2  ;;  %2308 = vst.msk [vmem:[#allocation3 + $0x110] sm:$0xff] %vm1755_vm2, %v6462_v30  ;;  %2310 = vst.msk [vmem:[#allocation3 + $0x120] sm:$0xff] %vm1755_vm2, %v6462_v30 }
 0x130   :  { %2312 = vst.msk [vmem:[#allocation3 + $0x130] sm:$0xff] %vm1755_vm2, %v6462_v30 }
 0x131   :  { %v493_v58 = vadd.f32 %v492_v56, %v491_v44  ;;  %v503_v56 = vmul.f32 %v4850_v6, %v4401_v18  ;;  %v4878_v18 = vmul.f32 %v4850_v6, %v4449_v1  ;;  %v4898_v1 = vmul.f32 %v4850_v6, %v4498_v39  ;;  %2301 = vst.msk [vmem:[#allocation3 + $0xd8] sm:$0x3] %vm2274_vm11, %v6462_v30 }
 0x132   :  { %v4958_v39 = vmul.f32 %v4850_v6, %v4533_v54  ;;  %v4978_v54 = vmul.f32 %v4850_v6, %v4582_v20  ;;  %v4998_v20 = vmul.f32 %v4850_v6, %v4631_v50  ;;  %v5021_v50 = vmul.f32 %v4850_v6, %v4603_v32  ;;  %2303 = vst.msk [vmem:[#allocation3 + $0xe8] sm:$0x3] %vm2274_vm11, %v6462_v30 }
 0x133   :  { %v494_v49 = vrot.slane %v493_v58, 1  ;;  %2305 = vst.msk [vmem:[#allocation3 + $0xf8] sm:$0x3] %vm2274_vm11, %v6462_v30  ;;  %2307 = vst.msk [vmem:[#allocation3 + $0x108] sm:$0x3] %vm2274_vm11, %v6462_v30 }
 0x134   :  { %2309 = vst.msk [vmem:[#allocation3 + $0x118] sm:$0x3] %vm2274_vm11, %v6462_v30  ;;  %2311 = vst.msk [vmem:[#allocation3 + $0x128] sm:$0x3] %vm2274_vm11, %v6462_v30 }
 0x135   :  { %v495_v4 = vadd.f32 %v494_v49, %v493_v58  ;;  %v508_v49 = vmul.f32 %v4850_v6, %v4427_v3  ;;  %v6461_v58 = vld [vmem:[#allocation21_spill] sm:$0xff]  ;;  %v4882_v3 = vmul.f32 %v4850_v6, %v4456_v19  ;;  %v4902_v19 = vmul.f32 %v4850_v6, %v4519_v48  ;;  %2275 = vst.msk [vmem:[#allocation3 + $0x8] sm:$0x3] %vm2274_vm11, %v6462_v30 }
 0x136   :  { %v504_v31 = vmul.f32 %v4850_v6, %v6461_v58  ;;  %v4962_v48 = vmul.f32 %v4850_v6, %v4540_v57  ;;  %v4982_v57 = vmul.f32 %v4850_v6, %v4561_v7  ;;  %v5002_v7 = vmul.f32 %v4850_v6, %v4638_v55  ;;  %2277 = vst.msk [vmem:[#allocation3 + $0x18] sm:$0x3] %vm2274_vm11, %v6462_v30 }
 0x137   :  { %v496_v25 = vmul.f32 0.001953125, %v495_v4  ;;  %v5025_v55 = vmul.f32 %v4850_v6, %v4610_v37  ;;  %2279 = vst.msk [vmem:[#allocation3 + $0x28] sm:$0x3] %vm2274_vm11, %v6462_v30  ;;  %2281 = vst.msk [vmem:[#allocation3 + $0x38] sm:$0x3] %vm2274_vm11, %v6462_v30 }
 0x138   :  { %2283 = vst.msk [vmem:[#allocation3 + $0x48] sm:$0x3] %vm2274_vm11, %v6462_v30  ;;  %2285 = vst.msk [vmem:[#allocation3 + $0x58] sm:$0x3] %vm2274_vm11, %v6462_v30 }
 0x139   :  { %v567_v15 = vadd.f32 1e-05, %v496_v25  ;;  %2287 = vst.msk [vmem:[#allocation3 + $0x68] sm:$0x3] %vm2274_vm11, %v6462_v30  ;;  %2289 = vst.msk [vmem:[#allocation3 + $0x78] sm:$0x3] %vm2274_vm11, %v6462_v30 }
 0x13a   :  { %2291 = vst.msk [vmem:[#allocation3 + $0x88] sm:$0x3] %vm2274_vm11, %v6462_v30  ;;  %2293 = vst.msk [vmem:[#allocation3 + $0x98] sm:$0x3] %vm2274_vm11, %v6462_v30 }
 0x13b   :  { %3650 = vrsqrt.f32 %v567_v15  ;;  %2295 = vst.msk [vmem:[#allocation3 + $0xa8] sm:$0x3] %vm2274_vm11, %v6462_v30  ;;  %2297 = vst.msk [vmem:[#allocation3 + $0xb8] sm:$0x3] %vm2274_vm11, %v6462_v30 }
 0x13c   :  { %2299 = vst.msk [vmem:[#allocation3 + $0xc8] sm:$0x3] %vm2274_vm11, %v6462_v30  ;;  %2313 = vst.msk [vmem:[#allocation3 + $0x138] sm:$0x3] %vm2274_vm11, %v6462_v30 }
 0x148   :  { %v5012_v14 = vpop.eup %3650 }
 0x149   :  { %v571_v38 = vmul.f32 %v5012_v14, %v505_v62  ;;  %v572_v40 = vmul.f32 %v5012_v14, %v506_v47  ;;  %v573_v26 = vmul.f32 %v5012_v14, %v507_v0  ;;  %v574_v32 = vmul.f32 %v5012_v14, %v508_v49 }
 0x14a   :  { %v569_v53 = vmul.f32 %v5012_v14, %v503_v56  ;;  %v570_v37 = vmul.f32 %v5012_v14, %v504_v31  ;;  %v575_v61 = vmul.f32 %v5012_v14, %v509_v13  ;;  %v576_v59 = vmul.f32 %v5012_v14, %v510_v9 }
 0x14b   :  { %v641_v2 = vadd.f32 %v5017_v28, %v571_v38  ;;  %v642_v5 = vadd.f32 %v5017_v28, %v572_v40  ;;  %v643_v44 = vadd.f32 %v5017_v28, %v573_v26  ;;  %v644_v4 = vadd.f32 %v5017_v28, %v574_v32 }
 0x14c   :  { %v639_v25 = vadd.f32 %v5017_v28, %v569_v53  ;;  %v640_v15 = vadd.f32 %v5017_v28, %v570_v37  ;;  %v645_v62 = vadd.f32 %v5017_v28, %v575_v61  ;;  %v646_v47 = vadd.f32 %v5017_v28, %v576_v59 }
 0x14d   :  { %v705_v0 = vmax.f32 %v641_v2, 0.0  ;;  %v706_v49 = vmax.f32 %v642_v5, 0.0  ;;  %v707_v56 = vmax.f32 %v643_v44, 0.0  ;;  %v708_v58 = vmax.f32 %v644_v4, 0.0 }
 0x14e   :  { %v703_v31 = vmax.f32 %v639_v25, 0.0  ;;  %v704_v13 = vmax.f32 %v640_v15, 0.0  ;;  %v709_v9 = vmax.f32 %v645_v62, 0.0  ;;  %v710_v38 = vmax.f32 %v646_v47, 0.0 }
 0x14f   :  { %879 = vst.msk [vmem:[#allocation2 + $0x31] sm:$0xff] %vm99_vm0, %v705_v0  ;;  %880 = vst.msk [vmem:[#allocation2 + $0x39] sm:$0xff] %vm99_vm0, %v706_v49  ;;  %v579_v40 = vmul.f32 %v5012_v14, %v4870_v34  ;;  %v580_v26 = vmul.f32 %v5012_v14, %v4874_v52  ;;  %v577_v32 = vmul.f32 %v5012_v14, %v4878_v18 }
 0x150   :  { %881 = vst.msk [vmem:[#allocation2 + $0x49] sm:$0xff] %vm99_vm0, %v707_v56  ;;  %882 = vst.msk [vmem:[#allocation2 + $0x51] sm:$0xff] %vm99_vm0, %v708_v58  ;;  %v578_v53 = vmul.f32 %v5012_v14, %v4882_v3  ;;  %v581_v34 = vmul.f32 %v5012_v14, %v4886_v8  ;;  %v582_v52 = vmul.f32 %v5012_v14, %v4890_v11 }
 0x151   :  { %877 = vst.msk [vmem:[#allocation2 + $0x19] sm:$0xff] %vm99_vm0, %v703_v31  ;;  %878 = vst.msk [vmem:[#allocation2 + $0x21] sm:$0xff] %vm99_vm0, %v704_v13  ;;  %v583_v18 = vmul.f32 %v5012_v14, %v4894_v24  ;;  %v584_v3 = vmul.f32 %v5012_v14, %v4898_v1  ;;  %v649_v37 = vadd.f32 %v5017_v28, %v579_v40 }
 0x152   :  { %883 = vst.msk [vmem:[#allocation2 + $0x61] sm:$0xff] %vm99_vm0, %v709_v9  ;;  %884 = vst.msk [vmem:[#allocation2 + $0x69] sm:$0xff] %vm99_vm0, %v710_v38  ;;  %v650_v61 = vadd.f32 %v5017_v28, %v580_v26  ;;  %v647_v59 = vadd.f32 %v5017_v28, %v577_v32  ;;  %v648_v2 = vadd.f32 %v5017_v28, %v578_v53 }
 0x153   :  { %v651_v5 = vadd.f32 %v5017_v28, %v581_v34  ;;  %v652_v8 = vadd.f32 %v5017_v28, %v582_v52  ;;  %v653_v11 = vadd.f32 %v5017_v28, %v583_v18  ;;  %v654_v44 = vadd.f32 %v5017_v28, %v584_v3 }
 0x154   :  { %v713_v24 = vmax.f32 %v649_v37, 0.0  ;;  %v714_v4 = vmax.f32 %v650_v61, 0.0  ;;  %v711_v25 = vmax.f32 %v647_v59, 0.0  ;;  %v712_v1 = vmax.f32 %v648_v2, 0.0 }
 0x155   :  { %v715_v15 = vmax.f32 %v651_v5, 0.0  ;;  %v716_v62 = vmax.f32 %v652_v8, 0.0  ;;  %v717_v47 = vmax.f32 %v653_v11, 0.0  ;;  %v718_v0 = vmax.f32 %v654_v44, 0.0 }
 0x156   :  { %887 = vst.msk [vmem:[#allocation2 + $0x91] sm:$0xff] %vm99_vm0, %v713_v24  ;;  %888 = vst.msk [vmem:[#allocation2 + $0x99] sm:$0xff] %vm99_vm0, %v714_v4  ;;  %v587_v49 = vmul.f32 %v5012_v14, %v4902_v19  ;;  %v588_v56 = vmul.f32 %v5012_v14, %v4906_v27  ;;  %v585_v58 = vmul.f32 %v5012_v14, %v4950_v33  ;;  %v1007_v13 = vld [vmem:[#allocation2 + $0x32] ss:$2 sm:$0xff]  ;;  %v975_v9 = vld [vmem:[#allocation2 + $0x31] ss:$2 sm:$0xff] }
 0x157   :  { %885 = vst.msk [vmem:[#allocation2 + $0x79] sm:$0xff] %vm99_vm0, %v711_v25  ;;  %886 = vst.msk [vmem:[#allocation2 + $0x81] sm:$0xff] %vm99_vm0, %v712_v1  ;;  %v586_v31 = vmul.f32 %v5012_v14, %v4954_v36  ;;  %v589_v19 = vmul.f32 %v5012_v14, %v4958_v39  ;;  %v590_v27 = vmul.f32 %v5012_v14, %v4962_v48  ;;  %1309 = vrot.lane.b32.xlu1 %v1007_v13, %s3677_s23  ;;  %v1038_v39 = vld [vmem:[#allocation2 + $0x48] ss:$2 sm:$0xff] }
 0x158   :  { %889 = vst.msk [vmem:[#allocation2 + $0xa9] sm:$0xff] %vm99_vm0, %v715_v15  ;;  %890 = vst.msk [vmem:[#allocation2 + $0xb1] sm:$0xff] %vm99_vm0, %v716_v62  ;;  %v591_v33 = vmul.f32 %v5012_v14, %v4966_v51  ;;  %v592_v36 = vmul.f32 %v5012_v14, %v4970_v42  ;;  %1245 = vrot.lane.b32.xlu0 %v975_v9, %s3678_s24  ;;  %v657_v38 = vadd.f32 %v5017_v28, %v587_v49  ;;  %v1036_v32 = vld [vmem:[#allocation2 + $0x18] ss:$2 sm:$0xff]  ;;  %v1070_v49 = vld [vmem:[#allocation2 + $0x49] ss:$2 sm:$0xff] }
 0x159   :  { %891 = vst.msk [vmem:[#allocation2 + $0xc1] sm:$0xff] %vm99_vm0, %v717_v47  ;;  %892 = vst.msk [vmem:[#allocation2 + $0xc9] sm:$0xff] %vm99_vm0, %v718_v0  ;;  %v658_v40 = vadd.f32 %v5017_v28, %v588_v56  ;;  %v655_v26 = vadd.f32 %v5017_v28, %v585_v58  ;;  %v656_v48 = vadd.f32 %v5017_v28, %v586_v31  ;;  %v977_v8 = vld [vmem:[#allocation2 + $0x61] ss:$2 sm:$0xff] }
 0x15a   :  { %v659_v53 = vadd.f32 %v5017_v28, %v589_v19  ;;  %v660_v51 = vadd.f32 %v5017_v28, %v590_v27  ;;  %v661_v42 = vadd.f32 %v5017_v28, %v591_v33  ;;  %v662_v34 = vadd.f32 %v5017_v28, %v592_v36 }
 0x15b   :  { %v595_v52 = vmul.f32 %v5012_v14, %v4974_v45  ;;  %v596_v18 = vmul.f32 %v5012_v14, %v4978_v54  ;;  %v593_v3 = vmul.f32 %v5012_v14, %v4982_v57  ;;  %v594_v37 = vmul.f32 %v5012_v14, %v4986_v60  ;;  %1373 = vrot.lane.b32.xlu1 %v1038_v39, %s3679_s2  ;;  %v1068_v60 = vld [vmem:[#allocation2 + $0x19] ss:$2 sm:$0xff]  ;;  %v1009_v39 = vld [vmem:[#allocation2 + $0x62] ss:$2 sm:$0xff] }
 0x15c   :  { %v597_v61 = vmul.f32 %v5012_v14, %v4990_v63  ;;  %v598_v59 = vmul.f32 %v5012_v14, %v4994_v16  ;;  %v603_v2 = vmul.f32 %v5012_v14, %v4998_v20  ;;  %1371 = vrot.lane.b32.xlu0 %v1036_v32, %s3679_s2  ;;  %v721_v45 = vmax.f32 %v657_v38, 0.0 }
 0x15d   :  { %v722_v54 = vmax.f32 %v658_v40, 0.0  ;;  %v719_v57 = vmax.f32 %v655_v26, 0.0  ;;  %v720_v5 = vmax.f32 %v656_v48, 0.0  ;;  %v665_v11 = vadd.f32 %v5017_v28, %v595_v52  ;;  %v979_v32 = vld [vmem:[#allocation2 + $0x91] ss:$2 sm:$0xff] }
 0x15e   :  { %v666_v63 = vadd.f32 %v5017_v28, %v596_v18  ;;  %v663_v16 = vadd.f32 %v5017_v28, %v593_v3  ;;  %v664_v44 = vadd.f32 %v5017_v28, %v594_v37  ;;  %895 = vst.msk [vmem:[#allocation2 + $0xf1] sm:$0xff] %vm99_vm0, %v721_v45  ;;  %v667_v20 = vadd.f32 %v5017_v28, %v597_v61 }
 0x15f   :  { %896 = vst.msk [vmem:[#allocation2 + $0xf9] sm:$0xff] %vm99_vm0, %v722_v54  ;;  %893 = vst.msk [vmem:[#allocation2 + $0xd9] sm:$0xff] %vm99_vm0, %v719_v57  ;;  %v668_v24 = vadd.f32 %v5017_v28, %v598_v59  ;;  %v604_v4 = vmul.f32 %v5012_v14, %v5002_v7  ;;  %v673_v25 = vadd.f32 %v5017_v28, %v603_v2  ;;  %1247 = vrot.lane.b32.xlu1 %v977_v8, %s3678_s24  ;;  %v1132_v59 = vld [vmem:[#allocation2 + $0x30] ss:$2 sm:$0xff]  ;;  %v6464_v8 = vld [vmem:[#allocation23_spill] sm:$0xff] }
 0x160   :  { %894 = vst.msk [vmem:[#allocation2 + $0xe1] sm:$0xff] %vm99_vm0, %v720_v5  ;;  %v601_v1 = vmul.f32 %v5012_v14, %v5006_v12  ;;  %v602_v15 = vmul.f32 %v5012_v14, %v5010_v23  ;;  %v599_v62 = vmul.f32 %v5012_v14, %v5021_v50  ;;  %v600_v47 = vmul.f32 %v5012_v14, %v5025_v55  ;;  %v1100_v23 = vld [vmem:[#allocation2 + $0x1a] ss:$2 sm:$0xff]  ;;  %v1102_v2 = vld [vmem:[#allocation2 + $0x4a] ss:$2 sm:$0xff] }
 0x161   :  { %1435 = vrot.lane.b32.xlu0 %v1068_v60, %s3680_s27  ;;  %v674_v7 = vadd.f32 %v5017_v28, %v604_v4  ;;  %v605_v0 = vmul.f32 %v5012_v14, %v5029_v41  ;;  %v606_v12 = vmul.f32 %v5012_v14, %v5033_v46  ;;  %v723_v56 = vmax.f32 %v659_v53, 0.0  ;;  %v6463_v5 = vld [vmem:[#allocation22_spill] sm:$0xff] }
 0x162   :  { %v724_v50 = vmax.f32 %v660_v51, 0.0  ;;  %v671_v58 = vadd.f32 %v5017_v28, %v601_v1  ;;  %v672_v55 = vadd.f32 %v5017_v28, %v602_v15  ;;  %v725_v31 = vmax.f32 %v661_v42, 0.0 }
 0x163   :  { %v726_v13 = vmax.f32 %v662_v34, 0.0  ;;  %v669_v9 = vadd.f32 %v5017_v28, %v599_v62  ;;  %v670_v19 = vadd.f32 %v5017_v28, %v600_v47  ;;  %897 = vst.msk [vmem:[#allocation2 + $0x109] sm:$0xff] %vm99_vm0, %v723_v56  ;;  %v729_v41 = vmax.f32 %v665_v11, 0.0  ;;  %1499 = vrot.lane.b32.xlu1 %v1100_v23, %s3681_s28  ;;  %v1040_v11 = vld [vmem:[#allocation2 + $0x78] ss:$2 sm:$0xff] }
 0x164   :  { %898 = vst.msk [vmem:[#allocation2 + $0x111] sm:$0xff] %vm99_vm0, %v724_v50  ;;  %v730_v46 = vmax.f32 %v666_v63, 0.0  ;;  %v727_v27 = vmax.f32 %v663_v16, 0.0  ;;  %v728_v33 = vmax.f32 %v664_v44, 0.0  ;;  %899 = vst.msk [vmem:[#allocation2 + $0x121] sm:$0xff] %vm99_vm0, %v725_v31  ;;  %v731_v36 = vmax.f32 %v667_v20, 0.0 }
 0x165   :  { %1437 = vrot.lane.b32.xlu0 %v1070_v49, %s3680_s27  ;;  %900 = vst.msk [vmem:[#allocation2 + $0x129] sm:$0xff] %vm99_vm0, %v726_v13  ;;  %v732_v38 = vmax.f32 %v668_v24, 0.0  ;;  %v737_v40 = vmax.f32 %v673_v25, 0.0  ;;  %v738_v26 = vmax.f32 %v674_v7, 0.0  ;;  %903 = vst.msk [vmem:[#allocation2 + $0x151] sm:$0xff] %vm99_vm0, %v729_v41  ;;  %v675_v48 = vadd.f32 %v5017_v28, %v605_v0  ;;  %v6465_v20 = vld [vmem:[#allocation24_spill] sm:$0xff] }
 0x166   :  { %904 = vst.msk [vmem:[#allocation2 + $0x159] sm:$0xff] %vm99_vm0, %v730_v46  ;;  %901 = vst.msk [vmem:[#allocation2 + $0x139] sm:$0xff] %vm99_vm0, %v727_v27  ;;  %v676_v53 = vadd.f32 %v5017_v28, %v606_v12  ;;  %v541_v51 = vmul.f32 %v4850_v6, %v4659_v10  ;;  %v735_v42 = vmax.f32 %v671_v58, 0.0  ;;  %v736_v34 = vmax.f32 %v672_v55, 0.0  ;;  %v1011_v63 = vld [vmem:[#allocation2 + $0x92] ss:$2 sm:$0xff] }
 0x167   :  { %902 = vst.msk [vmem:[#allocation2 + $0x141] sm:$0xff] %vm99_vm0, %v728_v33  ;;  %905 = vst.msk [vmem:[#allocation2 + $0x169] sm:$0xff] %vm99_vm0, %v731_v36  ;;  %v542_v52 = vmul.f32 %v4850_v6, %v4666_v17  ;;  %v545_v18 = vmul.f32 %v4850_v6, %v4687_v35  ;;  %1311 = vrot.lane.b32.xlu1 %v1009_v39, %s3677_s23  ;;  %v733_v3 = vmax.f32 %v669_v9, 0.0  ;;  %v734_v37 = vmax.f32 %v670_v19, 0.0  ;;  %v6466_v25 = vld [vmem:[#allocation25_spill] sm:$0xff]  ;;  %v6467_v39 = vld [vmem:[#allocation8_spill] sm:$0xff] }
 0x168   :  { %906 = vst.msk [vmem:[#allocation2 + $0x171] sm:$0xff] %vm99_vm0, %v732_v38  ;;  %911 = vst.msk [vmem:[#allocation2 + $0x1e1] sm:$0xff] %vm99_vm0, %v737_v40  ;;  %v546_v61 = vmul.f32 %v4850_v6, %v4694_v43  ;;  %v739_v10 = vmax.f32 %v675_v48, 0.0  ;;  %v740_v17 = vmax.f32 %v676_v53, 0.0  ;;  %v543_v35 = vmul.f32 %v4850_v6, %v4673_v22  ;;  %v1164_v49 = vld [vmem:[#allocation2 + $0x31] ss:$2 sm:$0xff] }
 0x169   :  { %912 = vst.msk [vmem:[#allocation2 + $0x1e9] sm:$0xff] %vm99_vm0, %v738_v26  ;;  %1249 = vrot.lane.b32.xlu0 %v979_v32, %s3678_s24  ;;  %909 = vst.msk [vmem:[#allocation2 + $0x1c9] sm:$0xff] %vm99_vm0, %v735_v42  ;;  %v544_v45 = vmul.f32 %v4850_v6, %v4680_v29  ;;  %v607_v43 = vmul.f32 %v5012_v14, %v541_v51  ;;  %v608_v54 = vmul.f32 %v5012_v14, %v542_v52  ;;  %v1134_v56 = vld [vmem:[#allocation2 + $0x60] ss:$2 sm:$0xff]  ;;  %v1072_v41 = vld [vmem:[#allocation2 + $0x79] ss:$2 sm:$0xff] }
 0x16a   :  { %910 = vst.msk [vmem:[#allocation2 + $0x1d1] sm:$0xff] %vm99_vm0, %v736_v34  ;;  %907 = vst.msk [vmem:[#allocation2 + $0x181] sm:$0xff] %vm99_vm0, %v733_v3  ;;  %v611_v57 = vmul.f32 %v5012_v14, %v545_v18  ;;  %v547_v22 = vmul.f32 %v4850_v6, %v6463_v5  ;;  %v548_v29 = vmul.f32 %v4850_v6, %v6464_v8  ;;  %v1042_v36 = vld [vmem:[#allocation2 + $0xa8] ss:$2 sm:$0xff]  ;;  %v1878_v26 = vld [vmem:[%s6370_s3 + $0x20] sm:$0xf] }
 0x16b   :  { %908 = vst.msk [vmem:[#allocation2 + $0x189] sm:$0xff] %vm99_vm0, %v734_v37  ;;  %913 = vst.msk [vmem:[#allocation2 + $0x1f9] sm:$0xff] %vm99_vm0, %v739_v10  ;;  %1563 = vrot.lane.b32.xlu1 %v1132_v59, %s3682_s29  ;;  %v612_v60 = vmul.f32 %v5012_v14, %v546_v61  ;;  %v609_v16 = vmul.f32 %v5012_v14, %v543_v35  ;;  %v610_v44 = vmul.f32 %v5012_v14, %v544_v45  ;;  %v6468_v48 = vld [vmem:[#allocation9_spill] sm:$0xff]  ;;  %v1877_v51 = vld [vmem:[%s6370_s3 + $0x18] sm:$0xff] }
 0x16c   :  { %914 = vst.msk [vmem:[#allocation2 + $0x201] sm:$0xff] %vm99_vm0, %v740_v17  ;;  %v549_v24 = vmul.f32 %v4850_v6, %v6465_v20  ;;  %v613_v4 = vmul.f32 %v5012_v14, %v547_v22  ;;  %v550_v1 = vmul.f32 %v4850_v6, %v6466_v25  ;;  %v677_v15 = vadd.f32 %v5017_v28, %v607_v43  ;;  %v1196_v61 = vld [vmem:[#allocation2 + $0x32] ss:$2 sm:$0xff]  ;;  %v1166_v59 = vld [vmem:[#allocation2 + $0x61] ss:$2 sm:$0xff] }
 0x16d   :  { %1501 = vrot.lane.b32.xlu0 %v1102_v2, %s3681_s28  ;;  %v678_v62 = vadd.f32 %v5017_v28, %v608_v54  ;;  %v681_v47 = vadd.f32 %v5017_v28, %v611_v57  ;;  %v614_v7 = vmul.f32 %v5012_v14, %v548_v29  ;;  %v682_v0 = vadd.f32 %v5017_v28, %v612_v60  ;;  %v1876_v17 = vld [vmem:[%s6370_s3 + $0x10] sm:$0xff]  ;;  %v1875_v43 = vld [vmem:[%s6370_s3 + $0x8] sm:$0xff]  ;;  %v6469_v5 = vld [vmem:[#allocation26_spill] sm:$0xff] }
 0x16e   :  { %v615_v12 = vmul.f32 %v5012_v14, %v549_v24  ;;  %v616_v23 = vmul.f32 %v5012_v14, %v550_v1  ;;  %v679_v50 = vadd.f32 %v5017_v28, %v609_v16  ;;  %v680_v58 = vadd.f32 %v5017_v28, %v610_v44  ;;  %3541 = vmatprep.subr.msk.mxu0 %vm1935_vm3, %v1878_v26  ;;  %v1074_v54 = vld [vmem:[#allocation2 + $0xa9] ss:$2 sm:$0xff]  ;;  %v6470_v8 = vld [vmem:[#allocation7_spill] sm:$0xff] }
 0x16f   :  { %1375 = vrot.lane.b32.xlu1 %v1040_v11, %s3679_s2  ;;  %v683_v55 = vadd.f32 %v5017_v28, %v613_v4  ;;  %v741_v31 = vmax.f32 %v677_v15, 0.0  ;;  %v742_v13 = vmax.f32 %v678_v62, 0.0  ;;  %v745_v9 = vmax.f32 %v681_v47, 0.0  ;;  %3542 = vmatpush3.msk.msra.mxu0 %vm1935_vm3, %v1878_v26  ;;  %v981_v57 = vld [vmem:[#allocation2 + $0xc1] ss:$2 sm:$0xff]  ;;  %v6471_v62 = vld [vmem:[#allocation10_spill] sm:$0xff] }
 0x170   :  { %v684_v19 = vadd.f32 %v5017_v28, %v614_v7  ;;  %v746_v46 = vmax.f32 %v682_v0, 0.0  ;;  %v685_v27 = vadd.f32 %v5017_v28, %v615_v12  ;;  %v686_v33 = vadd.f32 %v5017_v28, %v616_v23  ;;  %3543 = vmatprep.subr.mxu0 %v1877_v51  ;;  %v1874_v60 = vld [vmem:[%s6370_s3] sm:$0xff]  ;;  %v983_v15 = vld [vmem:[#allocation2 + $0xf1] ss:$2 sm:$0xff] }
 0x171   :  { %1313 = vrot.lane.b32.xlu0 %v1011_v63, %s3677_s23  ;;  %915 = vst.msk [vmem:[#allocation2 + $0x211] sm:$0xff] %vm99_vm0, %v741_v31  ;;  %916 = vst.msk [vmem:[#allocation2 + $0x219] sm:$0xff] %vm99_vm0, %v742_v13  ;;  %v743_v38 = vmax.f32 %v679_v50, 0.0  ;;  %v744_v40 = vmax.f32 %v680_v58, 0.0  ;;  %v553_v32 = vmul.f32 %v4850_v6, %v6467_v39  ;;  %v554_v53 = vmul.f32 %v4850_v6, %v6468_v48  ;;  %v1198_v16 = vld [vmem:[#allocation2 + $0x62] ss:$2 sm:$0xff] }
 0x172   :  { %919 = vst.msk [vmem:[#allocation2 + $0x241] sm:$0xff] %vm99_vm0, %v745_v9  ;;  %920 = vst.msk [vmem:[#allocation2 + $0x249] sm:$0xff] %vm99_vm0, %v746_v46  ;;  %v747_v42 = vmax.f32 %v683_v55, 0.0  ;;  %v748_v34 = vmax.f32 %v684_v19, 0.0  ;;  %v749_v3 = vmax.f32 %v685_v27, 0.0  ;;  %v750_v37 = vmax.f32 %v686_v33, 0.0  ;;  %3544 = vmatpush3.msra.mxu0 %v1877_v51 }
 0x173   :  { %1627 = vrot.lane.b32.xlu1 %v1164_v49, %s3683_s30  ;;  %917 = vst.msk [vmem:[#allocation2 + $0x229] sm:$0xff] %vm99_vm0, %v743_v38  ;;  %918 = vst.msk [vmem:[#allocation2 + $0x231] sm:$0xff] %vm99_vm0, %v744_v40  ;;  %v619_v52 = vmul.f32 %v5012_v14, %v553_v32  ;;  %v620_v18 = vmul.f32 %v5012_v14, %v554_v53  ;;  %3545 = vmatprep.subr.mxu0 %v1876_v17  ;;  %v1104_v44 = vld [vmem:[#allocation2 + $0x7a] ss:$2 sm:$0xff]  ;;  %v6474_v46 = vld [vmem:[#allocation13_spill] sm:$0xff] }
 0x174   :  { %921 = vst.msk [vmem:[#allocation2 + $0x259] sm:$0xff] %vm99_vm0, %v747_v42  ;;  %922 = vst.msk [vmem:[#allocation2 + $0x261] sm:$0xff] %vm99_vm0, %v748_v34  ;;  %v551_v22 = vmul.f32 %v4850_v6, %v6469_v5  ;;  %v552_v29 = vmul.f32 %v4850_v6, %v6470_v8  ;;  %3546 = vmatpush3.msra.mxu0 %v1876_v17  ;;  %v1013_v1 = vld [vmem:[#allocation2 + $0xc2] ss:$2 sm:$0xff]  ;;  %v555_v47 = vmul.f32 %v4850_v6, %v6471_v62  ;;  %v1015_v9 = vld [vmem:[#allocation2 + $0xf2] ss:$2 sm:$0xff] }
 0x175   :  { %1565 = vrot.lane.b32.xlu0 %v1134_v56, %s3682_s29  ;;  %v689_v2 = vadd.f32 %v5017_v28, %v619_v52  ;;  %v690_v10 = vadd.f32 %v5017_v28, %v620_v18  ;;  %923 = vst.msk [vmem:[#allocation2 + $0x271] sm:$0xff] %vm99_vm0, %v749_v3  ;;  %924 = vst.msk [vmem:[#allocation2 + $0x279] sm:$0xff] %vm99_vm0, %v750_v37  ;;  %3547 = vmatprep.subr.mxu0 %v1875_v43  ;;  %v6472_v7 = vld [vmem:[#allocation11_spill] sm:$0xff]  ;;  %v1136_v49 = vld [vmem:[#allocation2 + $0x90] ss:$2 sm:$0xff] }
 0x176   :  { %v617_v11 = vmul.f32 %v5012_v14, %v551_v22  ;;  %v618_v63 = vmul.f32 %v5012_v14, %v552_v29  ;;  %3548 = vmatpush3.msra.mxu0 %v1875_v43  ;;  %v556_v0 = vmul.f32 %v4850_v6, %v6472_v7  ;;  %v621_v12 = vmul.f32 %v5012_v14, %v555_v47  ;;  %v1106_v56 = vld [vmem:[#allocation2 + $0xaa] ss:$2 sm:$0xff]  ;;  %v1168_v38 = vld [vmem:[#allocation2 + $0x91] ss:$2 sm:$0xff]  ;;  %v985_v43 = vld [vmem:[#allocation2 + $0x121] ss:$2 sm:$0xff] }
 0x177   :  { %1439 = vrot.lane.b32.xlu1 %v1072_v41, %s3680_s27  ;;  %v753_v35 = vmax.f32 %v689_v2, 0.0  ;;  %v754_v45 = vmax.f32 %v690_v10, 0.0  ;;  %3549 = vmatprep.subr.mxu0 %v1874_v60  ;;  %v1044_v13 = vld [vmem:[#allocation2 + $0xd8] ss:$2 sm:$0xff]  ;;  %v6473_v19 = vld [vmem:[#allocation12_spill] sm:$0xff]  ;;  %v558_v27 = vmul.f32 %v4850_v6, %v6474_v46  ;;  %v6476_v52 = vld [vmem:[#allocation17_spill] sm:$0xff] }
 0x178   :  { %v687_v20 = vadd.f32 %v5017_v28, %v617_v11  ;;  %v688_v24 = vadd.f32 %v5017_v28, %v618_v63  ;;  %3550 = vmatpush3.msra.mxu0 %v1874_v60  ;;  %v622_v23 = vmul.f32 %v5012_v14, %v556_v0  ;;  %v691_v50 = vadd.f32 %v5017_v28, %v621_v12  ;;  %v1138_v40 = vld [vmem:[#allocation2 + $0xc0] ss:$2 sm:$0xff]  ;;  %v1076_v53 = vld [vmem:[#allocation2 + $0xd9] ss:$2 sm:$0xff]  ;;  %v1140_v0 = vld [vmem:[#allocation2 + $0xf0] ss:$2 sm:$0xff] }
 0x179   :  { %1377 = vrot.lane.b32.xlu0 %v1042_v36, %s3679_s2  ;;  %927 = vst.msk [vmem:[#allocation2 + $0x2a1] sm:$0xff] %vm99_vm0, %v753_v35  ;;  %928 = vst.msk [vmem:[#allocation2 + $0x2a9] sm:$0xff] %vm99_vm0, %v754_v45  ;;  %v557_v41 = vmul.f32 %v4850_v6, %v6473_v19  ;;  %v624_v36 = vmul.f32 %v5012_v14, %v558_v27  ;;  %v1046_v51 = vld [vmem:[#allocation2 + $0x108] ss:$2 sm:$0xff]  ;;  %v562_v18 = vmul.f32 %v4850_v6, %v6476_v52  ;;  %v1078_v45 = vld [vmem:[#allocation2 + $0x109] ss:$2 sm:$0xff] }
 0x17a   :  { %v751_v4 = vmax.f32 %v687_v20, 0.0  ;;  %v752_v25 = vmax.f32 %v688_v24, 0.0  ;;  %v692_v58 = vadd.f32 %v5017_v28, %v622_v23  ;;  %v755_v55 = vmax.f32 %v691_v50, 0.0  ;;  %v6475_v42 = vld [vmem:[#allocation16_spill] sm:$0xff]  ;;  %v6478_v5 = vld [vmem:[#allocation15_spill] sm:$0xff] }
 0x17b   :  { %1691 = vrot.lane.b32.xlu1 %v1196_v61, %s3684_s16  ;;  %v623_v33 = vmul.f32 %v5012_v14, %v557_v41  ;;  %v694_v39 = vadd.f32 %v5017_v28, %v624_v36  ;;  %v561_v34 = vmul.f32 %v4850_v6, %v6475_v42  ;;  %v628_v37 = vmul.f32 %v5012_v14, %v562_v18  ;;  %v1200_v61 = vld [vmem:[#allocation2 + $0x92] ss:$2 sm:$0xff]  ;;  %v1202_v60 = vld [vmem:[#allocation2 + $0xc2] ss:$2 sm:$0xff] }
 0x17c   :  { %925 = vst.msk [vmem:[#allocation2 + $0x289] sm:$0xff] %vm99_vm0, %v751_v4  ;;  %926 = vst.msk [vmem:[#allocation2 + $0x291] sm:$0xff] %vm99_vm0, %v752_v25  ;;  %v756_v31 = vmax.f32 %v692_v58, 0.0  ;;  %v560_v22 = vmul.f32 %v4850_v6, %v6478_v5  ;;  %v1108_v11 = vld [vmem:[#allocation2 + $0xda] ss:$2 sm:$0xff]  ;;  %v566_v27 = vmul.f32 %v4850_v6, %v4834_v21 }
 0x17d   :  { %1629 = vrot.lane.b32.xlu0 %v1166_v59, %s3683_s30  ;;  %929 = vst.msk [vmem:[#allocation2 + $0x2b9] sm:$0xff] %vm99_vm0, %v755_v55  ;;  %v693_v26 = vadd.f32 %v5017_v28, %v623_v33  ;;  %v758_v48 = vmax.f32 %v694_v39, 0.0  ;;  %v627_v3 = vmul.f32 %v5012_v14, %v561_v34  ;;  %v1170_v59 = vld [vmem:[#allocation2 + $0xc1] ss:$2 sm:$0xff]  ;;  %v698_v10 = vadd.f32 %v5017_v28, %v628_v37  ;;  %v1017_v24 = vld [vmem:[#allocation2 + $0x122] ss:$2 sm:$0xff] }
 0x17e   :  { %930 = vst.msk [vmem:[#allocation2 + $0x2c1] sm:$0xff] %vm99_vm0, %v756_v31  ;;  %v626_v29 = vmul.f32 %v5012_v14, %v560_v22  ;;  %v987_v4 = vld [vmem:[#allocation2 + $0x151] ss:$2 sm:$0xff]  ;;  %v1110_v12 = vld [vmem:[#allocation2 + $0x10a] ss:$2 sm:$0xff]  ;;  %v632_v36 = vmul.f32 %v5012_v14, %v566_v27 }
 0x17f   :  { %1441 = vrot.lane.b32.xlu1 %v1074_v54, %s3680_s27  ;;  %v757_v32 = vmax.f32 %v693_v26, 0.0  ;;  %932 = vst.msk [vmem:[#allocation2 + $0x2d9] sm:$0xff] %vm99_vm0, %v758_v48  ;;  %v697_v2 = vadd.f32 %v5017_v28, %v627_v3  ;;  %v762_v35 = vmax.f32 %v698_v10, 0.0  ;;  %v6477_v54 = vld [vmem:[#allocation14_spill] sm:$0xff]  ;;  %v1050_v19 = vld [vmem:[#allocation2 + $0x168] ss:$2 sm:$0xff] }
 0x180   :  { %v6479_v25 = vld [vmem:[#allocation18_spill] sm:$0xff]  ;;  %v6481_v41 = vld [vmem:[#allocation20_spill] sm:$0xff]  ;;  %v702_v39 = vadd.f32 %v5017_v28, %v632_v36 }
 0x181   :  { %1251 = vrot.lane.b32.xlu0 %v981_v57, %s3678_s24  ;;  %931 = vst.msk [vmem:[#allocation2 + $0x2d1] sm:$0xff] %vm99_vm0, %v757_v32  ;;  %v761_v17 = vmax.f32 %v697_v2, 0.0  ;;  %936 = vst.msk [vmem:[#allocation2 + $0x309] sm:$0xff] %vm99_vm0, %v762_v35  ;;  %v559_v57 = vmul.f32 %v4850_v6, %v6477_v54  ;;  %v1048_v58 = vld [vmem:[#allocation2 + $0x138] ss:$2 sm:$0xff]  ;;  %v565_v46 = vmul.f32 %v4850_v6, %v6481_v41 }
 0x182   :  { %v1019_v55 = vld [vmem:[#allocation2 + $0x152] ss:$2 sm:$0xff]  ;;  %v1172_v31 = vld [vmem:[#allocation2 + $0xf1] ss:$2 sm:$0xff]  ;;  %v766_v48 = vmax.f32 %v702_v39, 0.0 }
 0x183   :  { %1693 = vrot.lane.b32.xlu1 %v1198_v16, %s3684_s16  ;;  %935 = vst.msk [vmem:[#allocation2 + $0x301] sm:$0xff] %vm99_vm0, %v761_v17  ;;  %v625_v8 = vmul.f32 %v5012_v14, %v559_v57  ;;  %v696_v16 = vadd.f32 %v5017_v28, %v626_v29  ;;  %v631_v33 = vmul.f32 %v5012_v14, %v565_v46  ;;  %v1082_v21 = vld [vmem:[#allocation2 + $0x169] ss:$2 sm:$0xff]  ;;  %v1144_v52 = vld [vmem:[#allocation2 + $0x150] ss:$2 sm:$0xff] }
 0x184   :  { %940 = vst.msk [vmem:[#allocation2 + $0x339] sm:$0xff] %vm99_vm0, %v766_v48  ;;  %v1114_v18 = vld [vmem:[#allocation2 + $0x16a] ss:$2 sm:$0xff]  ;;  %v1176_v2 = vld [vmem:[#allocation2 + $0x151] ss:$2 sm:$0xff] }
 0x185   :  { %1503 = vrot.lane.b32.xlu0 %v1104_v44, %s3681_s28  ;;  %v695_v63 = vadd.f32 %v5017_v28, %v625_v8  ;;  %v760_v20 = vmax.f32 %v696_v16, 0.0  ;;  %v701_v26 = vadd.f32 %v5017_v28, %v631_v33  ;;  %v1052_v3 = vld [vmem:[#allocation2 + $0x1c8] ss:$2 sm:$0xff]  ;;  %v1178_v22 = vld [vmem:[#allocation2 + $0x181] ss:$2 sm:$0xff] }
 0x186   :  { %v1023_v37 = vld [vmem:[#allocation2 + $0x1e2] ss:$2 sm:$0xff]  ;;  %v1208_v5 = vld [vmem:[#allocation2 + $0x152] ss:$2 sm:$0xff]  ;;  %v1180_v27 = vld [vmem:[#allocation2 + $0x1e1] ss:$2 sm:$0xff] }
 0x187   :  { %1315 = vrot.lane.b32.xlu1 %v1013_v1, %s3677_s23  ;;  %v759_v44 = vmax.f32 %v695_v63, 0.0  ;;  %934 = vst.msk [vmem:[#allocation2 + $0x2f1] sm:$0xff] %vm99_vm0, %v760_v20  ;;  %v563_v1 = vmul.f32 %v4850_v6, %v6479_v25  ;;  %v765_v32 = vmax.f32 %v701_v26, 0.0  ;;  %v1146_v10 = vld [vmem:[#allocation2 + $0x180] ss:$2 sm:$0xff] }
 0x188   :  { %v1116_v20 = vld [vmem:[#allocation2 + $0x1ca] ss:$2 sm:$0xff]  ;;  %v1088_v48 = vld [vmem:[#allocation2 + $0x229] ss:$2 sm:$0xff] }
 0x189   :  { %1253 = vrot.lane.b32.xlu0 %v983_v15, %s3678_s24  ;;  %933 = vst.msk [vmem:[#allocation2 + $0x2e9] sm:$0xff] %vm99_vm0, %v759_v44  ;;  %v6480_v15 = vld [vmem:[#allocation19_spill] sm:$0xff]  ;;  %v629_v47 = vmul.f32 %v5012_v14, %v563_v1  ;;  %939 = vst.msk [vmem:[#allocation2 + $0x331] sm:$0xff] %vm99_vm0, %v765_v32  ;;  %v1150_v33 = vld [vmem:[#allocation2 + $0x210] ss:$2 sm:$0xff] }
 0x18a   :  { %v564_v62 = vmul.f32 %v4850_v6, %v6480_v15  ;;  %v1112_v6 = vld [vmem:[#allocation2 + $0x13a] ss:$2 sm:$0xff]  ;;  %v995_v1 = vld [vmem:[#allocation2 + $0x241] ss:$2 sm:$0xff] }
 0x18b   :  { %1567 = vrot.lane.b32.xlu1 %v1136_v49, %s3682_s29  ;;  %v699_v23 = vadd.f32 %v5017_v28, %v629_v47  ;;  %v1210_v44 = vld [vmem:[#allocation2 + $0x182] ss:$2 sm:$0xff]  ;;  %v1025_v25 = vld [vmem:[#allocation2 + $0x212] ss:$2 sm:$0xff] }
 0x18c   :  { %v630_v7 = vmul.f32 %v5012_v14, %v564_v62  ;;  %v5376_v14 = vpop.permute.xlu1 %1307  ;;  %v941_v47 = vld [vmem:[#allocation2] ss:$2 sm:$0xff] }
 0x18d   :  { %1505 = vrot.lane.b32.xlu0 %v1106_v56, %s3681_s28  ;;  %v763_v56 = vmax.f32 %v699_v23, 0.0 }
 0x18e   :  { %v700_v49 = vadd.f32 %v5017_v28, %v630_v7  ;;  %v1206_v28 = vld [vmem:[#allocation2 + $0x122] ss:$2 sm:$0xff] }
 0x18f   :  { %1379 = vrot.lane.b32.xlu1 %v1044_v13, %s3679_s2  ;;  %937 = vst.msk [vmem:[#allocation2 + $0x319] sm:$0xff] %vm99_vm0, %v763_v56  ;;  %v1142_v13 = vld [vmem:[#allocation2 + $0x120] ss:$2 sm:$0xff] }
 0x190   :  { %v764_v50 = vmax.f32 %v700_v49, 0.0  ;;  %v5382_v42 = vpop.permute.xlu1 %1323  ;;  %v1148_v7 = vld [vmem:[#allocation2 + $0x1e0] ss:$2 sm:$0xff] }
 0x191   :  { %1317 = vrot.lane.b32.xlu0 %v1015_v9, %s3677_s23  ;;  %v1080_v9 = vld [vmem:[#allocation2 + $0x139] ss:$2 sm:$0xff] }
 0x192   :  { %938 = vst.msk [vmem:[#allocation2 + $0x321] sm:$0xff] %vm99_vm0, %v764_v50  ;;  %v1056_v50 = vld [vmem:[#allocation2 + $0x228] ss:$2 sm:$0xff] }
 0x193   :  { %1631 = vrot.lane.b32.xlu1 %v1168_v38, %s3683_s30  ;;  %v1204_v38 = vld [vmem:[#allocation2 + $0xf2] ss:$2 sm:$0xff] }
 0x195   :  { %1569 = vrot.lane.b32.xlu0 %v1138_v40, %s3682_s29  ;;  %v1174_v40 = vld [vmem:[#allocation2 + $0x121] ss:$2 sm:$0xff] }
 0x197   :  { %1443 = vrot.lane.b32.xlu1 %v1076_v53, %s3680_s27  ;;  %v1244_v53 = vpop.permute.xlu0 %1243 }
 0x199   :  { %1381 = vrot.lane.b32.xlu0 %v1046_v51, %s3679_s2  ;;  %v991_v51 = vld [vmem:[#allocation2 + $0x1e1] ss:$2 sm:$0xff] }
 0x19b   :  { %1695 = vrot.lane.b32.xlu1 %v1200_v61, %s3684_s16  ;;  %v5384_v34 = vpop.permute.xlu0 %1259 }
 0x19d   :  { %1633 = vrot.lane.b32.xlu0 %v1170_v59, %s3683_s30 }
 0x19f   :  { %1445 = vrot.lane.b32.xlu1 %v1078_v45, %s3680_s27  ;;  %v1084_v45 = vld [vmem:[#allocation2 + $0x1c9] ss:$2 sm:$0xff] }
 0x1a1   :  { %1255 = vrot.lane.b32.xlu0 %v985_v43, %s3678_s24  ;;  %v1054_v43 = vld [vmem:[#allocation2 + $0x1f8] ss:$2 sm:$0xff] }
 0x1a3   :  { %1697 = vrot.lane.b32.xlu1 %v1202_v60, %s3684_s16  ;;  %v1086_v60 = vld [vmem:[#allocation2 + $0x1f9] ss:$2 sm:$0xff] }
 0x1a5   :  { %1507 = vrot.lane.b32.xlu0 %v1108_v11, %s3681_s28  ;;  %v993_v11 = vld [vmem:[#allocation2 + $0x211] ss:$2 sm:$0xff] }
 0x1a7   :  { %1319 = vrot.lane.b32.xlu1 %v1017_v24, %s3677_s23 }
 0x1a9   :  { %1257 = vrot.lane.b32.xlu0 %v987_v4, %s3678_s24 }
 0x1ab   :  { %1571 = vrot.lane.b32.xlu1 %v1140_v0, %s3682_s29  ;;  %v1118_v0 = vld [vmem:[#allocation2 + $0x1fa] ss:$2 sm:$0xff] }
 0x1ad   :  { %1509 = vrot.lane.b32.xlu0 %v1110_v12, %s3681_s28  ;;  %v1739_v12 = vsel %vm99_vm0, %v941_v47, %v1244_v53 }
 0x1ae   :  { %v1756_v56 = vsel %vm1755_vm2, %v1739_v12, %v5376_v14 }
 0x1af   :  { %1383 = vrot.lane.b32.xlu1 %v1048_v58, %s3679_s2  ;;  %v1027_v58 = vld [vmem:[#allocation2 + $0x242] ss:$2 sm:$0xff] }
 0x1b1   :  { %1321 = vrot.lane.b32.xlu0 %v1019_v55, %s3677_s23 }
 0x1b3   :  { %1635 = vrot.lane.b32.xlu1 %v1172_v31, %s3683_s30 }
 0x1b5   :  { %1573 = vrot.lane.b32.xlu0 %v1142_v13, %s3682_s29 }
 0x1b7   :  { %1447 = vrot.lane.b32.xlu1 %v1080_v9, %s3680_s27  ;;  %v943_v9 = vld [vmem:[#allocation2 + $0x30] ss:$2 sm:$0xff] }
 0x1b9   :  { %1385 = vrot.lane.b32.xlu0 %v1050_v19, %s3679_s2 }
 0x1bb   :  { %1699 = vrot.lane.b32.xlu1 %v1204_v38, %s3684_s16 }
 0x1bd   :  { %1637 = vrot.lane.b32.xlu0 %v1174_v40, %s3683_s30 }
 0x1bf   :  { %1449 = vrot.lane.b32.xlu1 %v1082_v21, %s3680_s27  ;;  %v1058_v21 = vld [vmem:[#allocation2 + $0x258] ss:$2 sm:$0xff] }
 0x1c1   :  { %1511 = vrot.lane.b32.xlu0 %v1112_v6, %s3681_s28 }
 0x1c3   :  { %1701 = vrot.lane.b32.xlu1 %v1206_v28, %s3684_s16 }
 0x1c5   :  { %1261 = vrot.lane.b32.xlu0 %v991_v51, %s3678_s24 }
 0x1c7   :  { %1575 = vrot.lane.b32.xlu1 %v1144_v52, %s3682_s29 }
 0x1c9   :  { %1513 = vrot.lane.b32.xlu0 %v1114_v18, %s3681_s28  ;;  %v5388_v61 = vpop.permute.xlu1 %1309  ;;  %v1212_v18 = vld [vmem:[#allocation2 + $0x1e2] ss:$2 sm:$0xff] }
 0x1ca   :  { %v5390_v59 = vpop.permute.xlu0 %1245 }
 0x1cb   :  { %1387 = vrot.lane.b32.xlu1 %v1052_v3, %s3679_s2  ;;  %v1740_v36 = vsel %vm99_vm0, %v943_v9, %v5390_v59  ;;  %v1182_v3 = vld [vmem:[#allocation2 + $0x211] ss:$2 sm:$0xff] }
 0x1cc   :  { %v1757_v32 = vsel %vm1755_vm2, %v1740_v36, %v5388_v61 }
 0x1cd   :  { %1325 = vrot.lane.b32.xlu0 %v1023_v37, %s3677_s23  ;;  %v5394_v17 = vpop.permute.xlu1 %1373 }
 0x1ce   :  { %v1372_v35 = vpop.permute.xlu0 %1371  ;;  %v1774_v6 = vsel %vm1772_vm4, %v1757_v32, %v5394_v17  ;;  %v997_v17 = vld [vmem:[#allocation2 + $0x271] ss:$2 sm:$0xff] }
 0x1cf   :  { %1639 = vrot.lane.b32.xlu1 %v1176_v2, %s3683_s30  ;;  %v1773_v55 = vsel %vm1772_vm4, %v1756_v56, %v1372_v35  ;;  %v1186_v32 = vld [vmem:[#allocation2 + $0x271] ss:$2 sm:$0xff] }
 0x1d1   :  { %1577 = vrot.lane.b32.xlu0 %v1146_v10, %s3682_s29  ;;  %v5398_v54 = vpop.permute.xlu1 %1247  ;;  %v1090_v10 = vld [vmem:[#allocation2 + $0x259] ss:$2 sm:$0xff] }
 0x1d3   :  { %v1436_v57 = vpop.permute.xlu0 %1435  ;;  %1451 = vrot.lane.b32.xlu1 %v1084_v45, %s3680_s27 }
 0x1d4   :  { %v1790_v19 = vsel %vm1789_vm5, %v1773_v55, %v1436_v57  ;;  %v1120_v57 = vld [vmem:[#allocation2 + $0x22a] ss:$2 sm:$0xff] }
 0x1d5   :  { %1389 = vrot.lane.b32.xlu0 %v1054_v43, %s3679_s2  ;;  %v1500_v8 = vpop.permute.xlu1 %1499  ;;  %v1214_v43 = vld [vmem:[#allocation2 + $0x212] ss:$2 sm:$0xff] }
 0x1d6   :  { %v1807_v41 = vsel %vm1806_vm6, %v1790_v19, %v1500_v8  ;;  %v1029_v8 = vld [vmem:[#allocation2 + $0x272] ss:$2 sm:$0xff] }
 0x1d7   :  { %v5402_v29 = vpop.permute.xlu0 %1437  ;;  %1703 = vrot.lane.b32.xlu1 %v1208_v5, %s3684_s16  ;;  %v1154_v55 = vld [vmem:[#allocation2 + $0x270] ss:$2 sm:$0xff] }
 0x1d8   :  { %v1791_v28 = vsel %vm1789_vm5, %v1774_v6, %v5402_v29  ;;  %v999_v29 = vld [vmem:[#allocation2 + $0x2a1] ss:$2 sm:$0xff] }
 0x1d9   :  { %1641 = vrot.lane.b32.xlu0 %v1178_v22, %s3683_s30  ;;  %v5406_v63 = vpop.permute.xlu1 %1311 }
 0x1db   :  { %v5408_v16 = vpop.permute.xlu0 %1249  ;;  %1453 = vrot.lane.b32.xlu1 %v1086_v60, %s3680_s27 }
 0x1dd   :  { %1263 = vrot.lane.b32.xlu0 %v993_v11, %s3678_s24  ;;  %v1564_v24 = vpop.permute.xlu1 %1563 }
 0x1de   :  { %v1824_v46 = vsel %vm1823_vm7, %v1807_v41, %v1564_v24  ;;  %v1122_v24 = vld [vmem:[#allocation2 + $0x25a] ss:$2 sm:$0xff] }
 0x1df   :  { %v1502_v4 = vpop.permute.xlu0 %1501  ;;  %1705 = vrot.lane.b32.xlu1 %v1210_v44, %s3684_s16  ;;  %v945_v44 = vld [vmem:[#allocation2 + $0x60] ss:$2 sm:$0xff] }
 0x1e0   :  { %v1808_v51 = vsel %vm1806_vm6, %v1791_v28, %v1502_v4  ;;  %v1001_v28 = vld [vmem:[#allocation2 + $0x2d1] ss:$2 sm:$0xff] }
 0x1e1   :  { %1515 = vrot.lane.b32.xlu0 %v1116_v20, %s3681_s28  ;;  %v5414_v15 = vpop.permute.xlu1 %1375  ;;  %v1152_v20 = vld [vmem:[#allocation2 + $0x240] ss:$2 sm:$0xff] }
 0x1e3   :  { %v5416_v62 = vpop.permute.xlu0 %1313  ;;  %1327 = vrot.lane.b32.xlu1 %v1025_v25, %s3677_s23 }
 0x1e5   :  { %1265 = vrot.lane.b32.xlu0 %v995_v1, %s3678_s24  ;;  %v1628_v23 = vpop.permute.xlu1 %1627  ;;  %v1741_v1 = vsel %vm99_vm0, %v945_v44, %v5398_v54 }
 0x1e6   :  { %v1841_v38 = vsel %vm1840_vm8, %v1824_v46, %v1628_v23  ;;  %v1758_v47 = vsel %vm1755_vm2, %v1741_v1, %v5406_v63 }
 0x1e7   :  { %v1566_v49 = vpop.permute.xlu0 %1565  ;;  %1579 = vrot.lane.b32.xlu1 %v1148_v7, %s3682_s29  ;;  %v1060_v7 = vld [vmem:[#allocation2 + $0x288] ss:$2 sm:$0xff]  ;;  %v1775_v12 = vsel %vm1772_vm4, %v1758_v47, %v5414_v15 }
 0x1e8   :  { %v1825_v52 = vsel %vm1823_vm7, %v1808_v51, %v1566_v49 }
 0x1e9   :  { %1517 = vrot.lane.b32.xlu0 %v1118_v0, %s3681_s28  ;;  %v5426_v31 = vpop.permute.xlu1 %1439  ;;  %v1031_v0 = vld [vmem:[#allocation2 + $0x2a2] ss:$2 sm:$0xff] }
 0x1ea   :  { %v1792_v56 = vsel %vm1789_vm5, %v1775_v12, %v5426_v31  ;;  %v1158_v12 = vld [vmem:[#allocation2 + $0x2d0] ss:$2 sm:$0xff] }
 0x1eb   :  { %v5428_v13 = vpop.permute.xlu0 %1377  ;;  %1391 = vrot.lane.b32.xlu1 %v1056_v50, %s3679_s2  ;;  %v947_v50 = vld [vmem:[#allocation2 + $0x90] ss:$2 sm:$0xff] }
 0x1ec   :  { %v1742_v31 = vsel %vm99_vm0, %v947_v50, %v5408_v16 }
 0x1ed   :  { %1329 = vrot.lane.b32.xlu0 %v1027_v58, %s3677_s23  ;;  %v1692_v40 = vpop.permute.xlu1 %1691  ;;  %v1184_v58 = vld [vmem:[#allocation2 + $0x241] ss:$2 sm:$0xff]  ;;  %v1759_v46 = vsel %vm1755_vm2, %v1742_v31, %v5416_v62  ;;  %v1220_v31 = vld [vmem:[#allocation2 + $0x2a2] ss:$2 sm:$0xff] }
 0x1ee   :  { %v1858_v39 = vsel %vm1857_vm9, %v1841_v38, %v1692_v40  ;;  %v1776_v36 = vsel %vm1772_vm4, %v1759_v46, %v5428_v13  ;;  %v1190_v46 = vld [vmem:[#allocation2 + $0x2d1] ss:$2 sm:$0xff] }
 0x1ef   :  { %v1630_v26 = vpop.permute.xlu0 %1629  ;;  %1643 = vrot.lane.b32.xlu1 %v1180_v27, %s3683_s30  ;;  %3551 = vmatprep.mubr.msk.f32.mxu0 %vm1886_vm10, %v1858_v39  ;;  %v1092_v27 = vld [vmem:[#allocation2 + $0x289] ss:$2 sm:$0xff]  ;;  %v1216_v39 = vld [vmem:[#allocation2 + $0x242] ss:$2 sm:$0xff] }
 0x1f0   :  { %v1842_v37 = vsel %vm1840_vm8, %v1825_v52, %v1630_v26 }
 0x1f1   :  { %1581 = vrot.lane.b32.xlu0 %v1150_v33, %s3682_s29  ;;  %v5446_v14 = vpop.permute.xlu1 %1441  ;;  %v1062_v33 = vld [vmem:[#allocation2 + $0x2b8] ss:$2 sm:$0xff] }
 0x1f2   :  { %v1793_v16 = vsel %vm1789_vm5, %v1776_v36, %v5446_v14  ;;  %v1094_v14 = vld [vmem:[#allocation2 + $0x2b9] ss:$2 sm:$0xff] }
 0x1f3   :  { %v5448_v53 = vpop.permute.xlu0 %1251  ;;  %1455 = vrot.lane.b32.xlu1 %v1088_v48, %s3680_s27 }
 0x1f5   :  { %1393 = vrot.lane.b32.xlu0 %v1058_v21, %s3679_s2  ;;  %v1694_v61 = vpop.permute.xlu1 %1693 }
 0x1f6   :  { %v1859_v2 = vsel %vm1857_vm9, %v1842_v37, %v1694_v61 }
 0x1f7   :  { %v1504_v59 = vpop.permute.xlu0 %1503  ;;  %1707 = vrot.lane.b32.xlu1 %v1212_v18, %s3684_s16  ;;  %3552 = vmatmul.mubr.msk.f32.vlgmr.msra.gmra.mxu0 %vm1886_vm10, %v1859_v2  ;;  %v1218_v18 = vld [vmem:[#allocation2 + $0x272] ss:$2 sm:$0xff]  ;;  %v1003_v2 = vld [vmem:[#allocation2 + $0x301] ss:$2 sm:$0xff] }
 0x1f8   :  { %v1809_v54 = vsel %vm1806_vm6, %v1792_v56, %v1504_v59  ;;  %v1033_v59 = vld [vmem:[#allocation2 + $0x2d2] ss:$2 sm:$0xff] }
 0x1f9   :  { %1645 = vrot.lane.b32.xlu0 %v1182_v3, %s3683_s30  ;;  %v5461_v35 = vpop.permute.xlu1 %1315  ;;  %v1124_v3 = vld [vmem:[#allocation2 + $0x28a] ss:$2 sm:$0xff] }
 0x1fb   :  { %v5463_v45 = vpop.permute.xlu0 %1253  ;;  %1457 = vrot.lane.b32.xlu1 %v1090_v10, %s3680_s27 }
 0x1fd   :  { %1267 = vrot.lane.b32.xlu0 %v997_v17, %s3678_s24  ;;  %v1568_v5 = vpop.permute.xlu1 %1567 }
 0x1fe   :  { %v1826_v63 = vsel %vm1823_vm7, %v1809_v54, %v1568_v5  ;;  %v1126_v5 = vld [vmem:[#allocation2 + $0x2ba] ss:$2 sm:$0xff] }
 0x1ff   :  { %v1506_v22 = vpop.permute.xlu0 %1505  ;;  %1709 = vrot.lane.b32.xlu1 %v1214_v43, %s3684_s16  ;;  %v949_v43 = vld [vmem:[#allocation2 + $0xc0] ss:$2 sm:$0xff] }
 0x200   :  { %v1810_v26 = vsel %vm1806_vm6, %v1793_v16, %v1506_v22  ;;  %v1098_v16 = vld [vmem:[#allocation2 + $0x319] ss:$2 sm:$0xff] }
 0x201   :  { %1519 = vrot.lane.b32.xlu0 %v1120_v57, %s3681_s28  ;;  %v5469_v60 = vpop.permute.xlu1 %1379  ;;  %v1156_v57 = vld [vmem:[#allocation2 + $0x2a0] ss:$2 sm:$0xff] }
 0x203   :  { %v5471_v11 = vpop.permute.xlu0 %1317  ;;  %1331 = vrot.lane.b32.xlu1 %v1029_v8, %s3677_s23 }
 0x205   :  { %1269 = vrot.lane.b32.xlu0 %v999_v29, %s3678_s24  ;;  %v1632_v4 = vpop.permute.xlu1 %1631  ;;  %v1743_v29 = vsel %vm99_vm0, %v949_v43, %v5448_v53 }
 0x206   :  { %v1843_v15 = vsel %vm1840_vm8, %v1826_v63, %v1632_v4  ;;  %v1760_v44 = vsel %vm1755_vm2, %v1743_v29, %v5461_v35  ;;  %v1224_v29 = vld [vmem:[#allocation2 + $0x302] ss:$2 sm:$0xff] }
 0x207   :  { %v1570_v25 = vpop.permute.xlu0 %1569  ;;  %1583 = vrot.lane.b32.xlu1 %v1152_v20, %s3682_s29  ;;  %v1064_v20 = vld [vmem:[#allocation2 + $0x2e8] ss:$2 sm:$0xff]  ;;  %v1777_v4 = vsel %vm1772_vm4, %v1760_v44, %v5469_v60 }
 0x208   :  { %v1827_v62 = vsel %vm1823_vm7, %v1810_v26, %v1570_v25 }
 0x209   :  { %1521 = vrot.lane.b32.xlu0 %v1122_v24, %s3681_s28  ;;  %v5483_v23 = vpop.permute.xlu1 %1443  ;;  %v1035_v24 = vld [vmem:[#allocation2 + $0x302] ss:$2 sm:$0xff] }
 0x20a   :  { %v1794_v47 = vsel %vm1789_vm5, %v1777_v4, %v5483_v23 }
 0x20b   :  { %v5485_v49 = vpop.permute.xlu0 %1381  ;;  %1395 = vrot.lane.b32.xlu1 %v1060_v7, %s3679_s2  ;;  %v951_v7 = vld [vmem:[#allocation2 + $0xf0] ss:$2 sm:$0xff] }
 0x20c   :  { %v1744_v23 = vsel %vm99_vm0, %v951_v7, %v5463_v45 }
 0x20d   :  { %1333 = vrot.lane.b32.xlu0 %v1031_v0, %s3677_s23  ;;  %v1696_v9 = vpop.permute.xlu1 %1695  ;;  %v1188_v0 = vld [vmem:[#allocation2 + $0x2a1] ss:$2 sm:$0xff]  ;;  %v1761_v63 = vsel %vm1755_vm2, %v1744_v23, %v5471_v11 }
 0x20e   :  { %v1860_v41 = vsel %vm1857_vm9, %v1843_v15, %v1696_v9  ;;  %v1778_v15 = vsel %vm1772_vm4, %v1761_v63, %v5485_v49 }
 0x20f   :  { %v1634_v19 = vpop.permute.xlu0 %1633  ;;  %1647 = vrot.lane.b32.xlu1 %v1184_v58, %s3683_s30  ;;  %3554 = vmatprep.mubr.msk.f32.mxu0 %vm1886_vm10, %v1860_v41  ;;  %v1096_v58 = vld [vmem:[#allocation2 + $0x2e9] ss:$2 sm:$0xff] }
 0x210   :  { %v1844_v48 = vsel %vm1840_vm8, %v1827_v62, %v1634_v19 }
 0x211   :  { %1585 = vrot.lane.b32.xlu0 %v1154_v55, %s3682_s29  ;;  %v5504_v38 = vpop.permute.xlu1 %1445  ;;  %v1066_v55 = vld [vmem:[#allocation2 + $0x318] ss:$2 sm:$0xff] }
 0x212   :  { %v1795_v45 = vsel %vm1789_vm5, %v1778_v15, %v5504_v38  ;;  %v1128_v38 = vld [vmem:[#allocation2 + $0x2ea] ss:$2 sm:$0xff] }
 0x213   :  { %v5506_v40 = vpop.permute.xlu0 %1255  ;;  %1459 = vrot.lane.b32.xlu1 %v1092_v27, %s3680_s27 }
 0x215   :  { %1397 = vrot.lane.b32.xlu0 %v1062_v33, %s3679_s2  ;;  %v1698_v13 = vpop.permute.xlu1 %1697 }
 0x216   :  { %v1861_v6 = vsel %vm1857_vm9, %v1844_v48, %v1698_v13 }
 0x217   :  { %v1508_v21 = vpop.permute.xlu0 %1507  ;;  %1711 = vrot.lane.b32.xlu1 %v1216_v39, %s3684_s16  ;;  %3555 = vmatmul.mubr.msk.f32.gmra.mxu0 %vm1886_vm10, %v1861_v6  ;;  %v1130_v39 = vld [vmem:[#allocation2 + $0x31a] ss:$2 sm:$0xff] }
 0x218   :  { %v1811_v53 = vsel %vm1806_vm6, %v1794_v47, %v1508_v21  ;;  %v953_v21 = vld [vmem:[#allocation2 + $0x120] ss:$2 sm:$0xff]  ;;  %v1162_v6 = vld [vmem:[#allocation2 + $0x330] ss:$2 sm:$0xff] }
 0x219   :  { %1649 = vrot.lane.b32.xlu0 %v1186_v32, %s3683_s30  ;;  %v5519_v51 = vpop.permute.xlu1 %1319  ;;  %v1222_v32 = vld [vmem:[#allocation2 + $0x2d2] ss:$2 sm:$0xff] }
 0x21b   :  { %v5521_v52 = vpop.permute.xlu0 %1257  ;;  %1461 = vrot.lane.b32.xlu1 %v1094_v14, %s3680_s27  ;;  %v1160_v14 = vld [vmem:[#allocation2 + $0x300] ss:$2 sm:$0xff] }
 0x21d   :  { %1271 = vrot.lane.b32.xlu0 %v1001_v28, %s3678_s24  ;;  %v1572_v37 = vpop.permute.xlu1 %1571 }
 0x21e   :  { %v1828_v35 = vsel %vm1823_vm7, %v1811_v53, %v1572_v37 }
 0x21f   :  { %v1510_v61 = vpop.permute.xlu0 %1509  ;;  %1713 = vrot.lane.b32.xlu1 %v1218_v18, %s3684_s16 }
 0x220   :  { %v1812_v41 = vsel %vm1806_vm6, %v1795_v45, %v1510_v61  ;;  %v1194_v61 = vld [vmem:[#allocation2 + $0x331] ss:$2 sm:$0xff] }
 0x221   :  { %1523 = vrot.lane.b32.xlu0 %v1124_v3, %s3681_s28  ;;  %v5527_v10 = vpop.permute.xlu1 %1383  ;;  %v1745_v3 = vsel %vm99_vm0, %v953_v21, %v5506_v40  ;;  %v955_v40 = vld [vmem:[#allocation2 + $0x150] ss:$2 sm:$0xff] }
 0x222   :  { %v1762_v37 = vsel %vm1755_vm2, %v1745_v3, %v5519_v51  ;;  %v1226_v51 = vld [vmem:[#allocation2 + $0x332] ss:$2 sm:$0xff]  ;;  %v1746_v4 = vsel %vm99_vm0, %v955_v40, %v5521_v52 }
 0x223   :  { %v5529_v17 = vpop.permute.xlu0 %1321  ;;  %1335 = vrot.lane.b32.xlu1 %v1033_v59, %s3677_s23  ;;  %v1192_v59 = vld [vmem:[#allocation2 + $0x301] ss:$2 sm:$0xff] }
 0x225   :  { %1273 = vrot.lane.b32.xlu0 %v1003_v2, %s3678_s24  ;;  %v1636_v22 = vpop.permute.xlu1 %1635  ;;  %v1779_v2 = vsel %vm1772_vm4, %v1762_v37, %v5527_v10 }
 0x226   :  { %v1845_v60 = vsel %vm1840_vm8, %v1828_v35, %v1636_v22 }
 0x227   :  { %v1574_v8 = vpop.permute.xlu0 %1573  ;;  %1587 = vrot.lane.b32.xlu1 %v1156_v57, %s3682_s29 }
 0x228   :  { %v1829_v11 = vsel %vm1823_vm7, %v1812_v41, %v1574_v8 }
 0x229   :  { %1525 = vrot.lane.b32.xlu0 %v1126_v5, %s3681_s28  ;;  %v5541_v25 = vpop.permute.xlu1 %1447 }
 0x22a   :  { %v1796_v5 = vsel %vm1789_vm5, %v1779_v2, %v5541_v25  ;;  %v1763_v25 = vsel %vm1755_vm2, %v1746_v4, %v5529_v17 }
 0x22b   :  { %v5543_v1 = vpop.permute.xlu0 %1385  ;;  %1399 = vrot.lane.b32.xlu1 %v1064_v20, %s3679_s2 }
 0x22c   :  { %v1780_v47 = vsel %vm1772_vm4, %v1763_v25, %v5543_v1 }
 0x22d   :  { %1337 = vrot.lane.b32.xlu0 %v1035_v24, %s3677_s23  ;;  %v1700_v56 = vpop.permute.xlu1 %1699 }
 0x22e   :  { %v1862_v50 = vsel %vm1857_vm9, %v1845_v60, %v1700_v56 }
 0x22f   :  { %v1638_v54 = vpop.permute.xlu0 %1637  ;;  %1651 = vrot.lane.b32.xlu1 %v1188_v0, %s3683_s30  ;;  %3557 = vmatprep.mubr.msk.f32.mxu0 %vm1886_vm10, %v1862_v50 }
 0x230   :  { %v1846_v27 = vsel %vm1840_vm8, %v1829_v11, %v1638_v54 }
 0x231   :  { %1589 = vrot.lane.b32.xlu0 %v1158_v12, %s3682_s29  ;;  %v5562_v9 = vpop.permute.xlu1 %1449 }
 0x232   :  { %v1797_v35 = vsel %vm1789_vm5, %v1780_v47, %v5562_v9 }
 0x233   :  { %v1512_v19 = vpop.permute.xlu0 %1511  ;;  %1463 = vrot.lane.b32.xlu1 %v1096_v58, %s3680_s27 }
 0x234   :  { %v1813_v22 = vsel %vm1806_vm6, %v1796_v5, %v1512_v19 }
 0x235   :  { %1401 = vrot.lane.b32.xlu0 %v1066_v55, %s3679_s2  ;;  %v1702_v33 = vpop.permute.xlu1 %1701  ;;  %v957_v55 = vld [vmem:[#allocation2 + $0x1b0] ss:$2 sm:$0xff] }
 0x236   :  { %v1863_v36 = vsel %vm1857_vm9, %v1846_v27, %v1702_v33  ;;  %v1747_v15 = vsel %vm99_vm0, %v957_v55, %v5384_v34  ;;  %v959_v33 = vld [vmem:[#allocation2 + $0x1e0] ss:$2 sm:$0xff] }
 0x237   :  { %v5571_v49 = vpop.permute.xlu0 %1261  ;;  %1715 = vrot.lane.b32.xlu1 %v1220_v31, %s3684_s16  ;;  %3558 = vmatmul.mubr.msk.f32.gmra.mxu0 %vm1886_vm10, %v1863_v36  ;;  %v1764_v45 = vsel %vm1755_vm2, %v1747_v15, %v5382_v42 }
 0x238   :  { %v1748_v42 = vsel %vm99_vm0, %v959_v33, %v5571_v49 }
 0x239   :  { %1653 = vrot.lane.b32.xlu0 %v1190_v46, %s3683_s30  ;;  %v1576_v26 = vpop.permute.xlu1 %1575 }
 0x23a   :  { %v1830_v8 = vsel %vm1823_vm7, %v1813_v22, %v1576_v26 }
 0x23b   :  { %v1514_v62 = vpop.permute.xlu0 %1513  ;;  %1527 = vrot.lane.b32.xlu1 %v1128_v38, %s3681_s28 }
 0x23c   :  { %v1814_v0 = vsel %vm1806_vm6, %v1797_v35, %v1514_v62 }
 0x23d   :  { %1465 = vrot.lane.b32.xlu0 %v1098_v16, %s3680_s27  ;;  %v1388_v48 = vpop.permute.xlu1 %1387 }
 0x23e   :  { %v1781_v41 = vsel %vm1772_vm4, %v1764_v45, %v1388_v48 }
 0x23f   :  { %v5579_v13 = vpop.permute.xlu0 %1325  ;;  %1529 = vrot.lane.b32.xlu1 %v1130_v39, %s3681_s28 }
 0x240   :  { %v1765_v62 = vsel %vm1755_vm2, %v1748_v42, %v5579_v13 }
 0x241   :  { %1717 = vrot.lane.b32.xlu0 %v1222_v32, %s3684_s16  ;;  %v1640_v28 = vpop.permute.xlu1 %1639 }
 0x242   :  { %v1847_v44 = vsel %vm1840_vm8, %v1830_v8, %v1640_v28 }
 0x243   :  { %v1578_v18 = vpop.permute.xlu0 %1577  ;;  %1593 = vrot.lane.b32.xlu1 %v1162_v6, %s3682_s29 }
 0x244   :  { %v1831_v52 = vsel %vm1823_vm7, %v1814_v0, %v1578_v18 }
 0x245   :  { %1591 = vrot.lane.b32.xlu0 %v1160_v14, %s3682_s29  ;;  %v1452_v43 = vpop.permute.xlu1 %1451 }
 0x246   :  { %v1798_v46 = vsel %vm1789_vm5, %v1781_v41, %v1452_v43  ;;  %v965_v41 = vld [vmem:[#allocation2 + $0x270] ss:$2 sm:$0xff] }
 0x247   :  { %v1390_v57 = vpop.permute.xlu0 %1389  ;;  %1657 = vrot.lane.b32.xlu1 %v1194_v61, %s3683_s30 }
 0x248   :  { %v1782_v39 = vsel %vm1772_vm4, %v1765_v62, %v1390_v57  ;;  %v961_v57 = vld [vmem:[#allocation2 + $0x210] ss:$2 sm:$0xff] }
 0x249   :  { %1655 = vrot.lane.b32.xlu0 %v1192_v59, %s3683_s30  ;;  %v1704_v20 = vpop.permute.xlu1 %1703 }
 0x24a   :  { %v1864_v24 = vsel %vm1857_vm9, %v1847_v44, %v1704_v20 }
 0x24b   :  { %v1642_v10 = vpop.permute.xlu0 %1641  ;;  %1721 = vrot.lane.b32.xlu1 %v1226_v51, %s3684_s16  ;;  %3560 = vmatprep.mubr.msk.f32.mxu0 %vm1886_vm10, %v1864_v24  ;;  %v963_v24 = vld [vmem:[#allocation2 + $0x240] ss:$2 sm:$0xff] }
 0x24c   :  { %v1848_v12 = vsel %vm1840_vm8, %v1831_v52, %v1642_v10 }
 0x24d   :  { %1719 = vrot.lane.b32.xlu0 %v1224_v29, %s3684_s16  ;;  %v1454_v53 = vpop.permute.xlu1 %1453 }
 0x24e   :  { %v1799_v21 = vsel %vm1789_vm5, %v1782_v39, %v1454_v53 }
 0x24f   :  { %v1264_v7 = vpop.permute.xlu0 %1263 }
 0x250   :  { %v1749_v40 = vsel %vm99_vm0, %v961_v57, %v1264_v7  ;;  %v969_v57 = vld [vmem:[#allocation2 + $0x2d0] ss:$2 sm:$0xff] }
 0x251   :  { %v1706_v60 = vpop.permute.xlu1 %1705 }
 0x252   :  { %v1865_v17 = vsel %vm1857_vm9, %v1848_v12, %v1706_v60 }
 0x253   :  { %v1516_v56 = vpop.permute.xlu0 %1515  ;;  %3561 = vmatmul.mubr.msk.f32.gmra.mxu0 %vm1886_vm10, %v1865_v17 }
 0x254   :  { %v1815_v27 = vsel %vm1806_vm6, %v1798_v46, %v1516_v56 }
 0x255   :  { %v1328_v54 = vpop.permute.xlu1 %1327 }
 0x256   :  { %v1766_v8 = vsel %vm1755_vm2, %v1749_v40, %v1328_v54 }
 0x257   :  { %v1266_v50 = vpop.permute.xlu0 %1265 }
 0x258   :  { %v1750_v7 = vsel %vm99_vm0, %v963_v24, %v1266_v50 }
 0x259   :  { %v1580_v1 = vpop.permute.xlu1 %1579 }
 0x25a   :  { %v1832_v36 = vsel %vm1823_vm7, %v1815_v27, %v1580_v1 }
 0x25b   :  { %v1518_v23 = vpop.permute.xlu0 %1517 }
 0x25c   :  { %v1816_v6 = vsel %vm1806_vm6, %v1799_v21, %v1518_v23 }
 0x25d   :  { %v1392_v63 = vpop.permute.xlu1 %1391 }
 0x25e   :  { %v1783_v51 = vsel %vm1772_vm4, %v1766_v8, %v1392_v63 }
 0x25f   :  { %v1330_v58 = vpop.permute.xlu0 %1329 }
 0x260   :  { %v1767_v0 = vsel %vm1755_vm2, %v1750_v7, %v1330_v58 }
 0x261   :  { %v1644_v9 = vpop.permute.xlu1 %1643 }
 0x262   :  { %v1849_v38 = vsel %vm1840_vm8, %v1832_v36, %v1644_v9 }
 0x263   :  { %v1582_v19 = vpop.permute.xlu0 %1581 }
 0x264   :  { %v1833_v14 = vsel %vm1823_vm7, %v1816_v6, %v1582_v19 }
 0x265   :  { %v1456_v11 = vpop.permute.xlu1 %1455 }
 0x266   :  { %v1800_v20 = vsel %vm1789_vm5, %v1783_v51, %v1456_v11 }
 0x267   :  { %v1394_v31 = vpop.permute.xlu0 %1393 }
 0x268   :  { %v1784_v52 = vsel %vm1772_vm4, %v1767_v0, %v1394_v31 }
 0x269   :  { %v1708_v16 = vpop.permute.xlu1 %1707 }
 0x26a   :  { %v1866_v26 = vsel %vm1857_vm9, %v1849_v38, %v1708_v16 }
 0x26b   :  { %v1646_v34 = vpop.permute.xlu0 %1645  ;;  %3563 = vmatprep.mubr.msk.f32.mxu0 %vm1886_vm10, %v1866_v26  ;;  %v967_v26 = vld [vmem:[#allocation2 + $0x2a0] ss:$2 sm:$0xff] }
 0x26c   :  { %v1850_v28 = vsel %vm1840_vm8, %v1833_v14, %v1646_v34 }
 0x26d   :  { %v1458_v32 = vpop.permute.xlu1 %1457 }
 0x26e   :  { %v1801_v56 = vsel %vm1789_vm5, %v1784_v52, %v1458_v32 }
 0x26f   :  { %v1268_v48 = vpop.permute.xlu0 %1267 }
 0x270   :  { %v1751_v46 = vsel %vm99_vm0, %v965_v41, %v1268_v48 }
 0x271   :  { %v1710_v18 = vpop.permute.xlu1 %1709 }
 0x272   :  { %v1867_v49 = vsel %vm1857_vm9, %v1850_v28, %v1710_v18 }
 0x273   :  { %v1520_v3 = vpop.permute.xlu0 %1519  ;;  %3564 = vmatmul.mubr.msk.f32.gmra.mxu0 %vm1886_vm10, %v1867_v49 }
 0x274   :  { %v1817_v10 = vsel %vm1806_vm6, %v1800_v20, %v1520_v3 }
 0x275   :  { %v1332_v37 = vpop.permute.xlu1 %1331 }
 0x276   :  { %v1768_v27 = vsel %vm1755_vm2, %v1751_v46, %v1332_v37 }
 0x277   :  { %v1270_v13 = vpop.permute.xlu0 %1269 }
 0x278   :  { %v1752_v48 = vsel %vm99_vm0, %v967_v26, %v1270_v13  ;;  %v2467_v26 = vld [vmem:[#allocation3 + $0x92] sm:$0xff] }
 0x279   :  { %v1584_v61 = vpop.permute.xlu1 %1583 }
 0x27a   :  { %v1834_v4 = vsel %vm1823_vm7, %v1817_v10, %v1584_v61 }
 0x27b   :  { %v1522_v59 = vpop.permute.xlu0 %1521 }
 0x27c   :  { %v1818_v17 = vsel %vm1806_vm6, %v1801_v56, %v1522_v59 }
 0x27d   :  { %v1396_v2 = vpop.permute.xlu1 %1395 }
 0x27e   :  { %v1785_v33 = vsel %vm1772_vm4, %v1768_v27, %v1396_v2  ;;  %v2371_v27 = vld [vmem:[#allocation3 + $0xa2] sm:$0xff] }
 0x27f   :  { %v1334_v43 = vpop.permute.xlu0 %1333  ;;  %2572 = vrot.lane.b32.xlu1 %v2371_v27, %s3680_s27 }
 0x280   :  { %v1769_v6 = vsel %vm1755_vm2, %v1752_v48, %v1334_v43  ;;  %v971_v43 = vld [vmem:[#allocation2 + $0x300] ss:$2 sm:$0xff] }
 0x281   :  { %v1648_v5 = vpop.permute.xlu1 %1647 }
 0x282   :  { %v1851_v25 = vsel %vm1840_vm8, %v1834_v4, %v1648_v5 }
 0x283   :  { %v1586_v22 = vpop.permute.xlu0 %1585  ;;  %2954 = vrot.lane.b32.xlu1 %v2467_v26, %s3686_s21 }
 0x284   :  { %v1835_v54 = vsel %vm1823_vm7, %v1818_v17, %v1586_v22 }
 0x285   :  { %v1460_v29 = vpop.permute.xlu1 %1459 }
 0x286   :  { %v1802_v16 = vsel %vm1789_vm5, %v1785_v33, %v1460_v29 }
 0x287   :  { %v1398_v44 = vpop.permute.xlu0 %1397 }
 0x288   :  { %v1786_v14 = vsel %vm1772_vm4, %v1769_v6, %v1398_v44  ;;  %v2451_v6 = vld [vmem:[#allocation3 + $0x91] sm:$0xff] }
 0x289   :  { %v1712_v47 = vpop.permute.xlu1 %1711 }
 0x28a   :  { %v1868_v35 = vsel %vm1857_vm9, %v1851_v25, %v1712_v47 }
 0x28b   :  { %v1650_v53 = vpop.permute.xlu0 %1649  ;;  %3566 = vmatprep.mubr.msk.f32.mxu0 %vm1886_vm10, %v1868_v35 }
 0x28c   :  { %v1852_v1 = vsel %vm1840_vm8, %v1835_v54, %v1650_v53 }
 0x28d   :  { %v1462_v12 = vpop.permute.xlu1 %1461 }
 0x28e   :  { %v1803_v3 = vsel %vm1789_vm5, %v1786_v14, %v1462_v12 }
 0x28f   :  { %v1272_v60 = vpop.permute.xlu0 %1271 }
 0x290   :  { %v1753_v40 = vsel %vm99_vm0, %v969_v57, %v1272_v60 }
 0x291   :  { %v1714_v23 = vpop.permute.xlu1 %1713 }
 0x292   :  { %v1869_v50 = vsel %vm1857_vm9, %v1852_v1, %v1714_v23 }
 0x293   :  { %v1524_v63 = vpop.permute.xlu0 %1523  ;;  %3567 = vmatmul.mubr.msk.f32.gmra.mxu0 %vm1886_vm10, %v1869_v50 }
 0x294   :  { %v1819_v34 = vsel %vm1806_vm6, %v1802_v16, %v1524_v63  ;;  %v5694_v63 = vld [vmem:[%s6371_s4] ss:$0 sm:$0xff]  ;;  %v2435_v16 = vld [vmem:[#allocation3 + $0x90] sm:$0xff]  ;;  %s3685_s4 = smov 48  }
 0x295   :  { %v1336_v55 = vpop.permute.xlu1 %1335 }
 0x296   :  { %v1770_v51 = vsel %vm1755_vm2, %v1753_v40, %v1336_v55 }
 0x297   :  { %v1274_v58 = vpop.permute.xlu0 %1273 }
 0x298   :  { %v1754_v8 = vsel %vm99_vm0, %v971_v43, %v1274_v58  ;;  %vm3136_vm0 = vcmask 588800  }
 0x299   :  { %v1588_v15 = vpop.permute.xlu1 %1587 }
 0x29a   :  { %v1836_v42 = vsel %vm1823_vm7, %v1819_v34, %v1588_v15 }
 0x29b   :  { %v1526_v9 = vpop.permute.xlu0 %1525 }
 0x29c   :  { %v1820_v49 = vsel %vm1806_vm6, %v1803_v3, %v1526_v9 }
 0x29d   :  { %v1400_v19 = vpop.permute.xlu1 %1399 }
 0x29e   :  { %v1787_v44 = vsel %vm1772_vm4, %v1770_v51, %v1400_v19 }
 0x29f   :  { %v1338_v45 = vpop.permute.xlu0 %1337 }
 0x2a0   :  { %v1771_v29 = vsel %vm1755_vm2, %v1754_v8, %v1338_v45 }
 0x2a1   :  { %v1652_v11 = vpop.permute.xlu1 %1651 }
 0x2a2   :  { %v1853_v62 = vsel %vm1840_vm8, %v1836_v42, %v1652_v11  ;;  %v2355_v11 = vld [vmem:[#allocation3 + $0xa1] sm:$0xff] }
 0x2a3   :  { %v1590_v31 = vpop.permute.xlu0 %1589  ;;  %2508 = vrot.lane.b32.xlu0 %v2355_v11, %s3677_s23 }
 0x2a4   :  { %v1837_v37 = vsel %vm1823_vm7, %v1820_v49, %v1590_v31  ;;  %v2443_v49 = vld [vmem:[#allocation3 + $0x130] sm:$0xff] }
 0x2a5   :  { %v1464_v36 = vpop.permute.xlu1 %1463 }
 0x2a6   :  { %v1804_v4 = vsel %vm1789_vm5, %v1787_v44, %v1464_v36 }
 0x2a7   :  { %v1402_v38 = vpop.permute.xlu0 %1401  ;;  %2826 = vrot.lane.b32.xlu0 %v2435_v16, %s3685_s4 }
 0x2a8   :  { %v1788_v20 = vsel %vm1772_vm4, %v1771_v29, %v1402_v38 }
 0x2a9   :  { %v1716_v39 = vpop.permute.xlu1 %1715 }
 0x2aa   :  { %v1870_v21 = vsel %vm1857_vm9, %v1853_v62, %v1716_v39 }
 0x2ab   :  { %v1654_v32 = vpop.permute.xlu0 %1653  ;;  %3569 = vmatprep.mubr.msk.f32.mxu0 %vm1886_vm10, %v1870_v21  ;;  %2890 = vrot.lane.b32.xlu0 %v2451_v6, %s3687_s22 }
 0x2ac   :  { %v1854_v61 = vsel %vm1840_vm8, %v1837_v37, %v1654_v32 }
 0x2ad   :  { %v1528_v28 = vpop.permute.xlu1 %1527 }
 0x2ae   :  { %v1821_v47 = vsel %vm1806_vm6, %v1804_v4, %v1528_v28  ;;  %v2363_v28 = vld [vmem:[#allocation3 + $0x2] sm:$0xff] }
 0x2af   :  { %v1466_v18 = vpop.permute.xlu0 %1465  ;;  %2556 = vrot.lane.b32.xlu1 %v2363_v28, %s3680_s27 }
 0x2b0   :  { %v1805_v25 = vsel %vm1789_vm5, %v1788_v20, %v1466_v18  ;;  %v2347_v18 = vld [vmem:[#allocation3 + $0x1] sm:$0xff] }
 0x2b1   :  { %v1530_v59 = vpop.permute.xlu1 %1529  ;;  %2492 = vrot.lane.b32.xlu0 %v2347_v18, %s3677_s23 }
 0x2b2   :  { %v1822_v53 = vsel %vm1806_vm6, %v1805_v25, %v1530_v59 }
 0x2b3   :  { %v1718_v2 = vpop.permute.xlu0 %1717  ;;  %2842 = vrot.lane.b32.xlu1 %v2443_v49, %s3685_s4 }
 0x2b4   :  { %v1871_v13 = vsel %vm1857_vm9, %v1854_v61, %v1718_v2 }
 0x2b5   :  { %3570 = vmatmul.mubr.msk.f32.gmra.mxu0 %vm1886_vm10, %v1871_v13  ;;  %v1594_v5 = vpop.permute.xlu1 %1593 }
 0x2b6   :  { %v1839_v35 = vsel %vm1823_vm7, %v1822_v53, %v1594_v5  ;;  %v2459_v5 = vld [vmem:[#allocation3 + $0x131] sm:$0xff] }
 0x2b7   :  { %v1592_v22 = vpop.permute.xlu0 %1591  ;;  %v3553_v54 = vpop.f32.mrf.mxu0  ;;  %2906 = vrot.lane.b32.xlu1 %v2459_v5, %s3687_s22 }
 0x2b8   :  { %v1838_v7 = vsel %vm1823_vm7, %v1821_v47, %v1592_v22  ;;  %v5740_v15 = vadd.f32 %v3553_v54, %v5694_v63 }
 0x2b9   :  { %v1658_v10 = vpop.permute.xlu1 %1657  ;;  %v2005_v1 = vpop.f32.mrf.mxu0 }
 0x2ba   :  { %v1856_v0 = vsel %vm1840_vm8, %v1839_v35, %v1658_v10  ;;  %v5737_v55 = vadd.f32 %v5694_v63, %v2005_v1  ;;  %v2087_v41 = vsel %vm1755_vm2, %v5740_v15, 0.0 }
 0x2bb   :  { %v1656_v24 = vpop.permute.xlu0 %1655 }
 0x2bc   :  { %v1855_v52 = vsel %vm1840_vm8, %v1838_v7, %v1656_v24  ;;  %v2086_v19 = vsel %vm1755_vm2, %v5737_v55, 0.0 }
 0x2bd   :  { %v1722_v12 = vpop.permute.xlu1 %1721  ;;  %v2088_v31 = vadd.f32 %v2087_v41, %v2086_v19 }
 0x2be   :  { %v1873_v56 = vsel %vm1857_vm9, %v1856_v0, %v1722_v12 }
 0x2bf   :  { %v1720_v60 = vpop.permute.xlu0 %1719 }
 0x2c0   :  { %v1872_v17 = vsel %vm1857_vm9, %v1855_v52, %v1720_v60 }
 0x2c1   :  { %3572 = vmatprep.mubr.msk.f32.mxu0 %vm1886_vm10, %v1872_v17 }
 0x2c2   :  { %3573 = vmatmul.mubr.msk.f32.gmra.mxu0 %vm1886_vm10, %v1873_v56 }
 0x2d7   :  { %v3556_v23 = vpop.f32.mrf.mxu0 }
 0x2d8   :  { %v5753_v33 = vadd.f32 %v3556_v23, %v5694_v63 }
 0x2d9   :  { %v2015_v50 = vpop.f32.mrf.mxu0 }
 0x2da   :  { %v5743_v9 = vadd.f32 %v5694_v63, %v2015_v50  ;;  %v2091_v42 = vsel %vm1755_vm2, %v5753_v33, 0.0 }
 0x2dc   :  { %v2089_v30 = vsel %vm1755_vm2, %v5743_v9, 0.0 }
 0x2dd   :  { %v2090_v38 = vadd.f32 %v2089_v30, %v2088_v31 }
 0x2df   :  { %v2092_v39 = vadd.f32 %v2091_v42, %v2090_v38 }
 0x2f7   :  { %v3559_v58 = vpop.f32.mrf.mxu0 }
 0x2f8   :  { %v5766_v21 = vadd.f32 %v3559_v58, %v5694_v63 }
 0x2f9   :  { %v2025_v45 = vpop.f32.mrf.mxu0 }
 0x2fa   :  { %v5756_v36 = vadd.f32 %v5694_v63, %v2025_v45  ;;  %v2095_v37 = vsel %vm1755_vm2, %v5766_v21, 0.0 }
 0x2fc   :  { %v2093_v62 = vsel %vm1755_vm2, %v5756_v36, 0.0 }
 0x2fd   :  { %v2094_v14 = vadd.f32 %v2093_v62, %v2092_v39 }
 0x2ff   :  { %v2096_v59 = vadd.f32 %v2095_v37, %v2094_v14 }
 0x313   :  { %v3562_v46 = vpop.f32.mrf.mxu0 }
 0x314   :  { %v2041_v13 = vadd.f32 %v3562_v46, %v5694_v63 }
 0x315   :  { %v2035_v34 = vpop.f32.mrf.mxu0 }
 0x316   :  { %v5769_v48 = vadd.f32 %v5694_v63, %v2035_v34  ;;  %v2099_v40 = vsel %vm1755_vm2, %v2041_v13, 0.0 }
 0x318   :  { %v2097_v61 = vsel %vm1755_vm2, %v5769_v48, 0.0 }
 0x319   :  { %v2098_v43 = vadd.f32 %v2097_v61, %v2096_v59 }
 0x31b   :  { %v2100_v51 = vadd.f32 %v2099_v40, %v2098_v43 }
 0x333   :  { %v3565_v32 = vpop.f32.mrf.mxu0 }
 0x334   :  { %v2051_v29 = vadd.f32 %v3565_v32, %v5694_v63 }
 0x335   :  { %v2045_v3 = vpop.f32.mrf.mxu0 }
 0x336   :  { %v5780_v57 = vadd.f32 %v5694_v63, %v2045_v3  ;;  %v2103_v4 = vsel %vm1755_vm2, %v2051_v29, 0.0 }
 0x338   :  { %v2101_v8 = vsel %vm1755_vm2, %v5780_v57, 0.0 }
 0x339   :  { %v2102_v10 = vadd.f32 %v2101_v8, %v2100_v51 }
 0x33b   :  { %v2104_v47 = vadd.f32 %v2103_v4, %v2102_v10 }
 0x353   :  { %v3568_v2 = vpop.f32.mrf.mxu0 }
 0x354   :  { %v2061_v53 = vadd.f32 %v3568_v2, %v5694_v63 }
 0x355   :  { %v2055_v22 = vpop.f32.mrf.mxu0 }
 0x356   :  { %v2056_v44 = vadd.f32 %v5694_v63, %v2055_v22  ;;  %v2107_v0 = vsel %vm1755_vm2, %v2061_v53, 0.0 }
 0x358   :  { %v2105_v25 = vsel %vm1755_vm2, %v2056_v44, 0.0 }
 0x359   :  { %v2106_v7 = vadd.f32 %v2105_v25, %v2104_v47 }
 0x35b   :  { %v2108_v12 = vadd.f32 %v2107_v0, %v2106_v7 }
 0x375   :  { %v3571_v20 = vpop.f32.mrf.mxu0 }
 0x376   :  { %v2071_v60 = vadd.f32 %v3571_v20, %v5694_v63 }
 0x377   :  { %v2065_v24 = vpop.f32.mrf.mxu0 }
 0x378   :  { %v2066_v35 = vadd.f32 %v5694_v63, %v2065_v24  ;;  %v2111_v1 = vsel %vm1755_vm2, %v2071_v60, 0.0 }
 0x37a   :  { %v2109_v52 = vsel %vm1755_vm2, %v2066_v35, 0.0 }
 0x37b   :  { %v2110_v56 = vadd.f32 %v2109_v52, %v2108_v12 }
 0x37d   :  { %v2112_v58 = vadd.f32 %v2111_v1, %v2110_v56 }
 0x382   :  { %v3574_v17 = vpop.f32.mrf.mxu0 }
 0x383   :  { %v5798_v23 = vadd.f32 %v3574_v17, %v5694_v63 }
 0x384   :  { %v2075_v54 = vpop.f32.mrf.mxu0 }
 0x385   :  { %v2076_v50 = vadd.f32 %v5694_v63, %v2075_v54  ;;  %v2115_v41 = vsel %vm1755_vm2, %v5798_v23, 0.0 }
 0x387   :  { %v2113_v19 = vsel %vm1755_vm2, %v2076_v50, 0.0 }
 0x388   :  { %v2114_v45 = vadd.f32 %v2113_v19, %v2112_v58 }
 0x38a   :  { %v2116_v30 = vadd.f32 %v2115_v41, %v2114_v45 }
 0x38c   :  { %v2117_v11 = vrot.slane %v2116_v30, 4 }
 0x38e   :  { %v2118_v31 = vadd.f32 %v2117_v11, %v2116_v30 }
 0x390   :  { %v2119_v46 = vrot.slane %v2118_v31, 2 }
 0x392   :  { %v2120_v27 = vadd.f32 %v2119_v46, %v2118_v31 }
 0x394   :  { %v2121_v38 = vrot.slane %v2120_v27, 1 }
 0x396   :  { %v2122_v16 = vadd.f32 %v2121_v38, %v2120_v27 }
 0x398   :  { %v2124_v34 = vmul.f32 0.0078125, %v2122_v16 }
 0x39a   :  { %v5805_v26 = vsub.f32 %v5737_v55, %v2124_v34  ;;  %v5808_v63 = vsub.f32 %v5740_v15, %v2124_v34  ;;  %v5811_v42 = vsub.f32 %v5743_v9, %v2124_v34  ;;  %v5814_v62 = vsub.f32 %v5753_v33, %v2124_v34 }
 0x39b   :  { %v5821_v6 = vsub.f32 %v5756_v36, %v2124_v34  ;;  %v5826_v15 = vsub.f32 %v5766_v21, %v2124_v34  ;;  %v5833_v18 = vsub.f32 %v5769_v48, %v2124_v34  ;;  %v5838_v37 = vsub.f32 %v2041_v13, %v2124_v34 }
 0x39c   :  { %v2141_v39 = vmul.f32 %v5805_v26, %v5805_v26  ;;  %v2142_v32 = vmul.f32 %v5808_v63, %v5808_v63  ;;  %v2143_v55 = vmul.f32 %v5811_v42, %v5811_v42  ;;  %v2144_v9 = vmul.f32 %v5814_v62, %v5814_v62 }
 0x39d   :  { %v2145_v36 = vmul.f32 %v5821_v6, %v5821_v6  ;;  %v2146_v21 = vmul.f32 %v5826_v15, %v5826_v15  ;;  %v2133_v2 = vsub.f32 %v5780_v57, %v2124_v34  ;;  %v2147_v48 = vmul.f32 %v5833_v18, %v5833_v18 }
 0x39e   :  { %v2157_v33 = vsel %vm1755_vm2, %v2141_v39, 0.0  ;;  %v2158_v14 = vsel %vm1755_vm2, %v2142_v32, 0.0  ;;  %v2160_v3 = vsel %vm1755_vm2, %v2143_v55, 0.0  ;;  %v2162_v61 = vsel %vm1755_vm2, %v2144_v9, 0.0 }
 0x39f   :  { %v2159_v28 = vadd.f32 %v2158_v14, %v2157_v33  ;;  %v2164_v43 = vsel %vm1755_vm2, %v2145_v36, 0.0  ;;  %v2134_v22 = vsub.f32 %v2051_v29, %v2124_v34  ;;  %v2148_v40 = vmul.f32 %v5838_v37, %v5838_v37  ;;  %v3476_v36 = vld [vmem:[%s6372_s5] ss:$0 sm:$0xff] }
 0x3a0   :  { %v2166_v13 = vsel %vm1755_vm2, %v2146_v21, 0.0  ;;  %v2135_v51 = vsub.f32 %v2056_v44, %v2124_v34  ;;  %v2149_v20 = vmul.f32 %v2133_v2, %v2133_v2  ;;  %v2168_v10 = vsel %vm1755_vm2, %v2147_v48, 0.0 }
 0x3a1   :  { %v2161_v49 = vadd.f32 %v2160_v3, %v2159_v28  ;;  %v2136_v4 = vsub.f32 %v2061_v53, %v2124_v34  ;;  %v2150_v57 = vmul.f32 %v2134_v22, %v2134_v22  ;;  %v2170_v25 = vsel %vm1755_vm2, %v2148_v40, 0.0 }
 0x3a2   :  { %v2137_v7 = vsub.f32 %v2066_v35, %v2124_v34  ;;  %v2151_v0 = vmul.f32 %v2135_v51, %v2135_v51  ;;  %v2172_v29 = vsel %vm1755_vm2, %v2149_v20, 0.0  ;;  %v2138_v12 = vsub.f32 %v2071_v60, %v2124_v34 }
 0x3a3   :  { %v2163_v59 = vadd.f32 %v2162_v61, %v2161_v49  ;;  %v2152_v56 = vmul.f32 %v2136_v4, %v2136_v4  ;;  %v2174_v17 = vsel %vm1755_vm2, %v2150_v57, 0.0  ;;  %v2139_v44 = vsub.f32 %v2076_v50, %v2124_v34 }
 0x3a4   :  { %v2153_v1 = vmul.f32 %v2137_v7, %v2137_v7  ;;  %v2176_v58 = vsel %vm1755_vm2, %v2151_v0, 0.0  ;;  %v2140_v53 = vsub.f32 %v5798_v23, %v2124_v34  ;;  %v2154_v45 = vmul.f32 %v2138_v12, %v2138_v12 }
 0x3a5   :  { %v2165_v5 = vadd.f32 %v2164_v43, %v2163_v59  ;;  %v2178_v41 = vsel %vm1755_vm2, %v2152_v56, 0.0  ;;  %v2155_v30 = vmul.f32 %v2139_v44, %v2139_v44  ;;  %v2201_v3 = vmul.f32 %v3476_v36, %v5805_v26 }
 0x3a6   :  { %v2180_v11 = vsel %vm1755_vm2, %v2153_v1, 0.0  ;;  %v2156_v60 = vmul.f32 %v2140_v53, %v2140_v53  ;;  %v2182_v46 = vsel %vm1755_vm2, %v2154_v45, 0.0  ;;  %v2202_v49 = vmul.f32 %v3476_v36, %v5808_v63 }
 0x3a7   :  { %v2167_v8 = vadd.f32 %v2166_v13, %v2165_v5  ;;  %v2184_v50 = vsel %vm1755_vm2, %v2155_v30, 0.0  ;;  %v2203_v21 = vmul.f32 %v3476_v36, %v5811_v42  ;;  %v2204_v61 = vmul.f32 %v3476_v36, %v5814_v62 }
 0x3a8   :  { %v2186_v16 = vsel %vm1755_vm2, %v2156_v60, 0.0  ;;  %v2205_v59 = vmul.f32 %v3476_v36, %v5821_v6  ;;  %v2206_v48 = vmul.f32 %v3476_v36, %v5826_v15  ;;  %v2207_v43 = vmul.f32 %v3476_v36, %v5833_v18  ;;  %v3477_v6 = vld [vmem:[%s6373_s6] ss:$0 sm:$0xff]  ;;  %s3688_s6 = smov 40  }
 0x3a9   :  { %v2169_v24 = vadd.f32 %v2168_v10, %v2167_v8  ;;  %v2208_v5 = vmul.f32 %v3476_v36, %v5838_v37  ;;  %v2209_v40 = vmul.f32 %v3476_v36, %v2133_v2  ;;  %v2210_v13 = vmul.f32 %v3476_v36, %v2134_v22 }
 0x3aa   :  { %v2211_v8 = vmul.f32 %v3476_v36, %v2135_v51  ;;  %v2212_v20 = vmul.f32 %v3476_v36, %v2136_v4  ;;  %v2213_v26 = vmul.f32 %v3476_v36, %v2137_v7  ;;  %v2215_v63 = vmul.f32 %v3476_v36, %v2139_v44 }
 0x3ab   :  { %v2171_v47 = vadd.f32 %v2170_v25, %v2169_v24  ;;  %v2214_v24 = vmul.f32 %v3476_v36, %v2138_v12  ;;  %v2216_v57 = vmul.f32 %v3476_v36, %v2140_v53 }
 0x3ad   :  { %v2173_v52 = vadd.f32 %v2172_v29, %v2171_v47 }
 0x3af   :  { %v2175_v54 = vadd.f32 %v2174_v17, %v2173_v52 }
 0x3b1   :  { %v2177_v19 = vadd.f32 %v2176_v58, %v2175_v54 }
 0x3b3   :  { %v2179_v35 = vadd.f32 %v2178_v41, %v2177_v19 }
 0x3b5   :  { %v2181_v31 = vadd.f32 %v2180_v11, %v2179_v35 }
 0x3b7   :  { %v2183_v27 = vadd.f32 %v2182_v46, %v2181_v31 }
 0x3b9   :  { %v2185_v38 = vadd.f32 %v2184_v50, %v2183_v27 }
 0x3bb   :  { %v2187_v39 = vadd.f32 %v2186_v16, %v2185_v38 }
 0x3bd   :  { %v2188_v32 = vrot.slane %v2187_v39, 4 }
 0x3bf   :  { %v2189_v23 = vadd.f32 %v2188_v32, %v2187_v39 }
 0x3c1   :  { %v2190_v34 = vrot.slane %v2189_v23, 2 }
 0x3c3   :  { %v2191_v55 = vadd.f32 %v2190_v34, %v2189_v23 }
 0x3c5   :  { %v2192_v9 = vrot.slane %v2191_v55, 1 }
 0x3c7   :  { %v2193_v33 = vadd.f32 %v2192_v9, %v2191_v55 }
 0x3c9   :  { %v2194_v14 = vmul.f32 0.0078125, %v2193_v33 }
 0x3cb   :  { %v2217_v28 = vadd.f32 1e-05, %v2194_v14 }
 0x3cd   :  { %3652 = vrsqrt.f32 %v2217_v28 }
 0x3da   :  { %v3653_v10 = vpop.eup %3652 }
 0x3db   :  { %v2219_v42 = vmul.f32 %v3653_v10, %v2201_v3  ;;  %v2220_v25 = vmul.f32 %v3653_v10, %v2202_v49  ;;  %v2221_v62 = vmul.f32 %v3653_v10, %v2203_v21  ;;  %v2222_v47 = vmul.f32 %v3653_v10, %v2204_v61 }
 0x3dc   :  { %v2223_v15 = vmul.f32 %v3653_v10, %v2205_v59  ;;  %v2224_v18 = vmul.f32 %v3653_v10, %v2206_v48  ;;  %v2225_v37 = vmul.f32 %v3653_v10, %v2207_v43  ;;  %v2226_v2 = vmul.f32 %v3653_v10, %v2208_v5 }
 0x3dd   :  { %v2227_v22 = vmul.f32 %v3653_v10, %v2209_v40  ;;  %v2228_v51 = vmul.f32 %v3653_v10, %v2210_v13  ;;  %v2229_v4 = vmul.f32 %v3653_v10, %v2211_v8  ;;  %v2230_v0 = vmul.f32 %v3653_v10, %v2212_v20  ;;  %v3128_v8 = vld [vmem:[%s6374_s7 + $0x40] sm:$0xff] }
 0x3de   :  { %v2231_v7 = vmul.f32 %v3653_v10, %v2213_v26  ;;  %v2232_v29 = vmul.f32 %v3653_v10, %v2214_v24  ;;  %v2233_v52 = vmul.f32 %v3653_v10, %v2215_v63  ;;  %v2234_v12 = vmul.f32 %v3653_v10, %v2216_v57  ;;  %3617 = vmatprep.subr.mxu1 %v3128_v8  ;;  %v3127_v10 = vld [vmem:[%s6374_s7 + $0x38] sm:$0xff]  ;;  %v3126_v26 = vld [vmem:[%s6374_s7 + $0x30] sm:$0xff]  ;;  %v3125_v63 = vld [vmem:[%s6374_s7 + $0x28] sm:$0xff] }
 0x3df   :  { %v2243_v56 = vadd.f32 %v3477_v6, %v2221_v62  ;;  %v2244_v17 = vadd.f32 %v3477_v6, %v2222_v47  ;;  %v2245_v54 = vadd.f32 %v3477_v6, %v2223_v15  ;;  %v2246_v44 = vadd.f32 %v3477_v6, %v2224_v18  ;;  %3575 = vmatprep.subr.mxu0 %v3128_v8  ;;  %v3124_v57 = vld [vmem:[%s6374_s7 + $0x20] sm:$0xff]  ;;  %v3122_v62 = vld [vmem:[%s6374_s7 + $0x10] sm:$0xff]  ;;  %v3121_v47 = vld [vmem:[%s6374_s7 + $0x8] sm:$0xff] }
 0x3e0   :  { %v2247_v1 = vadd.f32 %v3477_v6, %v2225_v37  ;;  %v2248_v58 = vadd.f32 %v3477_v6, %v2226_v2  ;;  %v2249_v19 = vadd.f32 %v3477_v6, %v2227_v22  ;;  %v2250_v53 = vadd.f32 %v3477_v6, %v2228_v51  ;;  %3626 = vmatpush3.msra.mxu1 %v3128_v8 }
 0x3e1   :  { %v2251_v45 = vadd.f32 %v3477_v6, %v2229_v4  ;;  %v2252_v41 = vadd.f32 %v3477_v6, %v2230_v0  ;;  %v2253_v35 = vadd.f32 %v3477_v6, %v2231_v7  ;;  %v2254_v30 = vadd.f32 %v3477_v6, %v2232_v29  ;;  %3576 = vmatpush3.msra.mxu0 %v3128_v8  ;;  %v5993_v7 = vpop.permute.xlu1 %2572 }
 0x3e2   :  { %v2255_v11 = vadd.f32 %v3477_v6, %v2233_v52  ;;  %v2256_v31 = vadd.f32 %v3477_v6, %v2234_v12  ;;  %v2259_v60 = vmax.f32 %v2243_v56, 0.0  ;;  %v2260_v46 = vmax.f32 %v2244_v17, 0.0  ;;  %3618 = vmatprep.subr.mxu1 %v3127_v10  ;;  %3577 = vmatprep.subr.mxu0 %v3127_v10 }
 0x3e3   :  { %v2261_v27 = vmax.f32 %v2245_v54, 0.0  ;;  %v2262_v50 = vmax.f32 %v2246_v44, 0.0  ;;  %v2263_v38 = vmax.f32 %v2247_v1, 0.0  ;;  %v2264_v16 = vmax.f32 %v2248_v58, 0.0  ;;  %3627 = vmatpush3.msra.mxu1 %v3127_v10  ;;  %3578 = vmatpush3.msra.mxu0 %v3127_v10  ;;  %v6012_v1 = vpop.permute.xlu0 %2508 }
 0x3e4   :  { %v2265_v39 = vmax.f32 %v2249_v19, 0.0  ;;  %v2266_v32 = vmax.f32 %v2250_v53, 0.0  ;;  %v2267_v23 = vmax.f32 %v2251_v45, 0.0  ;;  %v2268_v34 = vmax.f32 %v2252_v41, 0.0  ;;  %2317 = vst.msk [vmem:[#allocation3 + $0x31] sm:$0xff] %vm1755_vm2, %v2259_v60  ;;  %2318 = vst.msk [vmem:[#allocation3 + $0x41] sm:$0xff] %vm1755_vm2, %v2260_v46  ;;  %3619 = vmatprep.subr.mxu1 %v3126_v26  ;;  %3579 = vmatprep.subr.mxu0 %v3126_v26 }
 0x3e5   :  { %v2269_v55 = vmax.f32 %v2253_v35, 0.0  ;;  %v2270_v9 = vmax.f32 %v2254_v30, 0.0  ;;  %v2271_v33 = vmax.f32 %v2255_v11, 0.0  ;;  %v2272_v14 = vmax.f32 %v2256_v31, 0.0  ;;  %2319 = vst.msk [vmem:[#allocation3 + $0x51] sm:$0xff] %vm1755_vm2, %v2261_v27  ;;  %2320 = vst.msk [vmem:[#allocation3 + $0x61] sm:$0xff] %vm1755_vm2, %v2262_v50  ;;  %3628 = vmatpush3.msra.mxu1 %v3126_v26  ;;  %3580 = vmatpush3.msra.mxu0 %v3126_v26  ;;  %v6001_v56 = vpop.permute.xlu1 %2954 }
 0x3e6   :  { %2321 = vst.msk [vmem:[#allocation3 + $0x71] sm:$0xff] %vm1755_vm2, %v2263_v38  ;;  %2322 = vst.msk [vmem:[#allocation3 + $0x81] sm:$0xff] %vm1755_vm2, %v2264_v16  ;;  %v2242_v28 = vadd.f32 %v3477_v6, %v2220_v25  ;;  %v2241_v36 = vadd.f32 %v3477_v6, %v2219_v42  ;;  %3620 = vmatprep.subr.mxu1 %v3125_v63  ;;  %v3123_v25 = vld [vmem:[%s6374_s7 + $0x18] sm:$0xff]  ;;  %3581 = vmatprep.subr.mxu0 %v3125_v63  ;;  %v3120_v6 = vld [vmem:[%s6374_s7] sm:$0xff] }
 0x3e7   :  { %2325 = vst.msk [vmem:[#allocation3 + $0xd1] sm:$0xff] %vm1755_vm2, %v2267_v23  ;;  %2326 = vst.msk [vmem:[#allocation3 + $0xe1] sm:$0xff] %vm1755_vm2, %v2268_v34  ;;  %3629 = vmatpush3.msra.mxu1 %v3125_v63  ;;  %3582 = vmatpush3.msra.mxu0 %v3125_v63  ;;  %v6018_v53 = vpop.permute.xlu0 %2826 }
 0x3e8   :  { %2323 = vst.msk [vmem:[#allocation3 + $0xb1] sm:$0xff] %vm1755_vm2, %v2265_v39  ;;  %2324 = vst.msk [vmem:[#allocation3 + $0xc1] sm:$0xff] %vm1755_vm2, %v2266_v32  ;;  %v2258_v3 = vmax.f32 %v2242_v28, 0.0  ;;  %v2257_v49 = vmax.f32 %v2241_v36, 0.0  ;;  %3621 = vmatprep.subr.mxu1 %v3124_v57  ;;  %3583 = vmatprep.subr.mxu0 %v3124_v57 }
 0x3e9   :  { %2327 = vst.msk [vmem:[#allocation3 + $0xf1] sm:$0xff] %vm1755_vm2, %v2269_v55  ;;  %2328 = vst.msk [vmem:[#allocation3 + $0x101] sm:$0xff] %vm1755_vm2, %v2270_v9  ;;  %3630 = vmatpush3.msra.mxu1 %v3124_v57  ;;  %3584 = vmatpush3.msra.mxu0 %v3124_v57  ;;  %v6006_v54 = vpop.permute.xlu1 %2556 }
 0x3ea   :  { %2329 = vst.msk [vmem:[#allocation3 + $0x111] sm:$0xff] %vm1755_vm2, %v2271_v33  ;;  %2330 = vst.msk [vmem:[#allocation3 + $0x121] sm:$0xff] %vm1755_vm2, %v2272_v14  ;;  %3622 = vmatprep.subr.mxu1 %v3123_v25  ;;  %3585 = vmatprep.subr.mxu0 %v3123_v25 }
 0x3eb   :  { %2316 = vst.msk [vmem:[#allocation3 + $0x21] sm:$0xff] %vm1755_vm2, %v2258_v3  ;;  %2315 = vst.msk [vmem:[#allocation3 + $0x11] sm:$0xff] %vm1755_vm2, %v2257_v49  ;;  %v5891_v21 = vld [vmem:[#allocation3 + $0x31] sm:$0xff]  ;;  %v5903_v48 = vld [vmem:[#allocation3 + $0x40] sm:$0xff]  ;;  %3631 = vmatpush3.msra.mxu1 %v3123_v25  ;;  %3586 = vmatpush3.msra.mxu0 %v3123_v25  ;;  %v6025_v30 = vpop.permute.xlu0 %2890 }
 0x3ec   :  { %2498 = vrot.lane.b32.xlu1 %v5891_v21, %s3677_s23  ;;  %v5895_v61 = vld [vmem:[#allocation3 + $0x32] sm:$0xff]  ;;  %v2351_v5 = vld [vmem:[#allocation3 + $0x41] sm:$0xff]  ;;  %3623 = vmatprep.subr.mxu1 %v3122_v62 }
 0x3ed   :  { %v5912_v40 = vld [vmem:[#allocation3 + $0x30] sm:$0xff]  ;;  %v2367_v13 = vld [vmem:[#allocation3 + $0x42] sm:$0xff]  ;;  %3632 = vmatpush3.msra.mxu1 %v3122_v62  ;;  %3587 = vmatprep.subr.mxu0 %v3122_v62  ;;  %v6016_v19 = vpop.permute.xlu1 %2842 }
 0x3ee   :  { %v2352_v20 = vld [vmem:[#allocation3 + $0x51] sm:$0xff]  ;;  %3624 = vmatprep.subr.mxu1 %v3121_v47  ;;  %v5963_v15 = vld [vmem:[#allocation3 + $0x60] sm:$0xff]  ;;  %3588 = vmatpush3.msra.mxu0 %v3122_v62 }
 0x3ef   :  { %v5934_v24 = vld [vmem:[#allocation3 + $0x50] sm:$0xff]  ;;  %3633 = vmatpush3.msra.mxu1 %v3121_v47  ;;  %v2400_v18 = vld [vmem:[#allocation3 + $0x61] sm:$0xff]  ;;  %3589 = vmatprep.subr.mxu0 %v3121_v47  ;;  %v6035_v60 = vpop.permute.xlu0 %2492 }
 0x3f0   :  { %2562 = vrot.lane.b32.xlu1 %v5895_v61, %s3680_s27  ;;  %v2368_v42 = vld [vmem:[#allocation3 + $0x52] sm:$0xff]  ;;  %3625 = vmatprep.subr.mxu1 %v3120_v6  ;;  %v2369_v37 = vld [vmem:[#allocation3 + $0x62] sm:$0xff] }
 0x3f1   :  { %3634 = vmatpush3.msra.mxu1 %v3120_v6  ;;  %3590 = vmatpush3.msra.mxu0 %v3121_v47  ;;  %v2354_v2 = vld [vmem:[#allocation3 + $0x71] sm:$0xff]  ;;  %v2386_v4 = vld [vmem:[#allocation3 + $0x80] sm:$0xff]  ;;  %v6023_v41 = vpop.permute.xlu1 %2906 }
 0x3f2   :  { %v5899_v59 = vld [vmem:[#allocation3 + $0x21] sm:$0xff]  ;;  %3591 = vmatprep.subr.mxu0 %v3120_v6  ;;  %v5976_v22 = vld [vmem:[#allocation3 + $0x70] sm:$0xff] }
 0x3f3   :  { %2496 = vrot.lane.b32.xlu0 %v5899_v59, %s3677_s23  ;;  %v5907_v43 = vld [vmem:[#allocation3 + $0x22] sm:$0xff]  ;;  %3592 = vmatpush3.msra.mxu0 %v3120_v6  ;;  %v2370_v51 = vld [vmem:[#allocation3 + $0x72] sm:$0xff] }
 0x3f4   :  { %2626 = vrot.lane.b32.xlu1 %v5903_v48, %s3682_s29  ;;  %v2402_v0 = vld [vmem:[#allocation3 + $0x81] sm:$0xff]  ;;  %v2356_v29 = vld [vmem:[#allocation3 + $0xb1] sm:$0xff] }
 0x3f5   :  { %v5996_v52 = vld [vmem:[#allocation3 + $0xb0] sm:$0xff]  ;;  %v2418_v12 = vld [vmem:[#allocation3 + $0x82] sm:$0xff] }
 0x3f6   :  { %v2372_v17 = vld [vmem:[#allocation3 + $0xb2] sm:$0xff]  ;;  %v6008_v44 = vld [vmem:[#allocation3 + $0xc0] sm:$0xff] }
 0x3f7   :  { %2560 = vrot.lane.b32.xlu0 %v5907_v43, %s3680_s27  ;;  %v2357_v58 = vld [vmem:[#allocation3 + $0xc1] sm:$0xff]  ;;  %v2358_v35 = vld [vmem:[#allocation3 + $0xd1] sm:$0xff] }
 0x3f8   :  { %2500 = vrot.lane.b32.xlu1 %v2351_v5, %s3677_s23  ;;  %v2373_v45 = vld [vmem:[#allocation3 + $0xc2] sm:$0xff]  ;;  %v6033_v31 = vld [vmem:[#allocation3 + $0xd0] sm:$0xff] }
 0x3f9   :  { %v2374_v46 = vld [vmem:[#allocation3 + $0xd2] sm:$0xff]  ;;  %v6044_v39 = vld [vmem:[#allocation3 + $0xe0] sm:$0xff] }
 0x3fa   :  { %v2359_v55 = vld [vmem:[#allocation3 + $0xe1] sm:$0xff]  ;;  %v2360_v49 = vld [vmem:[#allocation3 + $0xf1] sm:$0xff] }
 0x3fb   :  { %2624 = vrot.lane.b32.xlu0 %v5912_v40, %s3682_s29  ;;  %v2375_v36 = vld [vmem:[#allocation3 + $0xe2] sm:$0xff]  ;;  %v6069_v10 = vld [vmem:[#allocation3 + $0xf0] sm:$0xff] }
 0x3fc   :  { %2752 = vrot.lane.b32.xlu1 %v5895_v61, %s3688_s6 }
 0x3ff   :  { %2688 = vrot.lane.b32.xlu0 %v5891_v21, %s3684_s16 }
 0x400   :  { %2564 = vrot.lane.b32.xlu1 %v2367_v13, %s3680_s27 }
 0x403   :  { %2690 = vrot.lane.b32.xlu0 %v2351_v5, %s3684_s16 }
 0x404   :  { %2816 = vrot.lane.b32.xlu1 %v5903_v48, %s3685_s4 }
 0x407   :  { %2502 = vrot.lane.b32.xlu0 %v2352_v20, %s3677_s23 }
 0x408   :  { %2628 = vrot.lane.b32.xlu1 %v5934_v24, %s3682_s29 }
 0x40b   :  { %2754 = vrot.lane.b32.xlu0 %v2367_v13, %s3688_s6 }
 0x40c   :  { %2880 = vrot.lane.b32.xlu1 %v2351_v5, %s3687_s22 }
 0x40f   :  { %2566 = vrot.lane.b32.xlu0 %v2368_v42, %s3680_s27 }
 0x410   :  { %2692 = vrot.lane.b32.xlu1 %v2352_v20, %s3684_s16 }
 0x413   :  { %2818 = vrot.lane.b32.xlu0 %v5934_v24, %s3685_s4 }
 0x414   :  { %2944 = vrot.lane.b32.xlu1 %v2367_v13, %s3686_s21 }
 0x417   :  { %2630 = vrot.lane.b32.xlu0 %v5963_v15, %s3682_s29 }
 0x418   :  { %2694 = vrot.lane.b32.xlu1 %v2400_v18, %s3684_s16 }
 0x41b   :  { %2882 = vrot.lane.b32.xlu0 %v2352_v20, %s3687_s22  ;;  %v6067_v20 = vld [vmem:[#allocation3 + $0x20] sm:$0xff] }
 0x41c   :  { %2946 = vrot.lane.b32.xlu1 %v2368_v42, %s3686_s21 }
 0x41f   :  { %2504 = vrot.lane.b32.xlu0 %v2400_v18, %s3677_s23 }
 0x420   :  { %2568 = vrot.lane.b32.xlu1 %v2369_v37, %s3680_s27 }
 0x423   :  { %2756 = vrot.lane.b32.xlu0 %v2368_v42, %s3688_s6  ;;  %v2376_v42 = vld [vmem:[#allocation3 + $0xf2] sm:$0xff] }
 0x424   :  { %2820 = vrot.lane.b32.xlu1 %v5963_v15, %s3685_s4 }
 0x427   :  { %2506 = vrot.lane.b32.xlu0 %v2354_v2, %s3677_s23 }
 0x428   :  { %2632 = vrot.lane.b32.xlu1 %v5976_v22, %s3682_s29 }
 0x42b   :  { %2758 = vrot.lane.b32.xlu0 %v2369_v37, %s3688_s6 }
 0x42c   :  { %2884 = vrot.lane.b32.xlu1 %v2400_v18, %s3687_s22 }
 0x42f   :  { %2570 = vrot.lane.b32.xlu0 %v2370_v51, %s3680_s27 }
 0x430   :  { %2696 = vrot.lane.b32.xlu1 %v2354_v2, %s3684_s16 }
 0x433   :  { %2822 = vrot.lane.b32.xlu0 %v5976_v22, %s3685_s4 }
 0x434   :  { %2948 = vrot.lane.b32.xlu1 %v2369_v37, %s3686_s21 }
 0x437   :  { %2634 = vrot.lane.b32.xlu0 %v2386_v4, %s3682_s29 }
 0x438   :  { %2698 = vrot.lane.b32.xlu1 %v2402_v0, %s3684_s16 }
 0x43b   :  { %2886 = vrot.lane.b32.xlu0 %v2354_v2, %s3687_s22 }
 0x43c   :  { %2950 = vrot.lane.b32.xlu1 %v2370_v51, %s3686_s21 }
 0x43f   :  { %2760 = vrot.lane.b32.xlu0 %v2370_v51, %s3688_s6 }
 0x440   :  { %2824 = vrot.lane.b32.xlu1 %v2386_v4, %s3685_s4 }
 0x443   :  { %2510 = vrot.lane.b32.xlu0 %v2356_v29, %s3677_s23 }
 0x444   :  { %2636 = vrot.lane.b32.xlu1 %v5996_v52, %s3682_s29 }
 0x447   :  { %2762 = vrot.lane.b32.xlu0 %v2418_v12, %s3688_s6 }
 0x448   :  { %2888 = vrot.lane.b32.xlu1 %v2402_v0, %s3687_s22 }
 0x44b   :  { %2574 = vrot.lane.b32.xlu0 %v2372_v17, %s3680_s27 }
 0x44c   :  { %2700 = vrot.lane.b32.xlu1 %v2356_v29, %s3684_s16 }
 0x44f   :  { %2638 = vrot.lane.b32.xlu0 %v6008_v44, %s3682_s29 }
 0x450   :  { %2952 = vrot.lane.b32.xlu1 %v2418_v12, %s3686_s21 }
 0x453   :  { %2512 = vrot.lane.b32.xlu0 %v2357_v58, %s3677_s23 }
 0x454   :  { %2702 = vrot.lane.b32.xlu1 %v2357_v58, %s3684_s16 }
 0x457   :  { %2764 = vrot.lane.b32.xlu0 %v2372_v17, %s3688_s6  ;;  %v6096_v17 = vld [vmem:[#allocation3 + $0x100] sm:$0xff] }
 0x458   :  { %2576 = vrot.lane.b32.xlu1 %v2373_v45, %s3680_s27 }
 0x45b   :  { %2514 = vrot.lane.b32.xlu0 %v2358_v35, %s3677_s23 }
 0x45c   :  { %2828 = vrot.lane.b32.xlu1 %v6008_v44, %s3685_s4 }
 0x45e   :  { %v6031_v11 = vpop.permute.xlu1 %2498 }
 0x45f   :  { %2766 = vrot.lane.b32.xlu0 %v2373_v45, %s3688_s6  ;;  %v2991_v0 = vsel %vm1755_vm2, %v5912_v40, %v6031_v11 }
 0x460   :  { %2640 = vrot.lane.b32.xlu1 %v6033_v31, %s3682_s29 }
 0x462   :  { %v2563_v27 = vpop.permute.xlu1 %2562 }
 0x463   :  { %2578 = vrot.lane.b32.xlu0 %v2374_v46, %s3680_s27  ;;  %v3007_v12 = vsel %vm1789_vm5, %v2991_v0, %v2563_v27 }
 0x464   :  { %2892 = vrot.lane.b32.xlu1 %v2357_v58, %s3687_s22 }
 0x465   :  { %v2497_v50 = vpop.permute.xlu0 %2496 }
 0x466   :  { %v2627_v38 = vpop.permute.xlu1 %2626  ;;  %v2990_v26 = vsel %vm1755_vm2, %v6067_v20, %v2497_v50 }
 0x467   :  { %2830 = vrot.lane.b32.xlu0 %v6033_v31, %s3685_s4  ;;  %v3023_v58 = vsel %vm1823_vm7, %v3007_v12, %v2627_v38  ;;  %v6142_v12 = vld [vmem:[#allocation3 + $0x110] sm:$0xff] }
 0x468   :  { %2704 = vrot.lane.b32.xlu1 %v2358_v35, %s3684_s16 }
 0x469   :  { %v2561_v16 = vpop.permute.xlu0 %2560 }
 0x46a   :  { %v6048_v32 = vpop.permute.xlu1 %2500  ;;  %v3006_v57 = vsel %vm1789_vm5, %v2990_v26, %v2561_v16 }
 0x46b   :  { %2642 = vrot.lane.b32.xlu0 %v6044_v39, %s3682_s29 }
 0x46c   :  { %2956 = vrot.lane.b32.xlu1 %v2373_v45, %s3686_s21 }
 0x46d   :  { %v2625_v23 = vpop.permute.xlu0 %2624 }
 0x46e   :  { %v2753_v34 = vpop.permute.xlu1 %2752  ;;  %v3022_v25 = vsel %vm1823_vm7, %v3006_v57, %v2625_v23  ;;  %v2408_v23 = vld [vmem:[#allocation3 + $0x101] sm:$0xff] }
 0x46f   :  { %2894 = vrot.lane.b32.xlu0 %v2358_v35, %s3687_s22 }
 0x470   :  { %2706 = vrot.lane.b32.xlu1 %v2359_v55, %s3684_s16 }
 0x471   :  { %v2689_v9 = vpop.permute.xlu0 %2688 }
 0x472   :  { %v6054_v33 = vpop.permute.xlu1 %2564  ;;  %v3038_v47 = vsel %vm1857_vm9, %v3022_v25, %v2689_v9  ;;  %v2364_v25 = vld [vmem:[#allocation3 + $0x12] sm:$0xff] }
 0x473   :  { %2516 = vrot.lane.b32.xlu0 %v2359_v55, %s3677_s23  ;;  %v3055_v6 = vsel %vm3052_vm12, %v3038_v47, %v2753_v34 }
 0x474   :  { %2958 = vrot.lane.b32.xlu1 %v2374_v46, %s3686_s21 }
 0x475   :  { %v2691_v14 = vpop.permute.xlu0 %2690 }
 0x476   :  { %v2817_v28 = vpop.permute.xlu1 %2816  ;;  %v3039_v35 = vsel %vm1857_vm9, %v3023_v58, %v2691_v14 }
 0x477   :  { %2768 = vrot.lane.b32.xlu0 %v2374_v46, %s3688_s6  ;;  %v3072_v37 = vsel %vm3069_vm13, %v3055_v6, %v2817_v28  ;;  %v2348_v28 = vld [vmem:[#allocation3 + $0x11] sm:$0xff] }
 0x478   :  { %2580 = vrot.lane.b32.xlu1 %v2375_v36, %s3680_s27 }
 0x479   :  { %v6058_v3 = vpop.permute.xlu0 %2502 }
 0x47a   :  { %v6062_v5 = vpop.permute.xlu1 %2628  ;;  %v2993_v58 = vsel %vm1755_vm2, %v5934_v24, %v6058_v3 }
 0x47b   :  { %2518 = vrot.lane.b32.xlu0 %v2360_v49, %s3677_s23 }
 0x47c   :  { %2832 = vrot.lane.b32.xlu1 %v6044_v39, %s3685_s4 }
 0x47d   :  { %v2755_v13 = vpop.permute.xlu0 %2754 }
 0x47e   :  { %v2881_v8 = vpop.permute.xlu1 %2880  ;;  %v3056_v11 = vsel %vm3052_vm12, %v3039_v35, %v2755_v13 }
 0x47f   :  { %2770 = vrot.lane.b32.xlu0 %v2375_v36, %s3688_s6  ;;  %v3089_v2 = vsel %vm3086_vm14, %v3072_v37, %v2881_v8  ;;  %v2377_v8 = vld [vmem:[#allocation3 + $0x102] sm:$0xff] }
 0x480   :  { %2644 = vrot.lane.b32.xlu1 %v6069_v10, %s3682_s29 }
 0x481   :  { %v6073_v63 = vpop.permute.xlu0 %2566 }
 0x482   :  { %v2693_v62 = vpop.permute.xlu1 %2692 }
 0x483   :  { %2582 = vrot.lane.b32.xlu0 %v2376_v42, %s3680_s27 }
 0x484   :  { %2896 = vrot.lane.b32.xlu1 %v2359_v55, %s3687_s22 }
 0x485   :  { %v2819_v18 = vpop.permute.xlu0 %2818 }
 0x486   :  { %v2945_v51 = vpop.permute.xlu1 %2944  ;;  %v3073_v50 = vsel %vm3069_vm13, %v3056_v11, %v2819_v18  ;;  %v3009_v11 = vsel %vm1789_vm5, %v2993_v58, %v6073_v63 }
 0x487   :  { %2834 = vrot.lane.b32.xlu0 %v6069_v10, %s3685_s4  ;;  %v3106_v4 = vsel %vm3103_vm15, %v3089_v2, %v2945_v51  ;;  %v6134_v51 = vld [vmem:[#allocation3 + $0x10] sm:$0xff] }
 0x488   :  { %2708 = vrot.lane.b32.xlu1 %v2360_v49, %s3684_s16  ;;  %3596 = vmatprep.mubr.msk.f32.mxu1 %vm3136_vm0, %v3106_v4 }
 0x489   :  { %v6091_v29 = vpop.permute.xlu0 %2630 }
 0x48a   :  { %v2695_v45 = vpop.permute.xlu1 %2694 }
 0x48b   :  { %2646 = vrot.lane.b32.xlu0 %v6096_v17, %s3682_s29 }
 0x48c   :  { %2960 = vrot.lane.b32.xlu1 %v2375_v36, %s3686_s21 }
 0x48d   :  { %v2883_v46 = vpop.permute.xlu0 %2882 }
 0x48e   :  { %v3090_v16 = vsel %vm3086_vm14, %v3073_v50, %v2883_v46  ;;  %v2947_v27 = vpop.permute.xlu1 %2946  ;;  %v3025_v46 = vsel %vm1823_vm7, %v3009_v11, %v6091_v29 }
 0x48f   :  { %2898 = vrot.lane.b32.xlu0 %v2360_v49, %s3687_s22  ;;  %v3107_v38 = vsel %vm3103_vm15, %v3090_v16, %v2947_v27  ;;  %v2362_v49 = vld [vmem:[#allocation3 + $0x111] sm:$0xff]  ;;  %v3041_v16 = vsel %vm1857_vm9, %v3025_v46, %v2695_v45  ;;  %v2394_v45 = vld [vmem:[#allocation3 + $0x120] sm:$0xff] }
 0x490   :  { %2520 = vrot.lane.b32.xlu1 %v2408_v23, %s3677_s23  ;;  %3597 = vmatmul.mubr.msk.f32.vlgmr.msra.gmra.mxu1 %vm3136_vm0, %v3107_v38 }
 0x491   :  { %v6108_v34 = vpop.permute.xlu0 %2504 }
 0x492   :  { %v6113_v55 = vpop.permute.xlu1 %2568 }
 0x493   :  { %2710 = vrot.lane.b32.xlu0 %v2408_v23, %s3684_s16 }
 0x494   :  { %2772 = vrot.lane.b32.xlu1 %v2376_v42, %s3688_s6 }
 0x495   :  { %v2757_v9 = vpop.permute.xlu0 %2756 }
 0x496   :  { %v2821_v14 = vpop.permute.xlu1 %2820 }
 0x497   :  { %2962 = vrot.lane.b32.xlu0 %v2376_v42, %s3686_s21  ;;  %v2992_v42 = vsel %vm1755_vm2, %v5903_v48, %v6048_v32 }
 0x498   :  { %2494 = vrot.lane.b32.xlu1 %v2348_v28, %s3677_s23  ;;  %v3008_v6 = vsel %vm1789_vm5, %v2992_v42, %v6054_v33  ;;  %v2378_v33 = vld [vmem:[#allocation3 + $0x112] sm:$0xff] }
 0x499   :  { %v2507_v36 = vpop.permute.xlu0 %2506  ;;  %v3024_v18 = vsel %vm1823_vm7, %v3008_v6, %v6062_v5 }
 0x49a   :  { %v6119_v13 = vpop.permute.xlu1 %2632  ;;  %v3040_v2 = vsel %vm1857_vm9, %v3024_v18, %v2693_v62 }
 0x49b   :  { %2522 = vrot.lane.b32.xlu0 %v2362_v49, %s3677_s23  ;;  %v3057_v4 = vsel %vm3052_vm12, %v3040_v2, %v2757_v9 }
 0x49c   :  { %2774 = vrot.lane.b32.xlu1 %v2377_v8, %s3688_s6  ;;  %v3074_v32 = vsel %vm3069_vm13, %v3057_v4, %v2821_v14 }
 0x49d   :  { %v2759_v26 = vpop.permute.xlu0 %2758 }
 0x49e   :  { %v2885_v57 = vpop.permute.xlu1 %2884  ;;  %v3058_v24 = vsel %vm3052_vm12, %v3041_v16, %v2759_v26 }
 0x49f   :  { %2584 = vrot.lane.b32.xlu0 %v2377_v8, %s3680_s27  ;;  %v3091_v0 = vsel %vm3086_vm14, %v3074_v32, %v2885_v57 }
 0x4a0   :  { %2558 = vrot.lane.b32.xlu1 %v2364_v25, %s3680_s27 }
 0x4a1   :  { %v2571_v47 = vpop.permute.xlu0 %2570 }
 0x4a2   :  { %v2697_v37 = vpop.permute.xlu1 %2696 }
 0x4a3   :  { %2836 = vrot.lane.b32.xlu0 %v6096_v17, %s3685_s4 }
 0x4a4   :  { %2620 = vrot.lane.b32.xlu1 %v6134_v51, %s3682_s29 }
 0x4a5   :  { %v2823_v48 = vpop.permute.xlu0 %2822 }
 0x4a6   :  { %v2949_v5 = vpop.permute.xlu1 %2948  ;;  %v3075_v27 = vsel %vm3069_vm13, %v3058_v24, %v2823_v48  ;;  %v2339_v24 = vld [vmem:[#allocation3 + $0xa0] sm:$0xff] }
 0x4a7   :  { %2586 = vrot.lane.b32.xlu0 %v2378_v33, %s3680_s27  ;;  %v3108_v62 = vsel %vm3103_vm15, %v3091_v0, %v2949_v5 }
 0x4a8   :  { %2838 = vrot.lane.b32.xlu1 %v6142_v12, %s3685_s4  ;;  %3599 = vmatprep.mubr.msk.f32.mxu1 %vm3136_vm0, %v3108_v62  ;;  %v2426_v62 = vld [vmem:[#allocation3 + $0x122] sm:$0xff] }
 0x4a9   :  { %v2635_v35 = vpop.permute.xlu0 %2634 }
 0x4aa   :  { %v2699_v50 = vpop.permute.xlu1 %2698 }
 0x4ab   :  { %2648 = vrot.lane.b32.xlu0 %v6142_v12, %s3682_s29 }
 0x4ac   :  { %2622 = vrot.lane.b32.xlu1 %v6067_v20, %s3682_s29 }
 0x4ad   :  { %v2887_v3 = vpop.permute.xlu0 %2886 }
 0x4ae   :  { %v3092_v38 = vsel %vm3086_vm14, %v3075_v27, %v2887_v3  ;;  %v2951_v63 = vpop.permute.xlu1 %2950 }
 0x4af   :  { %2900 = vrot.lane.b32.xlu0 %v2408_v23, %s3687_s22  ;;  %v3109_v29 = vsel %vm3103_vm15, %v3092_v38, %v2951_v63  ;;  %v2995_v23 = vsel %vm1755_vm2, %v5976_v22, %v2507_v36 }
 0x4b0   :  { %2684 = vrot.lane.b32.xlu1 %v2348_v28, %s3684_s16  ;;  %3600 = vmatmul.mubr.msk.f32.gmra.mxu1 %vm3136_vm0, %v3109_v29  ;;  %v3011_v42 = vsel %vm1789_vm5, %v2995_v23, %v2571_v47  ;;  %v2410_v47 = vld [vmem:[#allocation3 + $0x121] sm:$0xff] }
 0x4b1   :  { %v2761_v9 = vpop.permute.xlu0 %2760  ;;  %v3027_v28 = vsel %vm1823_vm7, %v3011_v42, %v2635_v35 }
 0x4b2   :  { %v2825_v14 = vpop.permute.xlu1 %2824  ;;  %v3043_v18 = vsel %vm1857_vm9, %v3027_v28, %v2699_v50  ;;  %v2475_v50 = vld [vmem:[#allocation3 + $0x132] sm:$0xff] }
 0x4b3   :  { %2650 = vrot.lane.b32.xlu0 %v2394_v45, %s3682_s29 }
 0x4b4   :  { %2902 = vrot.lane.b32.xlu1 %v2362_v49, %s3687_s22 }
 0x4b5   :  { %v6168_v26 = vpop.permute.xlu0 %2510 }
 0x4b6   :  { %v2637_v57 = vpop.permute.xlu1 %2636 }
 0x4b7   :  { %2712 = vrot.lane.b32.xlu0 %v2362_v49, %s3684_s16  ;;  %v2994_v49 = vsel %vm1755_vm2, %v5963_v15, %v6108_v34 }
 0x4b8   :  { %2686 = vrot.lane.b32.xlu1 %v5899_v59, %s3684_s16  ;;  %v3010_v36 = vsel %vm1789_vm5, %v2994_v49, %v6113_v55 }
 0x4b9   :  { %v2763_v6 = vpop.permute.xlu0 %2762  ;;  %v3026_v48 = vsel %vm1823_vm7, %v3010_v36, %v6119_v13 }
 0x4ba   :  { %v2889_v2 = vpop.permute.xlu1 %2888  ;;  %v3060_v4 = vsel %vm3052_vm12, %v3043_v18, %v2763_v6  ;;  %v3042_v0 = vsel %vm1857_vm9, %v3026_v48, %v2697_v37 }
 0x4bb   :  { %2964 = vrot.lane.b32.xlu0 %v2377_v8, %s3686_s21  ;;  %v3077_v8 = vsel %vm3069_vm13, %v3060_v4, %v6018_v53  ;;  %v3059_v15 = vsel %vm3052_vm12, %v3042_v0, %v2761_v9 }
 0x4bc   :  { %2748 = vrot.lane.b32.xlu1 %v2364_v25, %s3688_s6  ;;  %v3076_v25 = vsel %vm3069_vm13, %v3059_v15, %v2825_v14  ;;  %v3094_v55 = vsel %vm3086_vm14, %v3077_v8, %v6025_v30 }
 0x4bd   :  { %v2575_v22 = vpop.permute.xlu0 %2574  ;;  %v3093_v13 = vsel %vm3086_vm14, %v3076_v25, %v2889_v2  ;;  %v3111_v37 = vsel %vm3103_vm15, %v3094_v55, %v6001_v56 }
 0x4be   :  { %v2701_v32 = vpop.permute.xlu1 %2700 }
 0x4bf   :  { %2714 = vrot.lane.b32.xlu0 %v2410_v47, %s3684_s16 }
 0x4c0   :  { %2966 = vrot.lane.b32.xlu1 %v2378_v33, %s3686_s21 }
 0x4c1   :  { %v2639_v34 = vpop.permute.xlu0 %2638 }
 0x4c2   :  { %v2953_v53 = vpop.permute.xlu1 %2952 }
 0x4c3   :  { %2776 = vrot.lane.b32.xlu0 %v2378_v33, %s3688_s6  ;;  %v3110_v5 = vsel %vm3103_vm15, %v3093_v13, %v2953_v53 }
 0x4c4   :  { %2778 = vrot.lane.b32.xlu1 %v2426_v62, %s3688_s6  ;;  %3602 = vmatprep.mubr.msk.f32.mxu1 %vm3136_vm0, %v3110_v5 }
 0x4c5   :  { %v2513_v58 = vpop.permute.xlu0 %2512  ;;  %3603 = vmatmul.mubr.msk.f32.gmra.mxu1 %vm3136_vm0, %v3111_v37 }
 0x4c6   :  { %v2703_v30 = vpop.permute.xlu1 %2702  ;;  %v2998_v15 = vsel %vm1755_vm2, %v6008_v44, %v2513_v58 }
 0x4c7   :  { %2750 = vrot.lane.b32.xlu0 %v5907_v43, %s3688_s6 }
 0x4c8   :  { %2840 = vrot.lane.b32.xlu1 %v2394_v45, %s3685_s4 }
 0x4c9   :  { %v2765_v35 = vpop.permute.xlu0 %2764 }
 0x4ca   :  { %v2577_v33 = vpop.permute.xlu1 %2576 }
 0x4cb   :  { %2812 = vrot.lane.b32.xlu0 %v6067_v20, %s3685_s4  ;;  %v2996_v20 = vsel %vm1755_vm2, %v2339_v24, %v6012_v1  ;;  %v3014_v25 = vsel %vm1789_vm5, %v2998_v15, %v2577_v33 }
 0x4cc   :  { %2904 = vrot.lane.b32.xlu1 %v2410_v47, %s3687_s22  ;;  %v3012_v38 = vsel %vm1789_vm5, %v2996_v20, %v5993_v7 }
 0x4cd   :  { %v6211_v11 = vpop.permute.xlu0 %2514  ;;  %v3028_v63 = vsel %vm1823_vm7, %v3012_v38, %v2637_v57 }
 0x4ce   :  { %v2829_v56 = vpop.permute.xlu1 %2828  ;;  %v3044_v29 = vsel %vm1857_vm9, %v3028_v63, %v2701_v32  ;;  %v2999_v44 = vsel %vm1755_vm2, %v6033_v31, %v6211_v11 }
 0x4cf   :  { %2814 = vrot.lane.b32.xlu0 %v5912_v40, %s3685_s4  ;;  %v3061_v9 = vsel %vm3052_vm12, %v3044_v29, %v2765_v35 }
 0x4d0   :  { %2968 = vrot.lane.b32.xlu1 %v2426_v62, %s3686_s21  ;;  %v3078_v1 = vsel %vm3069_vm13, %v3061_v9, %v2829_v56 }
 0x4d1   :  { %v2767_v46 = vpop.permute.xlu0 %2766 }
 0x4d2   :  { %v2641_v16 = vpop.permute.xlu1 %2640 }
 0x4d3   :  { %2876 = vrot.lane.b32.xlu0 %v5899_v59, %s3687_s22  ;;  %v3030_v55 = vsel %vm1823_vm7, %v3014_v25, %v2641_v16 }
 0x4d4   :  { %2970 = vrot.lane.b32.xlu1 %v2475_v50, %s3686_s21 }
 0x4d5   :  { %v2579_v3 = vpop.permute.xlu0 %2578 }
 0x4d6   :  { %v2893_v40 = vpop.permute.xlu1 %2892  ;;  %v3015_v33 = vsel %vm1789_vm5, %v2999_v44, %v2579_v3 }
 0x4d7   :  { %2878 = vrot.lane.b32.xlu0 %v5891_v21, %s3687_s22  ;;  %v3095_v21 = vsel %vm3086_vm14, %v3078_v1, %v2893_v40 }
 0x4d9   :  { %v2831_v27 = vpop.permute.xlu0 %2830 }
 0x4da   :  { %v2705_v59 = vpop.permute.xlu1 %2704 }
 0x4db   :  { %2940 = vrot.lane.b32.xlu0 %v5907_v43, %s3686_s21  ;;  %v2997_v43 = vsel %vm1755_vm2, %v5996_v52, %v6168_v26  ;;  %v3046_v53 = vsel %vm1857_vm9, %v3030_v55, %v2705_v59 }
 0x4dc   :  { %v3013_v23 = vsel %vm1789_vm5, %v2997_v43, %v2575_v22 }
 0x4dd   :  { %v2643_v45 = vpop.permute.xlu0 %2642  ;;  %v3029_v42 = vsel %vm1823_vm7, %v3013_v23, %v2639_v34 }
 0x4de   :  { %v2957_v14 = vpop.permute.xlu1 %2956  ;;  %v3045_v28 = vsel %vm1857_vm9, %v3029_v42, %v2703_v30  ;;  %v3031_v50 = vsel %vm1823_vm7, %v3015_v33, %v2643_v45 }
 0x4df   :  { %2942 = vrot.lane.b32.xlu0 %v5895_v61, %s3686_s21  ;;  %v3112_v7 = vsel %vm3103_vm15, %v3095_v21, %v2957_v14  ;;  %v3062_v18 = vsel %vm3052_vm12, %v3045_v28, %v2767_v46 }
 0x4e0   :  { %3605 = vmatprep.mubr.msk.f32.mxu1 %vm3136_vm0, %v3112_v7  ;;  %v3079_v2 = vsel %vm3069_vm13, %v3062_v18, %v2831_v27 }
 0x4e1   :  { %v2895_v57 = vpop.permute.xlu0 %2894 }
 0x4e2   :  { %v2707_v6 = vpop.permute.xlu1 %2706  ;;  %v3096_v4 = vsel %vm3086_vm14, %v3079_v2, %v2895_v57 }
 0x4e3   :  { %v3047_v24 = vsel %vm1857_vm9, %v3031_v50, %v2707_v6 }
 0x4e5   :  { %v2517_v61 = vpop.permute.xlu0 %2516 }
 0x4e6   :  { %v2959_v49 = vpop.permute.xlu1 %2958  ;;  %v3000_v6 = vsel %vm1755_vm2, %v6044_v39, %v2517_v61 }
 0x4e7   :  { %v3113_v52 = vsel %vm3103_vm15, %v3096_v4, %v2959_v49 }
 0x4e8   :  { %3606 = vmatmul.mubr.msk.f32.gmra.mxu1 %vm3136_vm0, %v3113_v52 }
 0x4e9   :  { %v2769_v26 = vpop.permute.xlu0 %2768 }
 0x4ea   :  { %v2581_v36 = vpop.permute.xlu1 %2580  ;;  %v3063_v5 = vsel %vm3052_vm12, %v3046_v53, %v2769_v26 }
 0x4eb   :  { %v3016_v18 = vsel %vm1789_vm5, %v3000_v6, %v2581_v36 }
 0x4ed   :  { %v2519_v22 = vpop.permute.xlu0 %2518 }
 0x4ee   :  { %v2833_v47 = vpop.permute.xlu1 %2832 }
 0x4ef   :  { %v3080_v37 = vsel %vm3069_vm13, %v3063_v5, %v2833_v47 }
 0x4f1   :  { %v2771_v48 = vpop.permute.xlu0 %2770 }
 0x4f2   :  { %v2645_v8 = vpop.permute.xlu1 %2644  ;;  %v3064_v20 = vsel %vm3052_vm12, %v3047_v24, %v2771_v48  ;;  %v3001_v48 = vsel %vm1755_vm2, %v6069_v10, %v2519_v22 }
 0x4f3   :  { %v3032_v2 = vsel %vm1823_vm7, %v3016_v18, %v2645_v8 }
 0x4f5   :  { %v2583_v32 = vpop.permute.xlu0 %2582 }
 0x4f6   :  { %v2897_v0 = vpop.permute.xlu1 %2896  ;;  %v3017_v39 = vsel %vm1789_vm5, %v3001_v48, %v2583_v32 }
 0x4f7   :  { %v3097_v30 = vsel %vm3086_vm14, %v3080_v37, %v2897_v0 }
 0x4f9   :  { %v2835_v34 = vpop.permute.xlu0 %2834 }
 0x4fa   :  { %v2709_v13 = vpop.permute.xlu1 %2708  ;;  %v3081_v27 = vsel %vm3069_vm13, %v3064_v20, %v2835_v34 }
 0x4fb   :  { %v3048_v49 = vsel %vm1857_vm9, %v3032_v2, %v2709_v13 }
 0x4fd   :  { %v2647_v62 = vpop.permute.xlu0 %2646 }
 0x4fe   :  { %v2961_v35 = vpop.permute.xlu1 %2960  ;;  %v3033_v36 = vsel %vm1823_vm7, %v3017_v39, %v2647_v62 }
 0x4ff   :  { %v3114_v56 = vsel %vm3103_vm15, %v3097_v30, %v2961_v35 }
 0x500   :  { %3608 = vmatprep.mubr.msk.f32.mxu1 %vm3136_vm0, %v3114_v56 }
 0x501   :  { %v2899_v46 = vpop.permute.xlu0 %2898 }
 0x502   :  { %v2521_v58 = vpop.permute.xlu1 %2520  ;;  %v3098_v38 = vsel %vm3086_vm14, %v3081_v27, %v2899_v46 }
 0x503   :  { %v3002_v30 = vsel %vm1755_vm2, %v6096_v17, %v2521_v58 }
 0x505   :  { %v2711_v16 = vpop.permute.xlu0 %2710 }
 0x506   :  { %v2773_v40 = vpop.permute.xlu1 %2772  ;;  %v3049_v34 = vsel %vm1857_vm9, %v3033_v36, %v2711_v16 }
 0x507   :  { %v3065_v52 = vsel %vm3052_vm12, %v3048_v49, %v2773_v40 }
 0x509   :  { %v2963_v63 = vpop.permute.xlu0 %2962 }
 0x50a   :  { %v3115_v59 = vsel %vm3103_vm15, %v3098_v38, %v2963_v63  ;;  %v6269_v31 = vpop.permute.xlu1 %2494 }
 0x50b   :  { %3609 = vmatmul.mubr.msk.f32.gmra.mxu1 %vm3136_vm0, %v3115_v59 }
 0x50d   :  { %v2523_v11 = vpop.permute.xlu0 %2522 }
 0x50e   :  { %v2775_v3 = vpop.permute.xlu1 %2774  ;;  %v3003_v35 = vsel %vm1755_vm2, %v6142_v12, %v2523_v11  ;;  %v2331_v12 = vld [vmem:[#allocation3] sm:$0xff] }
 0x50f   :  { %v3066_v25 = vsel %vm3052_vm12, %v3049_v34, %v2775_v3  ;;  %v2988_v3 = vsel %vm1755_vm2, %v2331_v12, %v6035_v60 }
 0x511   :  { %v2585_v29 = vpop.permute.xlu0 %2584 }
 0x512   :  { %v6271_v9 = vpop.permute.xlu1 %2558  ;;  %v3018_v46 = vsel %vm1789_vm5, %v3002_v30, %v2585_v29 }
 0x515   :  { %v2837_v45 = vpop.permute.xlu0 %2836 }
 0x516   :  { %v6273_v1 = vpop.permute.xlu1 %2620  ;;  %v3082_v47 = vsel %vm3069_vm13, %v3065_v52, %v2837_v45 }
 0x519   :  { %v2587_v21 = vpop.permute.xlu0 %2586 }
 0x51a   :  { %v2839_v14 = vpop.permute.xlu1 %2838  ;;  %v3019_v44 = vsel %vm1789_vm5, %v3003_v35, %v2587_v21 }
 0x51b   :  { %v3083_v13 = vsel %vm3069_vm13, %v3066_v25, %v2839_v14  ;;  %v3004_v14 = vsel %vm1789_vm5, %v2988_v3, %v6006_v54 }
 0x51d   :  { %v2649_v7 = vpop.permute.xlu0 %2648 }
 0x51e   :  { %v6275_v43 = vpop.permute.xlu1 %2622  ;;  %v3034_v33 = vsel %vm1823_vm7, %v3018_v46, %v2649_v7 }
 0x521   :  { %v2901_v57 = vpop.permute.xlu0 %2900 }
 0x522   :  { %v2685_v23 = vpop.permute.xlu1 %2684  ;;  %v3099_v0 = vsel %vm3086_vm14, %v3082_v47, %v2901_v57 }
 0x525   :  { %v2651_v42 = vpop.permute.xlu0 %2650 }
 0x526   :  { %v2903_v28 = vpop.permute.xlu1 %2902  ;;  %v3035_v50 = vsel %vm1823_vm7, %v3019_v44, %v2651_v42  ;;  %v2989_v42 = vsel %vm1755_vm2, %v6134_v51, %v6269_v31  ;;  %v3478_v51 = vld [vmem:[%s6375_s8] ss:$0 sm:$0xff]  ;;  %s3689_s8 = smov [#allocation4]  }
 0x527   :  { %v3100_v10 = vsel %vm3086_vm14, %v3083_v13, %v2903_v28  ;;  %s3351_s29 = sshll.u32 %s3689_s8, 4  ;;  %s3352_s29 = int_to_ptr.vmem [resolvable:$true] %s3351_s29 }
 0x528   :  { %s3654_s16 = scalar_lea.vmem %s3352_s29, 2048  ;;  %p3659_p1 = scmp.lt.s32.totalorder %s3352_s29, %s3352_s29 }
 0x529   :  { %v2713_v4 = vpop.permute.xlu0 %2712  ;;  %p3655_p0 = scmp.ne.s32.totalorder %s3352_s29, %s3654_s16  ;;  %p3660_p2 = scmp.lt.s32.totalorder %s3654_s16, %s3654_s16 }
 0x52a   :  { %v2687_v26 = vpop.permute.xlu1 %2686  ;;  %v3050_v24 = vsel %vm1857_vm9, %v3034_v33, %v2713_v4 }
 0x52b   :  { %p3661_p3 = por %p3660_p2, %p3659_p1 }
 0x52d   :  { %v2965_v15 = vpop.permute.xlu0 %2964  ;;  %p3662_p4 = pnand %p3661_p3, %p3655_p0 }
 0x52e   :  { %v3116_v61 = vsel %vm3103_vm15, %v3099_v0, %v2965_v15  ;;  %v2749_v8 = vpop.permute.xlu1 %2748 }
 0x52f   :  { %3611 = vmatprep.mubr.msk.f32.mxu1 %vm3136_vm0, %v3116_v61 }
 0x531   :  { %v2715_v55 = vpop.permute.xlu0 %2714 }
 0x532   :  { %v2967_v22 = vpop.permute.xlu1 %2966  ;;  %v3051_v20 = vsel %vm1857_vm9, %v3035_v50, %v2715_v55 }
 0x533   :  { %v3117_v53 = vsel %vm3103_vm15, %v3100_v10, %v2967_v22 }
 0x534   :  { %3612 = vmatmul.mubr.msk.f32.gmra.mxu1 %vm3136_vm0, %v3117_v53 }
 0x535   :  { %v2777_v32 = vpop.permute.xlu0 %2776 }
 0x536   :  { %v2779_v5 = vpop.permute.xlu1 %2778  ;;  %v3067_v40 = vsel %vm3052_vm12, %v3050_v24, %v2777_v32 }
 0x537   :  { %v3068_v17 = vsel %vm3052_vm12, %v3051_v20, %v2779_v5 }
 0x538   :  { %v3085_v59 = vsel %vm3069_vm13, %v3068_v17, %v6016_v19  ;;  %v3020_v19 = vsel %vm1823_vm7, %v3004_v14, %v6273_v1 }
 0x539   :  { %v2751_v62 = vpop.permute.xlu0 %2750  ;;  %v3102_v21 = vsel %vm3086_vm14, %v3085_v59, %v6023_v41  ;;  %v3036_v60 = vsel %vm1857_vm9, %v3020_v19, %v2685_v23  ;;  %v3005_v41 = vsel %vm1789_vm5, %v2989_v42, %v6271_v9 }
 0x53a   :  { %v2841_v37 = vpop.permute.xlu1 %2840  ;;  %v3053_v6 = vsel %vm3052_vm12, %v3036_v60, %v2749_v8  ;;  %v3021_v28 = vsel %vm1823_vm7, %v3005_v41, %v6275_v43 }
 0x53b   :  { %v3084_v27 = vsel %vm3069_vm13, %v3067_v40, %v2841_v37  ;;  %v3037_v2 = vsel %vm1857_vm9, %v3021_v28, %v2687_v26 }
 0x53c   :  { %v3054_v4 = vsel %vm3052_vm12, %v3037_v2, %v2751_v62 }
 0x53d   :  { %v2813_v56 = vpop.permute.xlu0 %2812 }
 0x53e   :  { %v2905_v16 = vpop.permute.xlu1 %2904  ;;  %v3070_v54 = vsel %vm3069_vm13, %v3053_v6, %v2813_v56 }
 0x53f   :  { %v3101_v38 = vsel %vm3086_vm14, %v3084_v27, %v2905_v16 }
 0x541   :  { %v2815_v58 = vpop.permute.xlu0 %2814 }
 0x542   :  { %v2969_v63 = vpop.permute.xlu1 %2968  ;;  %v3071_v31 = vsel %vm3069_vm13, %v3054_v4, %v2815_v58 }
 0x543   :  { %v3118_v11 = vsel %vm3103_vm15, %v3101_v38, %v2969_v63 }
 0x544   :  { %3614 = vmatprep.mubr.msk.f32.mxu1 %vm3136_vm0, %v3118_v11 }
 0x545   :  { %v2877_v29 = vpop.permute.xlu0 %2876 }
 0x546   :  { %v2971_v45 = vpop.permute.xlu1 %2970  ;;  %v3087_v1 = vsel %vm3086_vm14, %v3070_v54, %v2877_v29 }
 0x547   :  { %v3119_v7 = vsel %vm3103_vm15, %v3102_v21, %v2971_v45 }
 0x548   :  { %3615 = vmatmul.mubr.msk.f32.gmra.mxu1 %vm3136_vm0, %v3119_v7 }
 0x549   :  { %v2879_v57 = vpop.permute.xlu0 %2878 }
 0x54a   :  { %v3088_v9 = vsel %vm3086_vm14, %v3071_v31, %v2879_v57 }
 0x54d   :  { %v2941_v18 = vpop.permute.xlu0 %2940 }
 0x54e   :  { %v3104_v23 = vsel %vm3103_vm15, %v3087_v1, %v2941_v18 }
 0x54f   :  { %3593 = vmatprep.mubr.msk.f32.mxu0 %vm3136_vm0, %v3104_v23 }
 0x550   :  { %v3598_v49 = vpop.f32.mrf.mxu1 }
 0x551   :  { %v2943_v43 = vpop.permute.xlu0 %2942  ;;  %v3267_v47 = vadd.f32 %v3598_v49, %v3478_v51 }
 0x552   :  { %v3105_v52 = vsel %vm3103_vm15, %v3088_v9, %v2943_v43  ;;  %v3261_v26 = vpop.f32.mrf.mxu1 }
 0x553   :  { %3594 = vmatmul.mubr.msk.f32.vlgmr.msra.gmra.mxu0 %vm3136_vm0, %v3105_v52  ;;  %3333 = vst.msk [vmem:[#allocation4 + $0x18] sm:$0xff] %vm1755_vm2, %v3267_v47  ;;  %v3262_v48 = vadd.f32 %v3478_v51, %v3261_v26 }
 0x555   :  { %3332 = vst.msk [vmem:[#allocation4 + $0x10] sm:$0xff] %vm1755_vm2, %v3262_v48 }
 0x570   :  { %v3601_v0 = vpop.f32.mrf.mxu1 }
 0x571   :  { %v3277_v15 = vadd.f32 %v3601_v0, %v3478_v51 }
 0x572   :  { %v3271_v39 = vpop.f32.mrf.mxu1 }
 0x573   :  { %3335 = vst.msk [vmem:[#allocation4 + $0x28] sm:$0xff] %vm1755_vm2, %v3277_v15  ;;  %v3272_v61 = vadd.f32 %v3478_v51, %v3271_v39 }
 0x575   :  { %3334 = vst.msk [vmem:[#allocation4 + $0x20] sm:$0xff] %vm1755_vm2, %v3272_v61 }
 0x585   :  { %v3604_v36 = vpop.f32.mrf.mxu1 }
 0x586   :  { %v3287_v8 = vadd.f32 %v3604_v36, %v3478_v51 }
 0x587   :  { %v3281_v34 = vpop.f32.mrf.mxu1 }
 0x588   :  { %3337 = vst.msk [vmem:[#allocation4 + $0x38] sm:$0xff] %vm1755_vm2, %v3287_v8  ;;  %v3282_v25 = vadd.f32 %v3478_v51, %v3281_v34 }
 0x58a   :  { %3336 = vst.msk [vmem:[#allocation4 + $0x30] sm:$0xff] %vm1755_vm2, %v3282_v25 }
 0x5a8   :  { %v3607_v55 = vpop.f32.mrf.mxu1 }
 0x5a9   :  { %v3297_v13 = vadd.f32 %v3607_v55, %v3478_v51 }
 0x5aa   :  { %v3291_v10 = vpop.f32.mrf.mxu1 }
 0x5ab   :  { %3339 = vst.msk [vmem:[#allocation4 + $0x48] sm:$0xff] %vm1755_vm2, %v3297_v13  ;;  %v3292_v22 = vadd.f32 %v3478_v51, %v3291_v10 }
 0x5ad   :  { %3338 = vst.msk [vmem:[#allocation4 + $0x40] sm:$0xff] %vm1755_vm2, %v3292_v22 }
 0x5cb   :  { %v3610_v53 = vpop.f32.mrf.mxu1 }
 0x5cc   :  { %v3307_v32 = vadd.f32 %v3610_v53, %v3478_v51 }
 0x5cd   :  { %v3301_v5 = vpop.f32.mrf.mxu1 }
 0x5ce   :  { %3341 = vst.msk [vmem:[#allocation4 + $0x58] sm:$0xff] %vm1755_vm2, %v3307_v32  ;;  %v3302_v62 = vadd.f32 %v3478_v51, %v3301_v5 }
 0x5d0   :  { %3340 = vst.msk [vmem:[#allocation4 + $0x50] sm:$0xff] %vm1755_vm2, %v3302_v62 }
 0x5f4   :  { %v3613_v37 = vpop.f32.mrf.mxu1 }
 0x5f5   :  { %v3317_v30 = vadd.f32 %v3613_v37, %v3478_v51 }
 0x5f6   :  { %v3311_v35 = vpop.f32.mrf.mxu1 }
 0x5f7   :  { %3343 = vst.msk [vmem:[#allocation4 + $0x68] sm:$0xff] %vm1755_vm2, %v3317_v30  ;;  %v3312_v56 = vadd.f32 %v3478_v51, %v3311_v35 }
 0x5f9   :  { %3342 = vst.msk [vmem:[#allocation4 + $0x60] sm:$0xff] %vm1755_vm2, %v3312_v56 }
 0x608   :  { %v3616_v46 = vpop.f32.mrf.mxu1 }
 0x609   :  { %v3327_v44 = vadd.f32 %v3616_v46, %v3478_v51 }
 0x60a   :  { %v3321_v33 = vpop.f32.mrf.mxu1 }
 0x60b   :  { %3345 = vst.msk [vmem:[#allocation4 + $0x78] sm:$0xff] %vm1755_vm2, %v3327_v44  ;;  %v3322_v50 = vadd.f32 %v3478_v51, %v3321_v33 }
 0x60d   :  { %3344 = vst.msk [vmem:[#allocation4 + $0x70] sm:$0xff] %vm1755_vm2, %v3322_v50 }
 0x613   :  { %v3595_v16 = vpop.f32.mrf.mxu0 }
 0x614   :  { %v3257_v24 = vadd.f32 %v3595_v16, %v3478_v51 }
 0x615   :  { %v3251_v20 = vpop.f32.mrf.mxu0 }
 0x616   :  { %3331 = vst.msk [vmem:[#allocation4 + $0x8] sm:$0xff] %vm1755_vm2, %v3257_v24  ;;  %v3252_v40 = vadd.f32 %v3478_v51, %v3251_v20 }
 0x618   :  { %3330 = vst.msk [vmem:[#allocation4] sm:$0xff] %vm1755_vm2, %v3252_v40 }
 0x619   :  { %3665 = shalt.err (!%p3662_p4)
}
 0x61a   :  { %s3690_s4 = smov 128  }
 0x61b   :  { %3357 = dma.vmem_to_hbm [thread:$0]  %s3352_s29, 2048, %s6376_s9, [#allocation5], %s3690_s4, %s3690_s4, %s3677_s23  }
 0x61c   :  { %3674 = dma.done.wait [#allocation5], 2048  }
 0x61d   :  { %3675 = vsyncadd [#allocation5], 4294965248 }
 0x61e   :  { %3361 = vsyncpa [#allocation5], 1 }

</bundles_post_ra>
